<compile_context>
chip_gen: v7x
topology: tpu7x:2x2x1
jax: 0.10.0
libtpu: 0.0.40
codegen_flags: <defaults>
</compile_context>

<pallas_src>
import functools

import numpy as np
import jax
import jax.numpy as jnp
from jax import lax
from jax.experimental import pallas as pl
from jax.experimental.pallas import tpu as pltpu

EPS = 1e-5


# -----------------------------------------------------------------------------
# Fused SAB kernel (one grid step == one batch block, fully VMEM resident)
# -----------------------------------------------------------------------------
def _sab_fused_kernel(f_ref, x_ref,
                      w1_ref, s1_ref, t1_ref,
                      w2_ref, s2_ref, t2_ref,
                      wsa_ref,
                      w3_ref, b3_ref,
                      w4_ref,
                      e_ref, b4_ref,
                      xout_ref, fout_ref,
                      pad_c, pad_sa, *, H, W, C, NB):
    WC = W * C
    NH = NB * H
    f32 = jnp.float32
    bf16 = jnp.bfloat16

    # Zero only the vertical halo rows (horizontal "same" padding is folded into the
    # banded weights).  Re-zeroed every step: trivial cost and safe no matter how the
    # parallel grid axis is split across TensorCores (scratch is per-core).
    zc = jnp.zeros((NB, 1, WC), pad_c.dtype)
    pad_c[:, 0:1, :] = zc
    pad_c[:, H + 1:H + 2, :] = zc
    zs = jnp.zeros((NB, 3, 2 * W), pad_sa.dtype)
    pad_sa[:, 0:3, :] = zs
    pad_sa[:, H + 3:H + 6, :] = zs

    def conv3x3(src, w_ref):
        # "same" 3x3 conv via 3 banded matmuls (one per kernel row).  src: (NB,H,W*C) f32.
        pad_c[:, 1:H + 1, :] = src
        ncol = w_ref.shape[-1]
        acc = jnp.zeros((NH, ncol), f32)
        for ky in range(3):
            slab = src if ky == 1 else pad_c[:, ky:ky + H, :]      # (NB, H, W*C)
            slab = slab.reshape(NH, WC).astype(bf16)
            acc = acc + jnp.dot(slab, w_ref[ky], preferred_element_type=f32)
        return acc                                                 # (NH, W*Cout) f32

    # ---- body: conv1 (+bias+BN1 folded) -> ReLU --------------------------------
    h = conv3x3(f_ref[...], w1_ref)
    h = jnp.maximum(h * s1_ref[...] + t1_ref[...], 0.0)            # (NH, WC)

    # ---- body: conv2 (+bias+BN2+BN3 folded) ------------------------------------
    fb = conv3x3(h.reshape(NB, H, WC), w2_ref)
    fb = fb * s2_ref[...] + t2_ref[...]                            # f_body, (NH, WC)

    # ---- SALayer: per-pixel channel mean/max -> banded 7x7 conv -> sigmoid gate -
    avg_cols, max_cols = [], []
    for xx in range(W):                                            # 16-lane channel groups
        grp = fb[:, xx * C:(xx + 1) * C]
        avg_cols.append(jnp.mean(grp, axis=-1, keepdims=True))
        max_cols.append(jnp.max(grp, axis=-1, keepdims=True))
    avg = jnp.concatenate(avg_cols, axis=-1)                       # (NH, W)
    mx = jnp.concatenate(max_cols, axis=-1)                        # (NH, W)
    pooled = jnp.concatenate([avg, mx], axis=-1).reshape(NB, H, 2 * W)   # planar [c*W+x]

    pad_sa[:, 3:H + 3, :] = pooled
    attn = jnp.zeros((NH, W), f32)
    for ky in range(7):                                            # banded 7x7 conv
        slab = pooled if ky == 3 else pad_sa[:, ky:ky + H, :]
        slab = slab.reshape(NH, 2 * W).astype(bf16)
        attn = attn + jnp.dot(slab, wsa_ref[ky], preferred_element_type=f32)
    gate = jax.nn.sigmoid(attn)                                    # (NH, W)
    gate_wc = jnp.dot(gate, e_ref[...], preferred_element_type=f32)       # (NH, WC)
    f_sa = fb * gate_wc
    fout_ref[...] = f_sa.reshape(NB, H, WC)

    # ---- body2: conv3 (+bias) -> ReLU -------------------------------------------
    h2 = jnp.maximum(conv3x3(f_sa.reshape(NB, H, WC), w3_ref) + b3_ref[...], 0.0)

    # ---- body2: conv4 (C -> 1) + bias; residual add broadcasts over x's channels -
    # (matches the PyTorch `x += res` broadcast of the 1-channel res over x)
    res = conv3x3(h2.reshape(NB, H, WC), w4_ref) + b4_ref[0]       # (NH, W)
    res_wc = jnp.dot(res, e_ref[...], preferred_element_type=f32)          # (NH, WC)
    xout_ref[...] = x_ref[...] + res_wc.reshape(NB, H, WC)


# -----------------------------------------------------------------------------
# Wrapper helpers
# -----------------------------------------------------------------------------
def fold_bn(scale, shift, gamma, beta, mean, var, eps=EPS):
    """Given y = conv*scale + shift, fold a following BatchNorm (eval mode)."""
    s = gamma / jnp.sqrt(var + eps)
    return scale * s, (shift - mean) * s + beta


def _shift_select(W, K):
    """S[x, k, q] = 1 iff q == x + k - K//2 lies in [0, W)  ('same' padding taps)."""
    S = np.zeros((W, K, W), np.float32)
    half = K // 2
    for x in range(W):
        for k in range(K):
            q = x + k - half
            if 0 <= q < W:
                S[x, k, q] = 1.0
    return S


def _banded_conv_w(w_hwio, W, channels_planar=False):
    """HWIO (KH,KW,Cin,Cout) -> (KH, W*Cin, W*Cout) banded matrices so a 'same' KxK conv
    becomes  out[(n,y), x*Cout+co] = sum_ky  vpad_row(n, y+ky-KH//2) @ B[ky]."""
    KH, KW, Cin, Cout = w_hwio.shape
    S = jnp.asarray(_shift_select(W, KW))
    if channels_planar:   # pad row laid out [ci*W + x]  (SA pooled planes)
        B = jnp.einsum("xkq,dkio->diqxo", S, w_hwio)
    else:                 # pad row laid out [x*Cin + ci] (flattened NHWC rows)
        B = jnp.einsum("xkq,dkio->dqixo", S, w_hwio)
    return B.reshape(KH, W * Cin, W * Cout)


def _channel_broadcast_matrix(W, C):
    """E[x, x*C + c] = 1 : expands a per-(pixel-column) scalar to all C channels."""
    E = np.zeros((W, W * C), np.float32)
    for x in range(W):
        E[x, x * C:(x + 1) * C] = 1.0
    return jnp.asarray(E)


def _default_batch_block(N):
    """Whole batch in one grid step on single-TC chips (v5e/v6e); split the batch across
    the two TensorCores on v7x via the parallel grid axis."""
    try:
        kind = jax.devices()[0].device_kind.lower()
    except Exception:
        kind = ""
    if ("v7" in kind or "7x" in kind) and N >= 2 and N % 2 == 0:
        return N // 2
    return N


# -----------------------------------------------------------------------------
# Wrapper
# -----------------------------------------------------------------------------
def sab_forward_pallas(x, f, params, n_blk=None):
    """x, f: NHWC f32. Returns (x_out, f_out) exactly as SAB.forward -> [x, f]."""
    N, H, W, C = f.shape
    WC = W * C
    if n_blk is None:
        n_blk = _default_batch_block(N)
    assert N % n_blk == 0
    grid_n = N // n_blk

    # Fold conv biases + chained inference-mode BatchNorms into per-channel affines.
    ones_c = jnp.ones((C,), jnp.float32)
    s1, t1 = fold_bn(ones_c, params["b1"], *params["bn1"])
    s2, t2 = fold_bn(ones_c, params["b2"], *params["bn2"])
    s2, t2 = fold_bn(s2, t2, *params["bn3"])

    def row(v):   # per-channel vector -> lane-dense (1, W*C) row, replicated over x
        return jnp.tile(v.astype(jnp.float32), (W,)).reshape(1, WC)

    # Banded conv weights (bf16 feeds the MXU at full rate, f32 accumulation).
    w1 = _banded_conv_w(params["w1"], W).astype(jnp.bfloat16)        # (3, WC, WC)
    w2 = _banded_conv_w(params["w2"], W).astype(jnp.bfloat16)        # (3, WC, WC)
    w3 = _banded_conv_w(params["w3"], W).astype(jnp.bfloat16)        # (3, WC, WC)
    w4 = _banded_conv_w(params["w4"], W).astype(jnp.bfloat16)        # (3, WC, W)
    wsa = _banded_conv_w(params["wsa"], W, channels_planar=True).astype(jnp.bfloat16)  # (7, 2W, W)
    e = _channel_broadcast_matrix(W, C)                              # (W, WC) f32

    # Lane-dense activation layout: (N, H, W*C) -- free reshape of contiguous NHWC.
    f2 = f.reshape(N, H, WC)
    x2 = x.reshape(N, H, WC)

    act_spec = pl.BlockSpec((n_blk, H, WC), lambda i: (i, 0, 0))

    def w3d(shape):
        return pl.BlockSpec(shape, lambda i: (0, 0, 0))

    def w2d(shape):
        return pl.BlockSpec(shape, lambda i: (0, 0))

    smem_spec = pl.BlockSpec(memory_space=pltpu.MemorySpace.SMEM)

    kernel = functools.partial(_sab_fused_kernel, H=H, W=W, C=C, NB=n_blk)

    x_out, f_out = pl.pallas_call(
        kernel,
        grid=(grid_n,),
        out_shape=(jax.ShapeDtypeStruct((N, H, WC), jnp.float32),
                   jax.ShapeDtypeStruct((N, H, WC), jnp.float32)),
        in_specs=[
            act_spec,                              # f
            act_spec,                              # x (aliased into x_out)
            w3d(w1.shape),                         # banded conv1
            w2d((1, WC)), w2d((1, WC)),            # s1, t1
            w3d(w2.shape),                         # banded conv2
            w2d((1, WC)), w2d((1, WC)),            # s2, t2
            w3d(wsa.shape),                        # banded SA conv
            w3d(w3.shape),                         # banded conv3
            w2d((1, WC)),                          # b3 row
            w3d(w4.shape),                         # banded conv4
            w2d((W, WC)),                          # channel-broadcast matrix E
            smem_spec,                             # b4 (scalar, SMEM)
        ],
        out_specs=(act_spec, act_spec),
        scratch_shapes=[
            pltpu.VMEM((n_blk, H + 2, WC), jnp.float32),      # vertical-pad conv buffer
            pltpu.VMEM((n_blk, H + 6, 2 * W), jnp.float32),   # vertical-pad SA buffer
        ],
        input_output_aliases={1: 0},
        compiler_params=pltpu.CompilerParams(
            dimension_semantics=("parallel",)),
    )(f2, x2, w1, row(s1), row(t1), w2, row(s2), row(t2), wsa,
      w3, row(params["b3"]), w4, e, params["b4"].astype(jnp.float32))

    return x_out.reshape(N, H, W, C), f_out.reshape(N, H, W, C)


# -----------------------------------------------------------------------------
# Pure-JAX reference (for correctness check)
# -----------------------------------------------------------------------------
def sab_forward_ref(x, f, params):
    def conv(h, w, b):
        y = lax.conv_general_dilated(h, w, (1, 1), "SAME",
                                     dimension_numbers=("NHWC", "HWIO", "NHWC"))
        return y + b

    def bn(y, p):
        g, be, m, v = p
        return (y - m) * g / jnp.sqrt(v + EPS) + be

    h = jnp.maximum(bn(conv(f, params["w1"], params["b1"]), params["bn1"]), 0.0)
    h = bn(bn(conv(h, params["w2"], params["b2"]), params["bn2"]), params["bn3"])
    avg = jnp.mean(h, axis=-1, keepdims=True)
    mx = jnp.max(h, axis=-1, keepdims=True)
    pooled = jnp.concatenate([avg, mx], axis=-1)
    attn = lax.conv_general_dilated(pooled, params["wsa"], (1, 1), "SAME",
                                    dimension_numbers=("NHWC", "HWIO", "NHWC"))
    f_sa = h * jax.nn.sigmoid(attn)
    h2 = jnp.maximum(conv(f_sa, params["w3"], params["b3"]), 0.0)
    res = conv(h2, params["w4"], params["b4"])
    return x + res, f_sa


def init_params(C, key):
    ks = iter(jax.random.split(key, 32))

    def w(shape, scale=0.05):
        return scale * jax.random.normal(next(ks), shape, jnp.float32)

    def bn(c):
        g = 0.5 + jax.random.uniform(next(ks), (c,), jnp.float32)
        b = 0.1 * jax.random.normal(next(ks), (c,), jnp.float32)
        m = 0.1 * jax.random.normal(next(ks), (c,), jnp.float32)
        v = 0.5 + jax.random.uniform(next(ks), (c,), jnp.float32)
        return (g, b, m, v)

    return dict(
        w1=w((3, 3, C, C)), b1=w((C,), 0.02), bn1=bn(C),
        w2=w((3, 3, C, C)), b2=w((C,), 0.02), bn2=bn(C), bn3=bn(C),
        wsa=w((7, 7, 2, 1)),
        w3=w((3, 3, C, C)), b3=w((C,), 0.02),
        w4=w((3, 3, C, 1)), b4=w((1,), 0.02),
    )


if __name__ == "__main__":
    N, C, H, W = 2, 16, 16, 16
    key = jax.random.PRNGKey(0)
    kx, kf, kp = jax.random.split(key, 3)

    # PyTorch-convention NCHW inputs, transposed to kernel layout NHWC.
    x_nchw = jax.random.normal(kx, (N, C, H, W), jnp.float32)
    f_nchw = jax.random.normal(kf, (N, C, H, W), jnp.float32)
    x = jnp.transpose(x_nchw, (0, 2, 3, 1))
    f = jnp.transpose(f_nchw, (0, 2, 3, 1))

    params = init_params(C, kp)

    x_out, f_out = jax.jit(sab_forward_pallas)(x, f, params)
    jax.block_until_ready((x_out, f_out))

    x_ref_o, f_ref_o = sab_forward_ref(x, f, params)
    assert x_out.shape == (N, H, W, C) and f_out.shape == (N, H, W, C)
    # bf16 matmul operands with f32 accumulation -> slightly relaxed tolerance.
    assert jnp.allclose(x_out, x_ref_o, atol=2e-2, rtol=2e-2), \
        float(jnp.max(jnp.abs(x_out - x_ref_o)))
    assert jnp.allclose(f_out, f_ref_o, atol=2e-2, rtol=2e-2), \
        float(jnp.max(jnp.abs(f_out - f_ref_o)))

    print("KERNEL_OK")
</pallas_src>

<mosaic_0001>
module attributes {stable_mosaic.version = 11 : i64} {
  func.func @_sab_fused_kernel(%arg0: i32, %arg1: memref<2x16x256xf32, #tpu.memory_space<vmem>>, %arg2: memref<2x16x256xf32, #tpu.memory_space<vmem>>, %arg3: memref<3x256x256xbf16, #tpu.memory_space<vmem>>, %arg4: memref<1x256xf32, #tpu.memory_space<vmem>>, %arg5: memref<1x256xf32, #tpu.memory_space<vmem>>, %arg6: memref<3x256x256xbf16, #tpu.memory_space<vmem>>, %arg7: memref<1x256xf32, #tpu.memory_space<vmem>>, %arg8: memref<1x256xf32, #tpu.memory_space<vmem>>, %arg9: memref<7x32x16xbf16, #tpu.memory_space<vmem>>, %arg10: memref<3x256x256xbf16, #tpu.memory_space<vmem>>, %arg11: memref<1x256xf32, #tpu.memory_space<vmem>>, %arg12: memref<3x256x16xbf16, #tpu.memory_space<vmem>>, %arg13: memref<16x256xf32, #tpu.memory_space<vmem>>, %arg14: memref<1xf32, #tpu.memory_space<smem>>, %arg15: memref<2x16x256xf32, #tpu.memory_space<vmem>>, %arg16: memref<2x16x256xf32, #tpu.memory_space<vmem>>, %arg17: memref<2x18x256xf32, #tpu.memory_space<vmem>>, %arg18: memref<2x22x32xf32, #tpu.memory_space<vmem>>) attributes {dimension_semantics = [#tpu.dimension_semantics<parallel>], iteration_bounds = array<i64: 1>, scalar_prefetch = 0 : i64, scratch_operands = 2 : i64, tpu.core_type = #tpu.core_type<tc>, window_params = [{transform_indices = @transform_0, window_bounds = array<i64: 2, 16, 256>}, {transform_indices = @transform_1, window_bounds = array<i64: 2, 16, 256>}, {pipeline_mode = #tpu.pipeline_mode<synchronous>, transform_indices = @transform_2, window_bounds = array<i64: 3, 256, 256>}, {pipeline_mode = #tpu.pipeline_mode<synchronous>, transform_indices = @transform_3, window_bounds = array<i64: 1, 256>}, {pipeline_mode = #tpu.pipeline_mode<synchronous>, transform_indices = @transform_4, window_bounds = array<i64: 1, 256>}, {pipeline_mode = #tpu.pipeline_mode<synchronous>, transform_indices = @transform_5, window_bounds = array<i64: 3, 256, 256>}, {pipeline_mode = #tpu.pipeline_mode<synchronous>, transform_indices = @transform_6, window_bounds = array<i64: 1, 256>}, {pipeline_mode = #tpu.pipeline_mode<synchronous>, transform_indices = @transform_7, window_bounds = array<i64: 1, 256>}, {pipeline_mode = #tpu.pipeline_mode<synchronous>, transform_indices = @transform_8, window_bounds = array<i64: 7, 32, 16>}, {pipeline_mode = #tpu.pipeline_mode<synchronous>, transform_indices = @transform_9, window_bounds = array<i64: 3, 256, 256>}, {pipeline_mode = #tpu.pipeline_mode<synchronous>, transform_indices = @transform_10, window_bounds = array<i64: 1, 256>}, {pipeline_mode = #tpu.pipeline_mode<synchronous>, transform_indices = @transform_11, window_bounds = array<i64: 3, 256, 16>}, {pipeline_mode = #tpu.pipeline_mode<synchronous>, transform_indices = @transform_12, window_bounds = array<i64: 16, 256>}, {transform_indices = @transform_13, window_bounds = array<i64: 1>}, {transform_indices = @transform_14, window_bounds = array<i64: 2, 16, 256>}, {transform_indices = @transform_15, window_bounds = array<i64: 2, 16, 256>}]} {
    %cst = arith.constant 0.000000e+00 : f32
    %0 = vector.broadcast %cst : f32 to vector<2x1x256xf32>
    %c0 = arith.constant 0 : index
    %c0_0 = arith.constant 0 : index
    %c0_1 = arith.constant 0 : index
    %1 = vector.load %arg17[%c0, %c0_0, %c0_1] : memref<2x18x256xf32, #tpu.memory_space<vmem>>, vector<2x1x256xf32>
    tpu.vector_store %arg17[%c0, %c0_0, %c0_1], %0 {strides = array<i32>} : memref<2x18x256xf32, #tpu.memory_space<vmem>>, vector<2x1x256xf32>,
    %c0_2 = arith.constant 0 : index
    %c17 = arith.constant 17 : index
    %c0_3 = arith.constant 0 : index
    %2 = vector.load %arg17[%c0_2, %c17, %c0_3] : memref<2x18x256xf32, #tpu.memory_space<vmem>>, vector<2x1x256xf32>
    tpu.vector_store %arg17[%c0_2, %c17, %c0_3], %0 {strides = array<i32>} : memref<2x18x256xf32, #tpu.memory_space<vmem>>, vector<2x1x256xf32>,
    %cst_4 = arith.constant 0.000000e+00 : f32
    %3 = vector.broadcast %cst_4 : f32 to vector<2x3x32xf32>
    %c0_5 = arith.constant 0 : index
    %c0_6 = arith.constant 0 : index
    %c0_7 = arith.constant 0 : index
    %4 = vector.load %arg18[%c0_5, %c0_6, %c0_7] : memref<2x22x32xf32, #tpu.memory_space<vmem>>, vector<2x3x32xf32>
    tpu.vector_store %arg18[%c0_5, %c0_6, %c0_7], %3 {strides = array<i32>} : memref<2x22x32xf32, #tpu.memory_space<vmem>>, vector<2x3x32xf32>,
    %c0_8 = arith.constant 0 : index
    %c19 = arith.constant 19 : index
    %c0_9 = arith.constant 0 : index
    %5 = vector.load %arg18[%c0_8, %c19, %c0_9] : memref<2x22x32xf32, #tpu.memory_space<vmem>>, vector<2x3x32xf32>
    tpu.vector_store %arg18[%c0_8, %c19, %c0_9], %3 {strides = array<i32>} : memref<2x22x32xf32, #tpu.memory_space<vmem>>, vector<2x3x32xf32>,
    %c0_10 = arith.constant 0 : index
    %c0_11 = arith.constant 0 : index
    %c0_12 = arith.constant 0 : index
    %6 = vector.load %arg1[%c0_10, %c0_11, %c0_12] : memref<2x16x256xf32, #tpu.memory_space<vmem>>, vector<2x16x256xf32>
    %c0_13 = arith.constant 0 : index
    %c1 = arith.constant 1 : index
    %c0_14 = arith.constant 0 : index
    %7 = vector.load %arg17[%c0_13, %c1, %c0_14] : memref<2x18x256xf32, #tpu.memory_space<vmem>>, vector<2x16x256xf32>
    tpu.vector_store %arg17[%c0_13, %c1, %c0_14], %6 {strides = array<i32>} : memref<2x18x256xf32, #tpu.memory_space<vmem>>, vector<2x16x256xf32>,
    %cst_15 = arith.constant 0.000000e+00 : f32
    %8 = vector.broadcast %cst_15 : f32 to vector<32x256xf32>
    %c0_16 = arith.constant 0 : index
    %c0_17 = arith.constant 0 : index
    %c0_18 = arith.constant 0 : index
    %9 = vector.load %arg17[%c0_16, %c0_17, %c0_18] : memref<2x18x256xf32, #tpu.memory_space<vmem>>, vector<2x16x256xf32>
    %10 = vector.shape_cast %9 : vector<2x16x256xf32> to vector<32x256xf32>
    %11 = arith.truncf %10 : vector<32x256xf32> to vector<32x256xbf16>
    %c0_19 = arith.constant 0 : index
    %c0_20 = arith.constant 0 : index
    %c0_21 = arith.constant 0 : index
    %12 = vector.load %arg3[%c0_19, %c0_20, %c0_21] : memref<3x256x256xbf16, #tpu.memory_space<vmem>>, vector<1x256x256xbf16>
    %13 = vector.shape_cast %12 : vector<1x256x256xbf16> to vector<256x256xbf16>
    %cst_22 = arith.constant dense<0.000000e+00> : vector<32x256xf32>
    %14 = tpu.matmul %11, %13, %cst_22 {dimension_numbers = #tpu.dot_dimension_numbers<[1], [0], [0], [1], [0, 0, 1, 1], [], []>} : vector<32x256xbf16>, vector<256x256xbf16>, vector<32x256xf32> -> vector<32x256xf32>
    %15 = arith.addf %8, %14 : vector<32x256xf32>
    %16 = vector.shape_cast %6 : vector<2x16x256xf32> to vector<32x256xf32>
    %17 = arith.truncf %16 : vector<32x256xf32> to vector<32x256xbf16>
    %c1_23 = arith.constant 1 : index
    %c0_24 = arith.constant 0 : index
    %c0_25 = arith.constant 0 : index
    %18 = vector.load %arg3[%c1_23, %c0_24, %c0_25] : memref<3x256x256xbf16, #tpu.memory_space<vmem>>, vector<1x256x256xbf16>
    %19 = vector.shape_cast %18 : vector<1x256x256xbf16> to vector<256x256xbf16>
    %cst_26 = arith.constant dense<0.000000e+00> : vector<32x256xf32>
    %20 = tpu.matmul %17, %19, %cst_26 {dimension_numbers = #tpu.dot_dimension_numbers<[1], [0], [0], [1], [0, 0, 1, 1], [], []>} : vector<32x256xbf16>, vector<256x256xbf16>, vector<32x256xf32> -> vector<32x256xf32>
    %21 = arith.addf %15, %20 : vector<32x256xf32>
    %c0_27 = arith.constant 0 : index
    %c2 = arith.constant 2 : index
    %c0_28 = arith.constant 0 : index
    %22 = vector.load %arg17[%c0_27, %c2, %c0_28] : memref<2x18x256xf32, #tpu.memory_space<vmem>>, vector<2x16x256xf32>
    %23 = vector.shape_cast %22 : vector<2x16x256xf32> to vector<32x256xf32>
    %24 = arith.truncf %23 : vector<32x256xf32> to vector<32x256xbf16>
    %c2_29 = arith.constant 2 : index
    %c0_30 = arith.constant 0 : index
    %c0_31 = arith.constant 0 : index
    %25 = vector.load %arg3[%c2_29, %c0_30, %c0_31] : memref<3x256x256xbf16, #tpu.memory_space<vmem>>, vector<1x256x256xbf16>
    %26 = vector.shape_cast %25 : vector<1x256x256xbf16> to vector<256x256xbf16>
    %cst_32 = arith.constant dense<0.000000e+00> : vector<32x256xf32>
    %27 = tpu.matmul %24, %26, %cst_32 {dimension_numbers = #tpu.dot_dimension_numbers<[1], [0], [0], [1], [0, 0, 1, 1], [], []>} : vector<32x256xbf16>, vector<256x256xbf16>, vector<32x256xf32> -> vector<32x256xf32>
    %28 = arith.addf %21, %27 : vector<32x256xf32>
    %c0_33 = arith.constant 0 : index
    %c0_34 = arith.constant 0 : index
    %29 = vector.load %arg4[%c0_33, %c0_34] : memref<1x256xf32, #tpu.memory_space<vmem>>, vector<1x256xf32>
    %30 = vector.broadcast %29 : vector<1x256xf32> to vector<32x256xf32>
    %31 = arith.mulf %28, %30 : vector<32x256xf32>
    %c0_35 = arith.constant 0 : index
    %c0_36 = arith.constant 0 : index
    %32 = vector.load %arg5[%c0_35, %c0_36] : memref<1x256xf32, #tpu.memory_space<vmem>>, vector<1x256xf32>
    %33 = vector.broadcast %32 : vector<1x256xf32> to vector<32x256xf32>
    %34 = arith.addf %31, %33 : vector<32x256xf32>
    %cst_37 = arith.constant 0.000000e+00 : f32
    %35 = vector.broadcast %cst_37 : f32 to vector<32x256xf32>
    %36 = arith.maximumf %34, %35 : vector<32x256xf32>
    %37 = vector.shape_cast %36 : vector<32x256xf32> to vector<2x16x256xf32>
    %c0_38 = arith.constant 0 : index
    %c1_39 = arith.constant 1 : index
    %c0_40 = arith.constant 0 : index
    %38 = vector.load %arg17[%c0_38, %c1_39, %c0_40] : memref<2x18x256xf32, #tpu.memory_space<vmem>>, vector<2x16x256xf32>
    tpu.vector_store %arg17[%c0_38, %c1_39, %c0_40], %37 {strides = array<i32>} : memref<2x18x256xf32, #tpu.memory_space<vmem>>, vector<2x16x256xf32>,
    %cst_41 = arith.constant 0.000000e+00 : f32
    %39 = vector.broadcast %cst_41 : f32 to vector<32x256xf32>
    %c0_42 = arith.constant 0 : index
    %c0_43 = arith.constant 0 : index
    %c0_44 = arith.constant 0 : index
    %40 = vector.load %arg17[%c0_42, %c0_43, %c0_44] : memref<2x18x256xf32, #tpu.memory_space<vmem>>, vector<2x16x256xf32>
    %41 = vector.shape_cast %40 : vector<2x16x256xf32> to vector<32x256xf32>
    %42 = arith.truncf %41 : vector<32x256xf32> to vector<32x256xbf16>
    %c0_45 = arith.constant 0 : index
    %c0_46 = arith.constant 0 : index
    %c0_47 = arith.constant 0 : index
    %43 = vector.load %arg6[%c0_45, %c0_46, %c0_47] : memref<3x256x256xbf16, #tpu.memory_space<vmem>>, vector<1x256x256xbf16>
    %44 = vector.shape_cast %43 : vector<1x256x256xbf16> to vector<256x256xbf16>
    %cst_48 = arith.constant dense<0.000000e+00> : vector<32x256xf32>
    %45 = tpu.matmul %42, %44, %cst_48 {dimension_numbers = #tpu.dot_dimension_numbers<[1], [0], [0], [1], [0, 0, 1, 1], [], []>} : vector<32x256xbf16>, vector<256x256xbf16>, vector<32x256xf32> -> vector<32x256xf32>
    %46 = arith.addf %39, %45 : vector<32x256xf32>
    %47 = vector.shape_cast %37 : vector<2x16x256xf32> to vector<32x256xf32>
    %48 = arith.truncf %47 : vector<32x256xf32> to vector<32x256xbf16>
    %c1_49 = arith.constant 1 : index
    %c0_50 = arith.constant 0 : index
    %c0_51 = arith.constant 0 : index
    %49 = vector.load %arg6[%c1_49, %c0_50, %c0_51] : memref<3x256x256xbf16, #tpu.memory_space<vmem>>, vector<1x256x256xbf16>
    %50 = vector.shape_cast %49 : vector<1x256x256xbf16> to vector<256x256xbf16>
    %cst_52 = arith.constant dense<0.000000e+00> : vector<32x256xf32>
    %51 = tpu.matmul %48, %50, %cst_52 {dimension_numbers = #tpu.dot_dimension_numbers<[1], [0], [0], [1], [0, 0, 1, 1], [], []>} : vector<32x256xbf16>, vector<256x256xbf16>, vector<32x256xf32> -> vector<32x256xf32>
    %52 = arith.addf %46, %51 : vector<32x256xf32>
    %c0_53 = arith.constant 0 : index
    %c2_54 = arith.constant 2 : index
    %c0_55 = arith.constant 0 : index
    %53 = vector.load %arg17[%c0_53, %c2_54, %c0_55] : memref<2x18x256xf32, #tpu.memory_space<vmem>>, vector<2x16x256xf32>
    %54 = vector.shape_cast %53 : vector<2x16x256xf32> to vector<32x256xf32>
    %55 = arith.truncf %54 : vector<32x256xf32> to vector<32x256xbf16>
    %c2_56 = arith.constant 2 : index
    %c0_57 = arith.constant 0 : index
    %c0_58 = arith.constant 0 : index
    %56 = vector.load %arg6[%c2_56, %c0_57, %c0_58] : memref<3x256x256xbf16, #tpu.memory_space<vmem>>, vector<1x256x256xbf16>
    %57 = vector.shape_cast %56 : vector<1x256x256xbf16> to vector<256x256xbf16>
    %cst_59 = arith.constant dense<0.000000e+00> : vector<32x256xf32>
    %58 = tpu.matmul %55, %57, %cst_59 {dimension_numbers = #tpu.dot_dimension_numbers<[1], [0], [0], [1], [0, 0, 1, 1], [], []>} : vector<32x256xbf16>, vector<256x256xbf16>, vector<32x256xf32> -> vector<32x256xf32>
    %59 = arith.addf %52, %58 : vector<32x256xf32>
    %c0_60 = arith.constant 0 : index
    %c0_61 = arith.constant 0 : index
    %60 = vector.load %arg7[%c0_60, %c0_61] : memref<1x256xf32, #tpu.memory_space<vmem>>, vector<1x256xf32>
    %61 = vector.broadcast %60 : vector<1x256xf32> to vector<32x256xf32>
    %62 = arith.mulf %59, %61 : vector<32x256xf32>
    %c0_62 = arith.constant 0 : index
    %c0_63 = arith.constant 0 : index
    %63 = vector.load %arg8[%c0_62, %c0_63] : memref<1x256xf32, #tpu.memory_space<vmem>>, vector<1x256xf32>
    %64 = vector.broadcast %63 : vector<1x256xf32> to vector<32x256xf32>
    %65 = arith.addf %62, %64 : vector<32x256xf32>
    %66 = vector.extract_strided_slice %65 {offsets = [0, 0], sizes = [32, 16], strides = [1, 1]} : vector<32x256xf32> to vector<32x16xf32>
    %cst_64 = arith.constant dense<0.000000e+00> : vector<32xf32>
    %67 = vector.multi_reduction <add>, %66, %cst_64 [1] : vector<32x16xf32> to vector<32xf32>
    %68 = vector.shape_cast %67 : vector<32xf32> to vector<32x1xf32>
    %cst_65 = arith.constant 1.600000e+01 : f32
    %69 = vector.broadcast %cst_65 : f32 to vector<32x1xf32>
    %70 = arith.divf %68, %69 : vector<32x1xf32>
    %cst_66 = arith.constant dense<0xFF800000> : vector<32xf32>
    %71 = vector.multi_reduction <maximumf>, %66, %cst_66 [1] : vector<32x16xf32> to vector<32xf32>
    %72 = vector.shape_cast %71 : vector<32xf32> to vector<32x1xf32>
    %73 = vector.extract_strided_slice %65 {offsets = [0, 16], sizes = [32, 16], strides = [1, 1]} : vector<32x256xf32> to vector<32x16xf32>
    %cst_67 = arith.constant dense<0.000000e+00> : vector<32xf32>
    %74 = vector.multi_reduction <add>, %73, %cst_67 [1] : vector<32x16xf32> to vector<32xf32>
    %75 = vector.shape_cast %74 : vector<32xf32> to vector<32x1xf32>
    %cst_68 = arith.constant 1.600000e+01 : f32
    %76 = vector.broadcast %cst_68 : f32 to vector<32x1xf32>
    %77 = arith.divf %75, %76 : vector<32x1xf32>
    %cst_69 = arith.constant dense<0xFF800000> : vector<32xf32>
    %78 = vector.multi_reduction <maximumf>, %73, %cst_69 [1] : vector<32x16xf32> to vector<32xf32>
    %79 = vector.shape_cast %78 : vector<32xf32> to vector<32x1xf32>
    %80 = vector.extract_strided_slice %65 {offsets = [0, 32], sizes = [32, 16], strides = [1, 1]} : vector<32x256xf32> to vector<32x16xf32>
    %cst_70 = arith.constant dense<0.000000e+00> : vector<32xf32>
    %81 = vector.multi_reduction <add>, %80, %cst_70 [1] : vector<32x16xf32> to vector<32xf32>
    %82 = vector.shape_cast %81 : vector<32xf32> to vector<32x1xf32>
    %cst_71 = arith.constant 1.600000e+01 : f32
    %83 = vector.broadcast %cst_71 : f32 to vector<32x1xf32>
    %84 = arith.divf %82, %83 : vector<32x1xf32>
    %cst_72 = arith.constant dense<0xFF800000> : vector<32xf32>
    %85 = vector.multi_reduction <maximumf>, %80, %cst_72 [1] : vector<32x16xf32> to vector<32xf32>
    %86 = vector.shape_cast %85 : vector<32xf32> to vector<32x1xf32>
    %87 = vector.extract_strided_slice %65 {offsets = [0, 48], sizes = [32, 16], strides = [1, 1]} : vector<32x256xf32> to vector<32x16xf32>
    %cst_73 = arith.constant dense<0.000000e+00> : vector<32xf32>
    %88 = vector.multi_reduction <add>, %87, %cst_73 [1] : vector<32x16xf32> to vector<32xf32>
    %89 = vector.shape_cast %88 : vector<32xf32> to vector<32x1xf32>
    %cst_74 = arith.constant 1.600000e+01 : f32
    %90 = vector.broadcast %cst_74 : f32 to vector<32x1xf32>
    %91 = arith.divf %89, %90 : vector<32x1xf32>
    %cst_75 = arith.constant dense<0xFF800000> : vector<32xf32>
    %92 = vector.multi_reduction <maximumf>, %87, %cst_75 [1] : vector<32x16xf32> to vector<32xf32>
    %93 = vector.shape_cast %92 : vector<32xf32> to vector<32x1xf32>
    %94 = vector.extract_strided_slice %65 {offsets = [0, 64], sizes = [32, 16], strides = [1, 1]} : vector<32x256xf32> to vector<32x16xf32>
    %cst_76 = arith.constant dense<0.000000e+00> : vector<32xf32>
    %95 = vector.multi_reduction <add>, %94, %cst_76 [1] : vector<32x16xf32> to vector<32xf32>
    %96 = vector.shape_cast %95 : vector<32xf32> to vector<32x1xf32>
    %cst_77 = arith.constant 1.600000e+01 : f32
    %97 = vector.broadcast %cst_77 : f32 to vector<32x1xf32>
    %98 = arith.divf %96, %97 : vector<32x1xf32>
    %cst_78 = arith.constant dense<0xFF800000> : vector<32xf32>
    %99 = vector.multi_reduction <maximumf>, %94, %cst_78 [1] : vector<32x16xf32> to vector<32xf32>
    %100 = vector.shape_cast %99 : vector<32xf32> to vector<32x1xf32>
    %101 = vector.extract_strided_slice %65 {offsets = [0, 80], sizes = [32, 16], strides = [1, 1]} : vector<32x256xf32> to vector<32x16xf32>
    %cst_79 = arith.constant dense<0.000000e+00> : vector<32xf32>
    %102 = vector.multi_reduction <add>, %101, %cst_79 [1] : vector<32x16xf32> to vector<32xf32>
    %103 = vector.shape_cast %102 : vector<32xf32> to vector<32x1xf32>
    %cst_80 = arith.constant 1.600000e+01 : f32
    %104 = vector.broadcast %cst_80 : f32 to vector<32x1xf32>
    %105 = arith.divf %103, %104 : vector<32x1xf32>
    %cst_81 = arith.constant dense<0xFF800000> : vector<32xf32>
    %106 = vector.multi_reduction <maximumf>, %101, %cst_81 [1] : vector<32x16xf32> to vector<32xf32>
    %107 = vector.shape_cast %106 : vector<32xf32> to vector<32x1xf32>
    %108 = vector.extract_strided_slice %65 {offsets = [0, 96], sizes = [32, 16], strides = [1, 1]} : vector<32x256xf32> to vector<32x16xf32>
    %cst_82 = arith.constant dense<0.000000e+00> : vector<32xf32>
    %109 = vector.multi_reduction <add>, %108, %cst_82 [1] : vector<32x16xf32> to vector<32xf32>
    %110 = vector.shape_cast %109 : vector<32xf32> to vector<32x1xf32>
    %cst_83 = arith.constant 1.600000e+01 : f32
    %111 = vector.broadcast %cst_83 : f32 to vector<32x1xf32>
    %112 = arith.divf %110, %111 : vector<32x1xf32>
    %cst_84 = arith.constant dense<0xFF800000> : vector<32xf32>
    %113 = vector.multi_reduction <maximumf>, %108, %cst_84 [1] : vector<32x16xf32> to vector<32xf32>
    %114 = vector.shape_cast %113 : vector<32xf32> to vector<32x1xf32>
    %115 = vector.extract_strided_slice %65 {offsets = [0, 112], sizes = [32, 16], strides = [1, 1]} : vector<32x256xf32> to vector<32x16xf32>
    %cst_85 = arith.constant dense<0.000000e+00> : vector<32xf32>
    %116 = vector.multi_reduction <add>, %115, %cst_85 [1] : vector<32x16xf32> to vector<32xf32>
    %117 = vector.shape_cast %116 : vector<32xf32> to vector<32x1xf32>
    %cst_86 = arith.constant 1.600000e+01 : f32
    %118 = vector.broadcast %cst_86 : f32 to vector<32x1xf32>
    %119 = arith.divf %117, %118 : vector<32x1xf32>
    %cst_87 = arith.constant dense<0xFF800000> : vector<32xf32>
    %120 = vector.multi_reduction <maximumf>, %115, %cst_87 [1] : vector<32x16xf32> to vector<32xf32>
    %121 = vector.shape_cast %120 : vector<32xf32> to vector<32x1xf32>
    %122 = vector.extract_strided_slice %65 {offsets = [0, 128], sizes = [32, 16], strides = [1, 1]} : vector<32x256xf32> to vector<32x16xf32>
    %cst_88 = arith.constant dense<0.000000e+00> : vector<32xf32>
    %123 = vector.multi_reduction <add>, %122, %cst_88 [1] : vector<32x16xf32> to vector<32xf32>
    %124 = vector.shape_cast %123 : vector<32xf32> to vector<32x1xf32>
    %cst_89 = arith.constant 1.600000e+01 : f32
    %125 = vector.broadcast %cst_89 : f32 to vector<32x1xf32>
    %126 = arith.divf %124, %125 : vector<32x1xf32>
    %cst_90 = arith.constant dense<0xFF800000> : vector<32xf32>
    %127 = vector.multi_reduction <maximumf>, %122, %cst_90 [1] : vector<32x16xf32> to vector<32xf32>
    %128 = vector.shape_cast %127 : vector<32xf32> to vector<32x1xf32>
    %129 = vector.extract_strided_slice %65 {offsets = [0, 144], sizes = [32, 16], strides = [1, 1]} : vector<32x256xf32> to vector<32x16xf32>
    %cst_91 = arith.constant dense<0.000000e+00> : vector<32xf32>
    %130 = vector.multi_reduction <add>, %129, %cst_91 [1] : vector<32x16xf32> to vector<32xf32>
    %131 = vector.shape_cast %130 : vector<32xf32> to vector<32x1xf32>
    %cst_92 = arith.constant 1.600000e+01 : f32
    %132 = vector.broadcast %cst_92 : f32 to vector<32x1xf32>
    %133 = arith.divf %131, %132 : vector<32x1xf32>
    %cst_93 = arith.constant dense<0xFF800000> : vector<32xf32>
    %134 = vector.multi_reduction <maximumf>, %129, %cst_93 [1] : vector<32x16xf32> to vector<32xf32>
    %135 = vector.shape_cast %134 : vector<32xf32> to vector<32x1xf32>
    %136 = vector.extract_strided_slice %65 {offsets = [0, 160], sizes = [32, 16], strides = [1, 1]} : vector<32x256xf32> to vector<32x16xf32>
    %cst_94 = arith.constant dense<0.000000e+00> : vector<32xf32>
    %137 = vector.multi_reduction <add>, %136, %cst_94 [1] : vector<32x16xf32> to vector<32xf32>
    %138 = vector.shape_cast %137 : vector<32xf32> to vector<32x1xf32>
    %cst_95 = arith.constant 1.600000e+01 : f32
    %139 = vector.broadcast %cst_95 : f32 to vector<32x1xf32>
    %140 = arith.divf %138, %139 : vector<32x1xf32>
    %cst_96 = arith.constant dense<0xFF800000> : vector<32xf32>
    %141 = vector.multi_reduction <maximumf>, %136, %cst_96 [1] : vector<32x16xf32> to vector<32xf32>
    %142 = vector.shape_cast %141 : vector<32xf32> to vector<32x1xf32>
    %143 = vector.extract_strided_slice %65 {offsets = [0, 176], sizes = [32, 16], strides = [1, 1]} : vector<32x256xf32> to vector<32x16xf32>
    %cst_97 = arith.constant dense<0.000000e+00> : vector<32xf32>
    %144 = vector.multi_reduction <add>, %143, %cst_97 [1] : vector<32x16xf32> to vector<32xf32>
    %145 = vector.shape_cast %144 : vector<32xf32> to vector<32x1xf32>
    %cst_98 = arith.constant 1.600000e+01 : f32
    %146 = vector.broadcast %cst_98 : f32 to vector<32x1xf32>
    %147 = arith.divf %145, %146 : vector<32x1xf32>
    %cst_99 = arith.constant dense<0xFF800000> : vector<32xf32>
    %148 = vector.multi_reduction <maximumf>, %143, %cst_99 [1] : vector<32x16xf32> to vector<32xf32>
    %149 = vector.shape_cast %148 : vector<32xf32> to vector<32x1xf32>
    %150 = vector.extract_strided_slice %65 {offsets = [0, 192], sizes = [32, 16], strides = [1, 1]} : vector<32x256xf32> to vector<32x16xf32>
    %cst_100 = arith.constant dense<0.000000e+00> : vector<32xf32>
    %151 = vector.multi_reduction <add>, %150, %cst_100 [1] : vector<32x16xf32> to vector<32xf32>
    %152 = vector.shape_cast %151 : vector<32xf32> to vector<32x1xf32>
    %cst_101 = arith.constant 1.600000e+01 : f32
    %153 = vector.broadcast %cst_101 : f32 to vector<32x1xf32>
    %154 = arith.divf %152, %153 : vector<32x1xf32>
    %cst_102 = arith.constant dense<0xFF800000> : vector<32xf32>
    %155 = vector.multi_reduction <maximumf>, %150, %cst_102 [1] : vector<32x16xf32> to vector<32xf32>
    %156 = vector.shape_cast %155 : vector<32xf32> to vector<32x1xf32>
    %157 = vector.extract_strided_slice %65 {offsets = [0, 208], sizes = [32, 16], strides = [1, 1]} : vector<32x256xf32> to vector<32x16xf32>
    %cst_103 = arith.constant dense<0.000000e+00> : vector<32xf32>
    %158 = vector.multi_reduction <add>, %157, %cst_103 [1] : vector<32x16xf32> to vector<32xf32>
    %159 = vector.shape_cast %158 : vector<32xf32> to vector<32x1xf32>
    %cst_104 = arith.constant 1.600000e+01 : f32
    %160 = vector.broadcast %cst_104 : f32 to vector<32x1xf32>
    %161 = arith.divf %159, %160 : vector<32x1xf32>
    %cst_105 = arith.constant dense<0xFF800000> : vector<32xf32>
    %162 = vector.multi_reduction <maximumf>, %157, %cst_105 [1] : vector<32x16xf32> to vector<32xf32>
    %163 = vector.shape_cast %162 : vector<32xf32> to vector<32x1xf32>
    %164 = vector.extract_strided_slice %65 {offsets = [0, 224], sizes = [32, 16], strides = [1, 1]} : vector<32x256xf32> to vector<32x16xf32>
    %cst_106 = arith.constant dense<0.000000e+00> : vector<32xf32>
    %165 = vector.multi_reduction <add>, %164, %cst_106 [1] : vector<32x16xf32> to vector<32xf32>
    %166 = vector.shape_cast %165 : vector<32xf32> to vector<32x1xf32>
    %cst_107 = arith.constant 1.600000e+01 : f32
    %167 = vector.broadcast %cst_107 : f32 to vector<32x1xf32>
    %168 = arith.divf %166, %167 : vector<32x1xf32>
    %cst_108 = arith.constant dense<0xFF800000> : vector<32xf32>
    %169 = vector.multi_reduction <maximumf>, %164, %cst_108 [1] : vector<32x16xf32> to vector<32xf32>
    %170 = vector.shape_cast %169 : vector<32xf32> to vector<32x1xf32>
    %171 = vector.extract_strided_slice %65 {offsets = [0, 240], sizes = [32, 16], strides = [1, 1]} : vector<32x256xf32> to vector<32x16xf32>
    %cst_109 = arith.constant dense<0.000000e+00> : vector<32xf32>
    %172 = vector.multi_reduction <add>, %171, %cst_109 [1] : vector<32x16xf32> to vector<32xf32>
    %173 = vector.shape_cast %172 : vector<32xf32> to vector<32x1xf32>
    %cst_110 = arith.constant 1.600000e+01 : f32
    %174 = vector.broadcast %cst_110 : f32 to vector<32x1xf32>
    %175 = arith.divf %173, %174 : vector<32x1xf32>
    %cst_111 = arith.constant dense<0xFF800000> : vector<32xf32>
    %176 = vector.multi_reduction <maximumf>, %171, %cst_111 [1] : vector<32x16xf32> to vector<32xf32>
    %177 = vector.shape_cast %176 : vector<32xf32> to vector<32x1xf32>
    %178 = tpu.concatenate %70, %77, %84, %91, %98, %105, %112, %119, %126, %133, %140, %147, %154, %161, %168, %175 in 1 : vector<32x1xf32>, vector<32x1xf32>, vector<32x1xf32>, vector<32x1xf32>, vector<32x1xf32>, vector<32x1xf32>, vector<32x1xf32>, vector<32x1xf32>, vector<32x1xf32>, vector<32x1xf32>, vector<32x1xf32>, vector<32x1xf32>, vector<32x1xf32>, vector<32x1xf32>, vector<32x1xf32>, vector<32x1xf32> -> vector<32x16xf32>
    %179 = tpu.concatenate %72, %79, %86, %93, %100, %107, %114, %121, %128, %135, %142, %149, %156, %163, %170, %177 in 1 : vector<32x1xf32>, vector<32x1xf32>, vector<32x1xf32>, vector<32x1xf32>, vector<32x1xf32>, vector<32x1xf32>, vector<32x1xf32>, vector<32x1xf32>, vector<32x1xf32>, vector<32x1xf32>, vector<32x1xf32>, vector<32x1xf32>, vector<32x1xf32>, vector<32x1xf32>, vector<32x1xf32>, vector<32x1xf32> -> vector<32x16xf32>
    %180 = tpu.concatenate %178, %179 in 1 : vector<32x16xf32>, vector<32x16xf32> -> vector<32x32xf32>
    %181 = vector.shape_cast %180 : vector<32x32xf32> to vector<2x16x32xf32>
    %c0_112 = arith.constant 0 : index
    %c3 = arith.constant 3 : index
    %c0_113 = arith.constant 0 : index
    %182 = vector.load %arg18[%c0_112, %c3, %c0_113] : memref<2x22x32xf32, #tpu.memory_space<vmem>>, vector<2x16x32xf32>
    tpu.vector_store %arg18[%c0_112, %c3, %c0_113], %181 {strides = array<i32>} : memref<2x22x32xf32, #tpu.memory_space<vmem>>, vector<2x16x32xf32>,
    %cst_114 = arith.constant 0.000000e+00 : f32
    %183 = vector.broadcast %cst_114 : f32 to vector<32x16xf32>
    %c0_115 = arith.constant 0 : index
    %c0_116 = arith.constant 0 : index
    %c0_117 = arith.constant 0 : index
    %184 = vector.load %arg18[%c0_115, %c0_116, %c0_117] : memref<2x22x32xf32, #tpu.memory_space<vmem>>, vector<2x16x32xf32>
    %185 = vector.shape_cast %184 : vector<2x16x32xf32> to vector<32x32xf32>
    %186 = arith.truncf %185 : vector<32x32xf32> to vector<32x32xbf16>
    %c0_118 = arith.constant 0 : index
    %c0_119 = arith.constant 0 : index
    %c0_120 = arith.constant 0 : index
    %187 = vector.load %arg9[%c0_118, %c0_119, %c0_120] : memref<7x32x16xbf16, #tpu.memory_space<vmem>>, vector<1x32x16xbf16>
    %188 = vector.shape_cast %187 : vector<1x32x16xbf16> to vector<32x16xbf16>
    %cst_121 = arith.constant dense<0.000000e+00> : vector<32x16xf32>
    %189 = tpu.matmul %186, %188, %cst_121 {dimension_numbers = #tpu.dot_dimension_numbers<[1], [0], [0], [1], [0, 0, 1, 1], [], []>} : vector<32x32xbf16>, vector<32x16xbf16>, vector<32x16xf32> -> vector<32x16xf32>
    %190 = arith.addf %183, %189 : vector<32x16xf32>
    %c0_122 = arith.constant 0 : index
    %c1_123 = arith.constant 1 : index
    %c0_124 = arith.constant 0 : index
    %191 = vector.load %arg18[%c0_122, %c1_123, %c0_124] : memref<2x22x32xf32, #tpu.memory_space<vmem>>, vector<2x16x32xf32>
    %192 = vector.shape_cast %191 : vector<2x16x32xf32> to vector<32x32xf32>
    %193 = arith.truncf %192 : vector<32x32xf32> to vector<32x32xbf16>
    %c1_125 = arith.constant 1 : index
    %c0_126 = arith.constant 0 : index
    %c0_127 = arith.constant 0 : index
    %194 = vector.load %arg9[%c1_125, %c0_126, %c0_127] : memref<7x32x16xbf16, #tpu.memory_space<vmem>>, vector<1x32x16xbf16>
    %195 = vector.shape_cast %194 : vector<1x32x16xbf16> to vector<32x16xbf16>
    %cst_128 = arith.constant dense<0.000000e+00> : vector<32x16xf32>
    %196 = tpu.matmul %193, %195, %cst_128 {dimension_numbers = #tpu.dot_dimension_numbers<[1], [0], [0], [1], [0, 0, 1, 1], [], []>} : vector<32x32xbf16>, vector<32x16xbf16>, vector<32x16xf32> -> vector<32x16xf32>
    %197 = arith.addf %190, %196 : vector<32x16xf32>
    %c0_129 = arith.constant 0 : index
    %c2_130 = arith.constant 2 : index
    %c0_131 = arith.constant 0 : index
    %198 = vector.load %arg18[%c0_129, %c2_130, %c0_131] : memref<2x22x32xf32, #tpu.memory_space<vmem>>, vector<2x16x32xf32>
    %199 = vector.shape_cast %198 : vector<2x16x32xf32> to vector<32x32xf32>
    %200 = arith.truncf %199 : vector<32x32xf32> to vector<32x32xbf16>
    %c2_132 = arith.constant 2 : index
    %c0_133 = arith.constant 0 : index
    %c0_134 = arith.constant 0 : index
    %201 = vector.load %arg9[%c2_132, %c0_133, %c0_134] : memref<7x32x16xbf16, #tpu.memory_space<vmem>>, vector<1x32x16xbf16>
    %202 = vector.shape_cast %201 : vector<1x32x16xbf16> to vector<32x16xbf16>
    %cst_135 = arith.constant dense<0.000000e+00> : vector<32x16xf32>
    %203 = tpu.matmul %200, %202, %cst_135 {dimension_numbers = #tpu.dot_dimension_numbers<[1], [0], [0], [1], [0, 0, 1, 1], [], []>} : vector<32x32xbf16>, vector<32x16xbf16>, vector<32x16xf32> -> vector<32x16xf32>
    %204 = arith.addf %197, %203 : vector<32x16xf32>
    %205 = vector.shape_cast %181 : vector<2x16x32xf32> to vector<32x32xf32>
    %206 = arith.truncf %205 : vector<32x32xf32> to vector<32x32xbf16>
    %c3_136 = arith.constant 3 : index
    %c0_137 = arith.constant 0 : index
    %c0_138 = arith.constant 0 : index
    %207 = vector.load %arg9[%c3_136, %c0_137, %c0_138] : memref<7x32x16xbf16, #tpu.memory_space<vmem>>, vector<1x32x16xbf16>
    %208 = vector.shape_cast %207 : vector<1x32x16xbf16> to vector<32x16xbf16>
    %cst_139 = arith.constant dense<0.000000e+00> : vector<32x16xf32>
    %209 = tpu.matmul %206, %208, %cst_139 {dimension_numbers = #tpu.dot_dimension_numbers<[1], [0], [0], [1], [0, 0, 1, 1], [], []>} : vector<32x32xbf16>, vector<32x16xbf16>, vector<32x16xf32> -> vector<32x16xf32>
    %210 = arith.addf %204, %209 : vector<32x16xf32>
    %c0_140 = arith.constant 0 : index
    %c4 = arith.constant 4 : index
    %c0_141 = arith.constant 0 : index
    %211 = vector.load %arg18[%c0_140, %c4, %c0_141] : memref<2x22x32xf32, #tpu.memory_space<vmem>>, vector<2x16x32xf32>
    %212 = vector.shape_cast %211 : vector<2x16x32xf32> to vector<32x32xf32>
    %213 = arith.truncf %212 : vector<32x32xf32> to vector<32x32xbf16>
    %c4_142 = arith.constant 4 : index
    %c0_143 = arith.constant 0 : index
    %c0_144 = arith.constant 0 : index
    %214 = vector.load %arg9[%c4_142, %c0_143, %c0_144] : memref<7x32x16xbf16, #tpu.memory_space<vmem>>, vector<1x32x16xbf16>
    %215 = vector.shape_cast %214 : vector<1x32x16xbf16> to vector<32x16xbf16>
    %cst_145 = arith.constant dense<0.000000e+00> : vector<32x16xf32>
    %216 = tpu.matmul %213, %215, %cst_145 {dimension_numbers = #tpu.dot_dimension_numbers<[1], [0], [0], [1], [0, 0, 1, 1], [], []>} : vector<32x32xbf16>, vector<32x16xbf16>, vector<32x16xf32> -> vector<32x16xf32>
    %217 = arith.addf %210, %216 : vector<32x16xf32>
    %c0_146 = arith.constant 0 : index
    %c5 = arith.constant 5 : index
    %c0_147 = arith.constant 0 : index
    %218 = vector.load %arg18[%c0_146, %c5, %c0_147] : memref<2x22x32xf32, #tpu.memory_space<vmem>>, vector<2x16x32xf32>
    %219 = vector.shape_cast %218 : vector<2x16x32xf32> to vector<32x32xf32>
    %220 = arith.truncf %219 : vector<32x32xf32> to vector<32x32xbf16>
    %c5_148 = arith.constant 5 : index
    %c0_149 = arith.constant 0 : index
    %c0_150 = arith.constant 0 : index
    %221 = vector.load %arg9[%c5_148, %c0_149, %c0_150] : memref<7x32x16xbf16, #tpu.memory_space<vmem>>, vector<1x32x16xbf16>
    %222 = vector.shape_cast %221 : vector<1x32x16xbf16> to vector<32x16xbf16>
    %cst_151 = arith.constant dense<0.000000e+00> : vector<32x16xf32>
    %223 = tpu.matmul %220, %222, %cst_151 {dimension_numbers = #tpu.dot_dimension_numbers<[1], [0], [0], [1], [0, 0, 1, 1], [], []>} : vector<32x32xbf16>, vector<32x16xbf16>, vector<32x16xf32> -> vector<32x16xf32>
    %224 = arith.addf %217, %223 : vector<32x16xf32>
    %c0_152 = arith.constant 0 : index
    %c6 = arith.constant 6 : index
    %c0_153 = arith.constant 0 : index
    %225 = vector.load %arg18[%c0_152, %c6, %c0_153] : memref<2x22x32xf32, #tpu.memory_space<vmem>>, vector<2x16x32xf32>
    %226 = vector.shape_cast %225 : vector<2x16x32xf32> to vector<32x32xf32>
    %227 = arith.truncf %226 : vector<32x32xf32> to vector<32x32xbf16>
    %c6_154 = arith.constant 6 : index
    %c0_155 = arith.constant 0 : index
    %c0_156 = arith.constant 0 : index
    %228 = vector.load %arg9[%c6_154, %c0_155, %c0_156] : memref<7x32x16xbf16, #tpu.memory_space<vmem>>, vector<1x32x16xbf16>
    %229 = vector.shape_cast %228 : vector<1x32x16xbf16> to vector<32x16xbf16>
    %cst_157 = arith.constant dense<0.000000e+00> : vector<32x16xf32>
    %230 = tpu.matmul %227, %229, %cst_157 {dimension_numbers = #tpu.dot_dimension_numbers<[1], [0], [0], [1], [0, 0, 1, 1], [], []>} : vector<32x32xbf16>, vector<32x16xbf16>, vector<32x16xf32> -> vector<32x16xf32>
    %231 = arith.addf %224, %230 : vector<32x16xf32>
    %232 = arith.negf %231 : vector<32x16xf32>
    %233 = math.exp %232 : vector<32x16xf32>
    %cst_158 = arith.constant 1.000000e+00 : f32
    %234 = vector.broadcast %cst_158 : f32 to vector<32x16xf32>
    %235 = arith.addf %234, %233 : vector<32x16xf32>
    %236 = arith.divf %234, %235 : vector<32x16xf32>
    %c0_159 = arith.constant 0 : index
    %c0_160 = arith.constant 0 : index
    %237 = vector.load %arg13[%c0_159, %c0_160] : memref<16x256xf32, #tpu.memory_space<vmem>>, vector<16x256xf32>
    %cst_161 = arith.constant dense<0.000000e+00> : vector<32x256xf32>
    %238 = tpu.matmul %236, %237, %cst_161 {dimension_numbers = #tpu.dot_dimension_numbers<[1], [0], [0], [1], [0, 0, 1, 1], [], []>} : vector<32x16xf32>, vector<16x256xf32>, vector<32x256xf32> -> vector<32x256xf32>
    %239 = arith.mulf %65, %238 : vector<32x256xf32>
    %240 = vector.shape_cast %239 : vector<32x256xf32> to vector<2x16x256xf32>
    %c0_162 = arith.constant 0 : index
    %c0_163 = arith.constant 0 : index
    %c0_164 = arith.constant 0 : index
    %241 = vector.load %arg16[%c0_162, %c0_163, %c0_164] : memref<2x16x256xf32, #tpu.memory_space<vmem>>, vector<2x16x256xf32>
    tpu.vector_store %arg16[%c0_162, %c0_163, %c0_164], %240 {strides = array<i32>} : memref<2x16x256xf32, #tpu.memory_space<vmem>>, vector<2x16x256xf32>,
    %242 = vector.shape_cast %239 : vector<32x256xf32> to vector<2x16x256xf32>
    %c0_165 = arith.constant 0 : index
    %c1_166 = arith.constant 1 : index
    %c0_167 = arith.constant 0 : index
    %243 = vector.load %arg17[%c0_165, %c1_166, %c0_167] : memref<2x18x256xf32, #tpu.memory_space<vmem>>, vector<2x16x256xf32>
    tpu.vector_store %arg17[%c0_165, %c1_166, %c0_167], %242 {strides = array<i32>} : memref<2x18x256xf32, #tpu.memory_space<vmem>>, vector<2x16x256xf32>,
    %cst_168 = arith.constant 0.000000e+00 : f32
    %244 = vector.broadcast %cst_168 : f32 to vector<32x256xf32>
    %c0_169 = arith.constant 0 : index
    %c0_170 = arith.constant 0 : index
    %c0_171 = arith.constant 0 : index
    %245 = vector.load %arg17[%c0_169, %c0_170, %c0_171] : memref<2x18x256xf32, #tpu.memory_space<vmem>>, vector<2x16x256xf32>
    %246 = vector.shape_cast %245 : vector<2x16x256xf32> to vector<32x256xf32>
    %247 = arith.truncf %246 : vector<32x256xf32> to vector<32x256xbf16>
    %c0_172 = arith.constant 0 : index
    %c0_173 = arith.constant 0 : index
    %c0_174 = arith.constant 0 : index
    %248 = vector.load %arg10[%c0_172, %c0_173, %c0_174] : memref<3x256x256xbf16, #tpu.memory_space<vmem>>, vector<1x256x256xbf16>
    %249 = vector.shape_cast %248 : vector<1x256x256xbf16> to vector<256x256xbf16>
    %cst_175 = arith.constant dense<0.000000e+00> : vector<32x256xf32>
    %250 = tpu.matmul %247, %249, %cst_175 {dimension_numbers = #tpu.dot_dimension_numbers<[1], [0], [0], [1], [0, 0, 1, 1], [], []>} : vector<32x256xbf16>, vector<256x256xbf16>, vector<32x256xf32> -> vector<32x256xf32>
    %251 = arith.addf %244, %250 : vector<32x256xf32>
    %252 = vector.shape_cast %242 : vector<2x16x256xf32> to vector<32x256xf32>
    %253 = arith.truncf %252 : vector<32x256xf32> to vector<32x256xbf16>
    %c1_176 = arith.constant 1 : index
    %c0_177 = arith.constant 0 : index
    %c0_178 = arith.constant 0 : index
    %254 = vector.load %arg10[%c1_176, %c0_177, %c0_178] : memref<3x256x256xbf16, #tpu.memory_space<vmem>>, vector<1x256x256xbf16>
    %255 = vector.shape_cast %254 : vector<1x256x256xbf16> to vector<256x256xbf16>
    %cst_179 = arith.constant dense<0.000000e+00> : vector<32x256xf32>
    %256 = tpu.matmul %253, %255, %cst_179 {dimension_numbers = #tpu.dot_dimension_numbers<[1], [0], [0], [1], [0, 0, 1, 1], [], []>} : vector<32x256xbf16>, vector<256x256xbf16>, vector<32x256xf32> -> vector<32x256xf32>
    %257 = arith.addf %251, %256 : vector<32x256xf32>
    %c0_180 = arith.constant 0 : index
    %c2_181 = arith.constant 2 : index
    %c0_182 = arith.constant 0 : index
    %258 = vector.load %arg17[%c0_180, %c2_181, %c0_182] : memref<2x18x256xf32, #tpu.memory_space<vmem>>, vector<2x16x256xf32>
    %259 = vector.shape_cast %258 : vector<2x16x256xf32> to vector<32x256xf32>
    %260 = arith.truncf %259 : vector<32x256xf32> to vector<32x256xbf16>
    %c2_183 = arith.constant 2 : index
    %c0_184 = arith.constant 0 : index
    %c0_185 = arith.constant 0 : index
    %261 = vector.load %arg10[%c2_183, %c0_184, %c0_185] : memref<3x256x256xbf16, #tpu.memory_space<vmem>>, vector<1x256x256xbf16>
    %262 = vector.shape_cast %261 : vector<1x256x256xbf16> to vector<256x256xbf16>
    %cst_186 = arith.constant dense<0.000000e+00> : vector<32x256xf32>
    %263 = tpu.matmul %260, %262, %cst_186 {dimension_numbers = #tpu.dot_dimension_numbers<[1], [0], [0], [1], [0, 0, 1, 1], [], []>} : vector<32x256xbf16>, vector<256x256xbf16>, vector<32x256xf32> -> vector<32x256xf32>
    %264 = arith.addf %257, %263 : vector<32x256xf32>
    %c0_187 = arith.constant 0 : index
    %c0_188 = arith.constant 0 : index
    %265 = vector.load %arg11[%c0_187, %c0_188] : memref<1x256xf32, #tpu.memory_space<vmem>>, vector<1x256xf32>
    %266 = vector.broadcast %265 : vector<1x256xf32> to vector<32x256xf32>
    %267 = arith.addf %264, %266 : vector<32x256xf32>
    %cst_189 = arith.constant 0.000000e+00 : f32
    %268 = vector.broadcast %cst_189 : f32 to vector<32x256xf32>
    %269 = arith.maximumf %267, %268 : vector<32x256xf32>
    %270 = vector.shape_cast %269 : vector<32x256xf32> to vector<2x16x256xf32>
    %c0_190 = arith.constant 0 : index
    %c1_191 = arith.constant 1 : index
    %c0_192 = arith.constant 0 : index
    %271 = vector.load %arg17[%c0_190, %c1_191, %c0_192] : memref<2x18x256xf32, #tpu.memory_space<vmem>>, vector<2x16x256xf32>
    tpu.vector_store %arg17[%c0_190, %c1_191, %c0_192], %270 {strides = array<i32>} : memref<2x18x256xf32, #tpu.memory_space<vmem>>, vector<2x16x256xf32>,
    %cst_193 = arith.constant 0.000000e+00 : f32
    %272 = vector.broadcast %cst_193 : f32 to vector<32x16xf32>
    %c0_194 = arith.constant 0 : index
    %c0_195 = arith.constant 0 : index
    %c0_196 = arith.constant 0 : index
    %273 = vector.load %arg17[%c0_194, %c0_195, %c0_196] : memref<2x18x256xf32, #tpu.memory_space<vmem>>, vector<2x16x256xf32>
    %274 = vector.shape_cast %273 : vector<2x16x256xf32> to vector<32x256xf32>
    %275 = arith.truncf %274 : vector<32x256xf32> to vector<32x256xbf16>
    %c0_197 = arith.constant 0 : index
    %c0_198 = arith.constant 0 : index
    %c0_199 = arith.constant 0 : index
    %276 = vector.load %arg12[%c0_197, %c0_198, %c0_199] : memref<3x256x16xbf16, #tpu.memory_space<vmem>>, vector<1x256x16xbf16>
    %277 = vector.shape_cast %276 : vector<1x256x16xbf16> to vector<256x16xbf16>
    %cst_200 = arith.constant dense<0.000000e+00> : vector<32x16xf32>
    %278 = tpu.matmul %275, %277, %cst_200 {dimension_numbers = #tpu.dot_dimension_numbers<[1], [0], [0], [1], [0, 0, 1, 1], [], []>} : vector<32x256xbf16>, vector<256x16xbf16>, vector<32x16xf32> -> vector<32x16xf32>
    %279 = arith.addf %272, %278 : vector<32x16xf32>
    %280 = vector.shape_cast %270 : vector<2x16x256xf32> to vector<32x256xf32>
    %281 = arith.truncf %280 : vector<32x256xf32> to vector<32x256xbf16>
    %c1_201 = arith.constant 1 : index
    %c0_202 = arith.constant 0 : index
    %c0_203 = arith.constant 0 : index
    %282 = vector.load %arg12[%c1_201, %c0_202, %c0_203] : memref<3x256x16xbf16, #tpu.memory_space<vmem>>, vector<1x256x16xbf16>
    %283 = vector.shape_cast %282 : vector<1x256x16xbf16> to vector<256x16xbf16>
    %cst_204 = arith.constant dense<0.000000e+00> : vector<32x16xf32>
    %284 = tpu.matmul %281, %283, %cst_204 {dimension_numbers = #tpu.dot_dimension_numbers<[1], [0], [0], [1], [0, 0, 1, 1], [], []>} : vector<32x256xbf16>, vector<256x16xbf16>, vector<32x16xf32> -> vector<32x16xf32>
    %285 = arith.addf %279, %284 : vector<32x16xf32>
    %c0_205 = arith.constant 0 : index
    %c2_206 = arith.constant 2 : index
    %c0_207 = arith.constant 0 : index
    %286 = vector.load %arg17[%c0_205, %c2_206, %c0_207] : memref<2x18x256xf32, #tpu.memory_space<vmem>>, vector<2x16x256xf32>
    %287 = vector.shape_cast %286 : vector<2x16x256xf32> to vector<32x256xf32>
    %288 = arith.truncf %287 : vector<32x256xf32> to vector<32x256xbf16>
    %c2_208 = arith.constant 2 : index
    %c0_209 = arith.constant 0 : index
    %c0_210 = arith.constant 0 : index
    %289 = vector.load %arg12[%c2_208, %c0_209, %c0_210] : memref<3x256x16xbf16, #tpu.memory_space<vmem>>, vector<1x256x16xbf16>
    %290 = vector.shape_cast %289 : vector<1x256x16xbf16> to vector<256x16xbf16>
    %cst_211 = arith.constant dense<0.000000e+00> : vector<32x16xf32>
    %291 = tpu.matmul %288, %290, %cst_211 {dimension_numbers = #tpu.dot_dimension_numbers<[1], [0], [0], [1], [0, 0, 1, 1], [], []>} : vector<32x256xbf16>, vector<256x16xbf16>, vector<32x16xf32> -> vector<32x16xf32>
    %292 = arith.addf %285, %291 : vector<32x16xf32>
    %c0_212 = arith.constant 0 : index
    %293 = memref.load %arg14[%c0_212] : memref<1xf32, #tpu.memory_space<smem>>
    %294 = vector.broadcast %293 : f32 to vector<32x16xf32>
    %295 = arith.addf %292, %294 : vector<32x16xf32>
    %c0_213 = arith.constant 0 : index
    %c0_214 = arith.constant 0 : index
    %296 = vector.load %arg13[%c0_213, %c0_214] : memref<16x256xf32, #tpu.memory_space<vmem>>, vector<16x256xf32>
    %cst_215 = arith.constant dense<0.000000e+00> : vector<32x256xf32>
    %297 = tpu.matmul %295, %296, %cst_215 {dimension_numbers = #tpu.dot_dimension_numbers<[1], [0], [0], [1], [0, 0, 1, 1], [], []>} : vector<32x16xf32>, vector<16x256xf32>, vector<32x256xf32> -> vector<32x256xf32>
    %c0_216 = arith.constant 0 : index
    %c0_217 = arith.constant 0 : index
    %c0_218 = arith.constant 0 : index
    %298 = vector.load %arg2[%c0_216, %c0_217, %c0_218] : memref<2x16x256xf32, #tpu.memory_space<vmem>>, vector<2x16x256xf32>
    %299 = vector.shape_cast %297 : vector<32x256xf32> to vector<2x16x256xf32>
    %300 = arith.addf %298, %299 : vector<2x16x256xf32>
    %c0_219 = arith.constant 0 : index
    %c0_220 = arith.constant 0 : index
    %c0_221 = arith.constant 0 : index
    %301 = vector.load %arg15[%c0_219, %c0_220, %c0_221] : memref<2x16x256xf32, #tpu.memory_space<vmem>>, vector<2x16x256xf32>
    tpu.vector_store %arg15[%c0_219, %c0_220, %c0_221], %300 {strides = array<i32>} : memref<2x16x256xf32, #tpu.memory_space<vmem>>, vector<2x16x256xf32>,
    return
  }
  func.func @transform_0(%arg0: i32) -> (i32, i32, i32) {
    %c0_i32 = arith.constant 0 : i32
    %c0_i32_0 = arith.constant 0 : i32
    %c0_i32_1 = arith.constant 0 : i32
    return %arg0, %c0_i32, %c0_i32_0 : i32, i32, i32
  }
  func.func @transform_1(%arg0: i32) -> (i32, i32, i32) {
    %c0_i32 = arith.constant 0 : i32
    %c0_i32_0 = arith.constant 0 : i32
    %c0_i32_1 = arith.constant 0 : i32
    return %arg0, %c0_i32, %c0_i32_0 : i32, i32, i32
  }
  func.func @transform_2(%arg0: i32) -> (i32, i32, i32) {
    %c0_i32 = arith.constant 0 : i32
    %c0_i32_0 = arith.constant 0 : i32
    %c0_i32_1 = arith.constant 0 : i32
    %c0_i32_2 = arith.constant 0 : i32
    return %c0_i32, %c0_i32_0, %c0_i32_1 : i32, i32, i32
  }
  func.func @transform_3(%arg0: i32) -> (i32, i32) {
    %c0_i32 = arith.constant 0 : i32
    %c0_i32_0 = arith.constant 0 : i32
    %c0_i32_1 = arith.constant 0 : i32
    return %c0_i32, %c0_i32_0 : i32, i32
  }
  func.func @transform_4(%arg0: i32) -> (i32, i32) {
    %c0_i32 = arith.constant 0 : i32
    %c0_i32_0 = arith.constant 0 : i32
    %c0_i32_1 = arith.constant 0 : i32
    return %c0_i32, %c0_i32_0 : i32, i32
  }
  func.func @transform_5(%arg0: i32) -> (i32, i32, i32) {
    %c0_i32 = arith.constant 0 : i32
    %c0_i32_0 = arith.constant 0 : i32
    %c0_i32_1 = arith.constant 0 : i32
    %c0_i32_2 = arith.constant 0 : i32
    return %c0_i32, %c0_i32_0, %c0_i32_1 : i32, i32, i32
  }
  func.func @transform_6(%arg0: i32) -> (i32, i32) {
    %c0_i32 = arith.constant 0 : i32
    %c0_i32_0 = arith.constant 0 : i32
    %c0_i32_1 = arith.constant 0 : i32
    return %c0_i32, %c0_i32_0 : i32, i32
  }
  func.func @transform_7(%arg0: i32) -> (i32, i32) {
    %c0_i32 = arith.constant 0 : i32
    %c0_i32_0 = arith.constant 0 : i32
    %c0_i32_1 = arith.constant 0 : i32
    return %c0_i32, %c0_i32_0 : i32, i32
  }
  func.func @transform_8(%arg0: i32) -> (i32, i32, i32) {
    %c0_i32 = arith.constant 0 : i32
    %c0_i32_0 = arith.constant 0 : i32
    %c0_i32_1 = arith.constant 0 : i32
    %c0_i32_2 = arith.constant 0 : i32
    return %c0_i32, %c0_i32_0, %c0_i32_1 : i32, i32, i32
  }
  func.func @transform_9(%arg0: i32) -> (i32, i32, i32) {
    %c0_i32 = arith.constant 0 : i32
    %c0_i32_0 = arith.constant 0 : i32
    %c0_i32_1 = arith.constant 0 : i32
    %c0_i32_2 = arith.constant 0 : i32
    return %c0_i32, %c0_i32_0, %c0_i32_1 : i32, i32, i32
  }
  func.func @transform_10(%arg0: i32) -> (i32, i32) {
    %c0_i32 = arith.constant 0 : i32
    %c0_i32_0 = arith.constant 0 : i32
    %c0_i32_1 = arith.constant 0 : i32
    return %c0_i32, %c0_i32_0 : i32, i32
  }
  func.func @transform_11(%arg0: i32) -> (i32, i32, i32) {
    %c0_i32 = arith.constant 0 : i32
    %c0_i32_0 = arith.constant 0 : i32
    %c0_i32_1 = arith.constant 0 : i32
    %c0_i32_2 = arith.constant 0 : i32
    return %c0_i32, %c0_i32_0, %c0_i32_1 : i32, i32, i32
  }
  func.func @transform_12(%arg0: i32) -> (i32, i32) {
    %c0_i32 = arith.constant 0 : i32
    %c0_i32_0 = arith.constant 0 : i32
    %c0_i32_1 = arith.constant 0 : i32
    return %c0_i32, %c0_i32_0 : i32, i32
  }
  func.func @transform_13(%arg0: i32) -> i32 {
    %c0_i32 = arith.constant 0 : i32
    %c0_i32_0 = arith.constant 0 : i32
    return %c0_i32 : i32
  }
  func.func @transform_14(%arg0: i32) -> (i32, i32, i32) {
    %c0_i32 = arith.constant 0 : i32
    %c0_i32_0 = arith.constant 0 : i32
    %c0_i32_1 = arith.constant 0 : i32
    return %arg0, %c0_i32, %c0_i32_0 : i32, i32, i32
  }
  func.func @transform_15(%arg0: i32) -> (i32, i32, i32) {
    %c0_i32 = arith.constant 0 : i32
    %c0_i32_0 = arith.constant 0 : i32
    %c0_i32_1 = arith.constant 0 : i32
    return %arg0, %c0_i32, %c0_i32_0 : i32, i32, i32
  }
}

</mosaic_0001>

<bundles_post_ra>
// kernel: tile.28
= control target key start
LH: loop header
LB: loop body
LE: loop exit
PB: predicated region body
PF: predicated region fallthrough
CT: control target
= control target key end

     0   :  { %s28_s0 = inlined_call_operand.vmem [shape: f32[16], index: 0, kind: input, shape index: {}]   ;;  %s29_s1 = inlined_call_operand.vmem [shape: f32[16,16], index: 1, kind: output, shape index: {}]  }
   0x1   :  { %v4_v0 = vld [vmem:[%s28_s0] ss:$0 sm:$0xff] }
   0x2   :  { %5 = vst [vmem:[%s29_s1] sm:$0xff] %v4_v0  ;;  %8 = vst [vmem:[%s29_s1 + $0x8] sm:$0xff] %v4_v0 }

// kernel: tile.29
= control target key start
LH: loop header
LB: loop body
LE: loop exit
PB: predicated region body
PF: predicated region fallthrough
CT: control target
= control target key end

     0   :  { %s7_s6 = smov 3  ;;  %s21_s9 = smov 3  ;;  %vm4_vm0 = vcmask 130048   ;;  %vm11_vm1 = vcmask 1048448   ;;  %vm18_vm2 = vcmask 917248   ;;  %vm25_vm3 = vcmask 786048   ;;  %s128_s0 = inlined_call_operand.vmem [shape: f32[16,16], index: 0, kind: input, shape index: {}]   ;;  %s129_s1 = inlined_call_operand.vmem [shape: f32[1,256], index: 1, kind: output, shape index: {}]  }
   0x1   :  { %v66_v0 = vld [vmem:[%s128_s0 + $0x7] ss:$8 sm:%s7_s6]   ;;  %s81_s10 = smov 112   ;;  %v68_v1 = vld [vmem:[%s128_s0 + $0x5] ss:$8 sm:%s21_s9]   ;;  %s14_s13 = smov 3 }
   0x2   :  { %9 = vrot.lane.b32.xlu0 %v66_v0, %s81_s10  ;;  %s82_s14 = smov 80   ;;  %v67_v2 = vld [vmem:[%s128_s0 + $0x6] ss:$8 sm:%s14_s13]   ;;  %s28_s17 = smov 3  ;;  %vm32_vm4 = vcmask 654848   ;;  %vm39_vm5 = vcmask 523648  }
   0x3   :  { %23 = vrot.lane.b32.xlu1 %v68_v1, %s82_s14  ;;  %v69_v3 = vld [vmem:[%s128_s0 + $0x4] ss:$8 sm:%s28_s17]   ;;  %s35_s20 = smov 3  ;;  %s42_s21 = smov 3  ;;  %vm46_vm6 = vcmask 392448   ;;  %vm53_vm7 = vcmask 261248  }
   0x4   :  { %s83_s22 = smov 96   ;;  %s84_s23 = smov 64   ;;  %v70_v4 = vld [vmem:[%s128_s0 + $0x3] ss:$8 sm:%s35_s20]   ;;  %v71_v5 = vld [vmem:[%s128_s0 + $0x2] ss:$8 sm:%s42_s21]  }
   0x5   :  { %s2_s26 = smov 3  ;;  %s49_s29 = smov 3 }
   0x6   :  { %16 = vrot.lane.b32.xlu0 %v67_v2, %s83_s22  ;;  %v3_v6 = vld [vmem:[%s128_s0] ss:$8 sm:%s2_s26]   ;;  %s85_s3 = smov 48   ;;  %s86_s4 = smov 32  }
   0x7   :  { %30 = vrot.lane.b32.xlu1 %v69_v3, %s84_s23  ;;  %5 = vst.msk [vmem:[#allocation0] ss:$8 sm:$0x3] %vm4_vm0, %v3_v6   ;;  %v72_v7 = vld [vmem:[%s128_s0 + $0x1] ss:$8 sm:%s49_s29]   ;;  %s87_s0 = smov 16  }
   0xa   :  { %37 = vrot.lane.b32.xlu0 %v70_v4, %s85_s3 }
   0xb   :  { %44 = vrot.lane.b32.xlu1 %v71_v5, %s86_s4 }
   0xe   :  { %51 = vrot.lane.b32.xlu0 %v72_v7, %s87_s0 }
  0x74   :  { %v10_v8 = vpop.permute.xlu0 %9  }
  0x75   :  { %12 = vst.msk [vmem:[#allocation0] ss:$8 sm:$0x3] %vm11_vm1, %v10_v8   ;;  %v24_v9 = vpop.permute.xlu1 %23  }
  0x78   :  { %v17_v10 = vpop.permute.xlu0 %16  }
  0x79   :  { %19 = vst.msk [vmem:[#allocation0] ss:$8 sm:$0x3] %vm18_vm2, %v17_v10   ;;  %v31_v11 = vpop.permute.xlu1 %30  }
  0x7a   :  { %26 = vst.msk [vmem:[#allocation0] ss:$8 sm:$0x3] %vm25_vm3, %v24_v9  }
  0x7b   :  { %33 = vst.msk [vmem:[#allocation0] ss:$8 sm:$0x3] %vm32_vm4, %v31_v11  }
  0x7c   :  { %v38_v12 = vpop.permute.xlu0 %37  }
  0x7d   :  { %40 = vst.msk [vmem:[#allocation0] ss:$8 sm:$0x3] %vm39_vm5, %v38_v12   ;;  %v45_v13 = vpop.permute.xlu1 %44  }
  0x7e   :  { %47 = vst.msk [vmem:[#allocation0] ss:$8 sm:$0x3] %vm46_vm6, %v45_v13  }
  0x80   :  { %v52_v14 = vpop.permute.xlu0 %51  }
  0x81   :  { %54 = vst.msk [vmem:[#allocation0] ss:$8 sm:$0x3] %vm53_vm7, %v52_v14  }
  0x88   :  { %v58_v15 = vld [vmem:[#allocation0] sm:$0x1]  ;;  %v62_v16 = vld [vmem:[#allocation0 + $0x8] sm:$0x1] }
  0x89   :  { %60 = vst [vmem:[%s129_s1] sm:$0x1] %v58_v15  ;;  %73 = vst [vmem:[%s129_s1 + $0x1] sm:$0x1] %v62_v16 }

// kernel: sab_forward_pallas.1
= control target key start
LH: loop header
LB: loop body
LE: loop exit
PB: predicated region body
PF: predicated region fallthrough
CT: control target
= control target key end

     0   :  { %v51_v0 = vlaneseq  ;;  %v8750_v4 = vmov 0.0   ;;  %vm8757_vm1 = vcmask 1040384   ;;  %vm8756_vm2 = vcmask 1045504   ;;  %s6500_s23 = smov 48   ;;  %s6501_s24 = smov 96   ;;  %s8734_s2 = inlined_call_operand.vmem [shape: bf16[3,256,256], index: 2, kind: input, shape index: {}]   ;;  %s8735_s0 = inlined_call_operand.vmem [shape: f32[2,16,256], index: 0, kind: input, shape index: {}]   ;;  %s8736_s5 = inlined_call_operand.vmem [shape: bf16[3,256,256], index: 5, kind: input, shape index: {}]   ;;  %s8737_s3 = inlined_call_operand.vmem [shape: f32[1,256], index: 3, kind: input, shape index: {}]   ;;  %s8738_s4 = inlined_call_operand.vmem [shape: f32[1,256], index: 4, kind: input, shape index: {}]   ;;  %s8739_s6 = inlined_call_operand.vmem [shape: f32[1,256], index: 6, kind: input, shape index: {}]   ;;  %s8740_s7 = inlined_call_operand.vmem [shape: f32[1,256], index: 7, kind: input, shape index: {}]   ;;  %s8741_s8 = inlined_call_operand.vmem [shape: bf16[7,32,16], index: 8, kind: input, shape index: {}]   ;;  %s8742_s12 = inlined_call_operand.vmem [shape: f32[16,256], index: 12, kind: input, shape index: {}]   ;;  %s8743_s9 = inlined_call_operand.vmem [shape: bf16[3,256,256], index: 9, kind: input, shape index: {}]   ;;  %s8744_s15 = inlined_call_operand.vmem [shape: f32[2,16,256], index: 15, kind: output, shape index: {1}]   ;;  %s8745_s11 = inlined_call_operand.vmem [shape: bf16[3,256,16], index: 11, kind: input, shape index: {}]   ;;  %s8746_s10 = inlined_call_operand.vmem [shape: f32[1,256], index: 10, kind: input, shape index: {}]   ;;  %s8747_s13 = inlined_call_operand.<no memory space> [shape: f32[1], index: 13, kind: input, shape index: {}]   ;;  %s8748_s1 = inlined_call_operand.vmem [shape: f32[2,16,256], index: 1, kind: input, shape index: {}, may-alias: {1,14}]   ;;  %s8749_s14 = inlined_call_operand.vmem [shape: f32[2,16,256], index: 14, kind: output, shape index: {0}, may-alias: {1,14}]  }
   0x1   :  { %v5987_v1 = vld [vmem:[%s8734_s2 + $0x104] ss:$8 sps:$4 sm:$0xff]   ;;  %v5989_v2 = vld [vmem:[%s8734_s2 + $0x100] ss:$8 sps:$4 sm:$0xff]   ;;  %v5990_v3 = vld [vmem:[%s8734_s2 + $0x114] ss:$8 sps:$4 sm:$0xff]  }
   0x2   :  { %vm53_vm0 = vcmp.lt.s32.totalorder %v51_v0, 256  ;;  %365 = vmatprep.subr.bf16.mxu0 %v5987_v1  ;;  %v5992_v5 = vld [vmem:[%s8734_s2 + $0x110] ss:$8 sps:$4 sm:$0xff]   ;;  %v5993_v6 = vld [vmem:[%s8734_s2 + $0x124] ss:$8 sps:$4 sm:$0xff]   ;;  %vm1891_vm3 = vcmask 130048  }
   0x3   :  { %55 = vst.msk [vmem:[#allocation2] ss:$8 sm:$0x3] %vm53_vm0, %v8750_v4  ;;  %58 = vst.msk [vmem:[#allocation2 + $0x30] ss:$8 sm:$0x3] %vm53_vm0, %v8750_v4  ;;  %366 = vmatpush1.bf16.msra.mxu0 %v5989_v2 }
   0x4   :  { %61 = vst.msk [vmem:[#allocation2 + $0x21] ss:$8 sm:$0x3] %vm53_vm0, %v8750_v4  ;;  %64 = vst.msk [vmem:[#allocation2 + $0x51] ss:$8 sm:$0x3] %vm53_vm0, %v8750_v4  ;;  %367 = vmatprep.subr.bf16.mxu0 %v5990_v3 }
   0x5   :  { %v5995_v7 = vld [vmem:[%s8734_s2 + $0x120] ss:$8 sps:$4 sm:$0xff]   ;;  %v5996_v8 = vld [vmem:[%s8734_s2 + $0x134] ss:$8 sps:$4 sm:$0xff]   ;;  %v5998_v9 = vld [vmem:[%s8734_s2 + $0x130] ss:$8 sps:$4 sm:$0xff]  }
   0x6   :  { %v5999_v10 = vld [vmem:[%s8734_s2 + $0x144] ss:$8 sps:$4 sm:$0xff]   ;;  %v6001_v11 = vld [vmem:[%s8734_s2 + $0x140] ss:$8 sps:$4 sm:$0xff]   ;;  %v6002_v12 = vld [vmem:[%s8734_s2 + $0x154] ss:$8 sps:$4 sm:$0xff]  }
   0x7   :  { %368 = vmatpush1.bf16.msra.mxu0 %v5992_v5  ;;  %v6004_v13 = vld [vmem:[%s8734_s2 + $0x150] ss:$8 sps:$4 sm:$0xff]   ;;  %v6005_v14 = vld [vmem:[%s8734_s2 + $0x164] ss:$8 sps:$4 sm:$0xff]   ;;  %v6007_v20 = vld [vmem:[%s8734_s2 + $0x160] ss:$8 sps:$4 sm:$0xff]  }
   0x8   :  { %369 = vmatprep.subr.bf16.mxu0 %v5993_v6  ;;  %v6632_v15 = vld [vmem:[%s8735_s0 + $0x8] sm:$0xff]  ;;  %v6637_v16 = vld [vmem:[%s8735_s0 + $0x18] sm:$0xff]  ;;  %v6649_v21 = vld [vmem:[%s8735_s0] sm:$0xff]  ;;  %vm1953_vm4 = vcmask 261248   ;;  %vm2035_vm5 = vcmask 523648   ;;  %vm1994_vm6 = vcmask 392448  }
   0x9   :  { %v89_v17 = vrot.slane %v6632_v15, 7  ;;  %v92_v18 = vrot.slane %v6637_v16, 7  ;;  %v169_v19 = vpack.c.bf16 %v6637_v16, %v6632_v15  ;;  %v6654_v22 = vld [vmem:[%s8735_s0 + $0x10] sm:$0xff]  ;;  %v88_v24 = vrot.slane %v6649_v21, 7  ;;  %v6011_v28 = vld [vmem:[%s8734_s2 + $0x184] ss:$8 sps:$4 sm:$0xff]  }
   0xa   :  { %v6008_v23 = vld [vmem:[%s8734_s2 + $0x174] ss:$8 sps:$4 sm:$0xff]   ;;  %v90_v25 = vrot.slane %v6654_v22, 7  ;;  %v6010_v27 = vld [vmem:[%s8734_s2 + $0x170] ss:$8 sps:$4 sm:$0xff]   ;;  %v76_v35 = vld [vmem:[%s8735_s0 + $0x28] sm:$0xff]  ;;  %v168_v55 = vpack.c.bf16 %v6654_v22, %v6649_v21 }
   0xb   :  { %370 = vmatpush1.bf16.msra.mxu0 %v5995_v7  ;;  %113 = vst [vmem:[#allocation2 + $0x8] sm:$0xfe] %v89_v17  ;;  %117 = vst [vmem:[#allocation2 + $0x28] sm:$0x1] %v92_v18  ;;  %397 = vmatprep.mubr.bf16.mxu0 %v169_v19  ;;  %v6013_v29 = vld [vmem:[%s8734_s2 + $0x180] ss:$8 sps:$4 sm:$0xff]   ;;  %v6756_v60 = vsel %vm8757_vm1, %v89_v17, %v92_v18 }
   0xc   :  { %371 = vmatprep.subr.bf16.mxu0 %v5996_v8  ;;  %v6666_v26 = vsel %vm8757_vm1, %v88_v24, %v90_v25  ;;  %112 = vst [vmem:[#allocation2] sm:$0xfe] %v88_v24  ;;  %116 = vst [vmem:[#allocation2 + $0x20] sm:$0x1] %v90_v25  ;;  %v6014_v30 = vld [vmem:[%s8734_s2 + $0x194] ss:$8 sps:$4 sm:$0xff]  }
   0xd   :  { %v6016_v31 = vld [vmem:[%s8734_s2 + $0x190] ss:$8 sps:$4 sm:$0xff]   ;;  %v6017_v32 = vld [vmem:[%s8734_s2 + $0x1a4] ss:$8 sps:$4 sm:$0xff]   ;;  %v6019_v33 = vld [vmem:[%s8734_s2 + $0x1a0] ss:$8 sps:$4 sm:$0xff]  }
   0xe   :  { %v6020_v34 = vld [vmem:[%s8734_s2 + $0x1b4] ss:$8 sps:$4 sm:$0xff]   ;;  %v95_v37 = vrot.slane %v76_v35, 7  ;;  %v6022_v39 = vld [vmem:[%s8734_s2 + $0x1b0] ss:$8 sps:$4 sm:$0xff]   ;;  %v75_v40 = vld [vmem:[%s8735_s0 + $0x20] sm:$0xff] }
   0xf   :  { %372 = vmatpush1.bf16.msra.mxu0 %v5998_v9  ;;  %v78_v36 = vld [vmem:[%s8735_s0 + $0x38] sm:$0xff]  ;;  %v77_v41 = vld [vmem:[%s8735_s0 + $0x30] sm:$0xff]  ;;  %v6023_v42 = vld [vmem:[%s8734_s2 + $0x1c4] ss:$8 sps:$4 sm:$0xff]   ;;  %v94_v44 = vrot.slane %v75_v40, 7  ;;  %s6502_s0 = smov 32  }
  0x10   :  { %373 = vmatprep.subr.bf16.mxu0 %v5999_v10  ;;  %v98_v38 = vrot.slane %v78_v36, 7  ;;  %119 = vst [vmem:[#allocation2 + $0x38] sm:$0xfe] %v95_v37  ;;  %v96_v45 = vrot.slane %v77_v41, 7  ;;  %v6025_v47 = vld [vmem:[%s8734_s2 + $0x1c0] ss:$8 sps:$4 sm:$0xff]   ;;  %v171_v57 = vpack.c.bf16 %v78_v36, %v76_v35  ;;  %v170_v63 = vpack.c.bf16 %v77_v41, %v75_v40 }
  0x11   :  { %118 = vst [vmem:[#allocation2 + $0x30] sm:$0xfe] %v94_v44  ;;  %v6026_v48 = vld [vmem:[%s8734_s2 + $0x1d4] ss:$8 sps:$4 sm:$0xff]   ;;  %v6028_v49 = vld [vmem:[%s8734_s2 + $0x1d0] ss:$8 sps:$4 sm:$0xff]  }
  0x12   :  { %v6711_v43 = vsel %vm8757_vm1, %v95_v37, %v98_v38  ;;  %123 = vst [vmem:[#allocation2 + $0x58] sm:$0x1] %v98_v38  ;;  %v6714_v46 = vsel %vm8757_vm1, %v94_v44, %v96_v45  ;;  %122 = vst [vmem:[#allocation2 + $0x50] sm:$0x1] %v96_v45  ;;  %v6029_v50 = vld [vmem:[%s8734_s2 + $0x1e4] ss:$8 sps:$4 sm:$0xff]  }
  0x13   :  { %374 = vmatpush1.bf16.msra.mxu0 %v6001_v11  ;;  %v6031_v51 = vld [vmem:[%s8734_s2 + $0x1e0] ss:$8 sps:$4 sm:$0xff]   ;;  %v6032_v52 = vld [vmem:[%s8734_s2 + $0x1f4] ss:$8 sps:$4 sm:$0xff]   ;;  %v6034_v53 = vld [vmem:[%s8734_s2 + $0x1f0] ss:$8 sps:$4 sm:$0xff]  }
  0x14   :  { %375 = vmatprep.subr.bf16.mxu0 %v6002_v12  ;;  %v6037_v54 = vld [vmem:[%s8734_s2 + $0x4] ss:$8 sps:$4 sm:$0xff]   ;;  %v6035_v56 = vld [vmem:[%s8734_s2] ss:$8 sps:$4 sm:$0xff]   ;;  %v6040_v58 = vld [vmem:[%s8734_s2 + $0x14] ss:$8 sps:$4 sm:$0xff]  }
  0x15   :  { %v6038_v59 = vld [vmem:[%s8734_s2 + $0x10] ss:$8 sps:$4 sm:$0xff]   ;;  %v6043_v61 = vld [vmem:[%s8734_s2 + $0x24] ss:$8 sps:$4 sm:$0xff]   ;;  %v6041_v1 = vld [vmem:[%s8734_s2 + $0x20] ss:$8 sps:$4 sm:$0xff]  }
  0x16   :  { %v125_v62 = vld [vmem:[#allocation2 + $0x8] sm:$0xff]  ;;  %v6046_v3 = vld [vmem:[%s8734_s2 + $0x34] ss:$8 sps:$4 sm:$0xff]   ;;  %v6044_v5 = vld [vmem:[%s8734_s2 + $0x30] ss:$8 sps:$4 sm:$0xff]   ;;  %vm2076_vm7 = vcmask 654848  }
  0x17   :  { %376 = vmatpush1.bf16.msra.mxu0 %v6004_v13  ;;  %v133_v2 = vpack.c.bf16 %v6756_v60, %v125_v62  ;;  %v6049_v6 = vld [vmem:[%s8734_s2 + $0x44] ss:$8 sps:$4 sm:$0xff]   ;;  %v6133_v8 = vld [vmem:[%s8736_s5 + $0x100] ss:$8 sps:$4 sm:$0xff]   ;;  %v6134_v9 = vld [vmem:[%s8736_s5 + $0x114] ss:$8 sps:$4 sm:$0xff]  }
  0x18   :  { %377 = vmatprep.subr.bf16.mxu0 %v6005_v14  ;;  %v6131_v7 = vld [vmem:[%s8736_s5 + $0x104] ss:$8 sps:$4 sm:$0xff]   ;;  %v6047_v10 = vld [vmem:[%s8734_s2 + $0x40] ss:$8 sps:$4 sm:$0xff]   ;;  %v6136_v11 = vld [vmem:[%s8736_s5 + $0x110] ss:$8 sps:$4 sm:$0xff]  }
  0x19   :  { %1275 = vmatprep.subr.bf16.mxu1 %v6131_v7  ;;  %v6137_v12 = vld [vmem:[%s8736_s5 + $0x124] ss:$8 sps:$4 sm:$0xff]   ;;  %v6052_v13 = vld [vmem:[%s8734_s2 + $0x54] ss:$8 sps:$4 sm:$0xff]   ;;  %v6050_v14 = vld [vmem:[%s8734_s2 + $0x50] ss:$8 sps:$4 sm:$0xff]  }
  0x1a   :  { %1276 = vmatpush1.bf16.msra.mxu1 %v6133_v8  ;;  %v6139_v15 = vld [vmem:[%s8736_s5 + $0x120] ss:$8 sps:$4 sm:$0xff]   ;;  %v6140_v16 = vld [vmem:[%s8736_s5 + $0x134] ss:$8 sps:$4 sm:$0xff]   ;;  %v6055_v17 = vld [vmem:[%s8734_s2 + $0x64] ss:$8 sps:$4 sm:$0xff]  }
  0x1b   :  { %378 = vmatpush1.bf16.msra.mxu0 %v6007_v20  ;;  %1277 = vmatprep.subr.bf16.mxu1 %v6134_v9  ;;  %v6053_v18 = vld [vmem:[%s8734_s2 + $0x60] ss:$8 sps:$4 sm:$0xff]   ;;  %v6142_v19 = vld [vmem:[%s8736_s5 + $0x130] ss:$8 sps:$4 sm:$0xff]   ;;  %v6143_v20 = vld [vmem:[%s8736_s5 + $0x144] ss:$8 sps:$4 sm:$0xff]  }
  0x1c   :  { %379 = vmatprep.subr.bf16.mxu0 %v6008_v23  ;;  %v6058_v21 = vld [vmem:[%s8734_s2 + $0x74] ss:$8 sps:$4 sm:$0xff]   ;;  %v6056_v22 = vld [vmem:[%s8734_s2 + $0x70] ss:$8 sps:$4 sm:$0xff]   ;;  %v6061_v23 = vld [vmem:[%s8734_s2 + $0x84] ss:$8 sps:$4 sm:$0xff]  }
  0x1d   :  { %v6145_v24 = vld [vmem:[%s8736_s5 + $0x140] ss:$8 sps:$4 sm:$0xff]   ;;  %v6146_v25 = vld [vmem:[%s8736_s5 + $0x154] ss:$8 sps:$4 sm:$0xff]   ;;  %v6154_v35 = vld [vmem:[%s8736_s5 + $0x170] ss:$8 sps:$4 sm:$0xff]  }
  0x1e   :  { %1278 = vmatpush1.bf16.msra.mxu1 %v6136_v11  ;;  %v6065_v36 = vld [vmem:[%s8734_s2 + $0xa0] ss:$8 sps:$4 sm:$0xff]   ;;  %v6155_v37 = vld [vmem:[%s8736_s5 + $0x184] ss:$8 sps:$4 sm:$0xff]   ;;  %v6070_v38 = vld [vmem:[%s8734_s2 + $0xb4] ss:$8 sps:$4 sm:$0xff]  }
  0x1f   :  { %380 = vmatpush1.bf16.msra.mxu0 %v6010_v27  ;;  %1279 = vmatprep.subr.bf16.mxu1 %v6137_v12  ;;  %v6148_v27 = vld [vmem:[%s8736_s5 + $0x150] ss:$8 sps:$4 sm:$0xff]   ;;  %v6158_v41 = vld [vmem:[%s8736_s5 + $0x194] ss:$8 sps:$4 sm:$0xff]   ;;  %v6071_v45 = vld [vmem:[%s8734_s2 + $0xc0] ss:$8 sps:$4 sm:$0xff]  }
  0x20   :  { %381 = vmatprep.subr.bf16.mxu0 %v6011_v28  ;;  %v6059_v28 = vld [vmem:[%s8734_s2 + $0x80] ss:$8 sps:$4 sm:$0xff]   ;;  %v6068_v40 = vld [vmem:[%s8734_s2 + $0xb0] ss:$8 sps:$4 sm:$0xff]   ;;  %v660_v8 = vrot.slane %v6756_v60, 2  ;;  %vm2158_vm8 = vcmask 917248  }
  0x21   :  { %v6160_v44 = vld [vmem:[%s8736_s5 + $0x190] ss:$8 sps:$4 sm:$0xff]   ;;  %v6091_v12 = vld [vmem:[%s8734_s2 + $0x224] ss:$8 sps:$4 sm:$0xff]   ;;  %vm2117_vm9 = vcmask 786048   ;;  %vm2199_vm10 = vcmask 1048448  }
  0x22   :  { %1280 = vmatpush1.bf16.msra.mxu1 %v6139_v15  ;;  %v129_v62 = vld [vmem:[#allocation2 + $0x38] sm:$0xff]  ;;  %v128_v11 = vld [vmem:[#allocation2 + $0x30] sm:$0xff]  ;;  %v6089_v15 = vld [vmem:[%s8734_s2 + $0x220] ss:$8 sps:$4 sm:$0xff]   ;;  %vm2524_vm11 = vcmask 7168   ;;  %vm2529_vm12 = vcmask 15360  }
  0x23   :  { %382 = vmatpush1.bf16.msra.mxu0 %v6013_v29  ;;  %1281 = vmatprep.subr.bf16.mxu1 %v6140_v16  ;;  %v6149_v29 = vld [vmem:[%s8736_s5 + $0x164] ss:$8 sps:$4 sm:$0xff]   ;;  %v134_v60 = vpack.c.bf16 %v6714_v46, %v128_v11  ;;  %v6178_v11 = vld [vmem:[%s8736_s5 + $0x1f0] ss:$8 sps:$4 sm:$0xff]   ;;  %vm2534_vm13 = vcmask 23552   ;;  %vm2539_vm14 = vcmask 31744  }
  0x24   :  { %383 = vmatprep.subr.bf16.mxu0 %v6014_v30  ;;  %v6064_v30 = vld [vmem:[%s8734_s2 + $0x94] ss:$8 sps:$4 sm:$0xff]   ;;  %vm2544_vm15 = vcmask 39936   ;;  %vm2549_vm0 = vcmask 48128  }
  0x26   :  { %1282 = vmatpush1.bf16.msra.mxu1 %v6142_v19  ;;  %v6097_v19 = vld [vmem:[%s8734_s2 + $0x244] ss:$8 sps:$4 sm:$0xff]  }
  0x27   :  { %384 = vmatpush1.bf16.msra.mxu0 %v6016_v31  ;;  %1283 = vmatprep.subr.bf16.mxu1 %v6143_v20  ;;  %v6151_v31 = vld [vmem:[%s8736_s5 + $0x160] ss:$8 sps:$4 sm:$0xff]  }
  0x28   :  { %385 = vmatprep.subr.bf16.mxu0 %v6017_v32  ;;  %v6062_v32 = vld [vmem:[%s8734_s2 + $0x90] ss:$8 sps:$4 sm:$0xff]   ;;  %v6095_v20 = vld [vmem:[%s8734_s2 + $0x240] ss:$8 sps:$4 sm:$0xff]  }
  0x2a   :  { %1284 = vmatpush1.bf16.msra.mxu1 %v6145_v24  ;;  %v6101_v24 = vld [vmem:[%s8734_s2 + $0x260] ss:$8 sps:$4 sm:$0xff]  }
  0x2b   :  { %386 = vmatpush1.bf16.msra.mxu0 %v6019_v33  ;;  %1285 = vmatprep.subr.bf16.mxu1 %v6146_v25  ;;  %v6152_v33 = vld [vmem:[%s8736_s5 + $0x174] ss:$8 sps:$4 sm:$0xff]  }
  0x2c   :  { %387 = vmatprep.subr.bf16.mxu0 %v6020_v34  ;;  %v6067_v34 = vld [vmem:[%s8734_s2 + $0xa4] ss:$8 sps:$4 sm:$0xff]   ;;  %v6106_v25 = vld [vmem:[%s8734_s2 + $0x274] ss:$8 sps:$4 sm:$0xff]  }
  0x2e   :  { %1286 = vmatpush1.bf16.msra.mxu1 %v6148_v27  ;;  %v6104_v27 = vld [vmem:[%s8734_s2 + $0x270] ss:$8 sps:$4 sm:$0xff]  }
  0x2f   :  { %388 = vmatpush1.bf16.msra.mxu0 %v6022_v39  ;;  %1287 = vmatprep.subr.bf16.mxu1 %v6149_v29  ;;  %v6157_v39 = vld [vmem:[%s8736_s5 + $0x180] ss:$8 sps:$4 sm:$0xff]  }
  0x30   :  { %389 = vmatprep.subr.bf16.mxu0 %v6023_v42  ;;  %v6073_v42 = vld [vmem:[%s8734_s2 + $0xc4] ss:$8 sps:$4 sm:$0xff]   ;;  %v6107_v29 = vld [vmem:[%s8734_s2 + $0x280] ss:$8 sps:$4 sm:$0xff]  }
  0x32   :  { %1288 = vmatpush1.bf16.msra.mxu1 %v6151_v31  ;;  %v6110_v31 = vld [vmem:[%s8734_s2 + $0x290] ss:$8 sps:$4 sm:$0xff]  }
  0x33   :  { %390 = vmatpush1.bf16.msra.mxu0 %v6025_v47  ;;  %1289 = vmatprep.subr.bf16.mxu1 %v6152_v33  ;;  %v6161_v47 = vld [vmem:[%s8736_s5 + $0x1a4] ss:$8 sps:$4 sm:$0xff]   ;;  %v6113_v33 = vld [vmem:[%s8734_s2 + $0x2a0] ss:$8 sps:$4 sm:$0xff]  }
  0x34   :  { %391 = vmatprep.subr.bf16.mxu0 %v6026_v48  ;;  %v6076_v48 = vld [vmem:[%s8734_s2 + $0xd4] ss:$8 sps:$4 sm:$0xff]  }
  0x36   :  { %1290 = vmatpush1.bf16.msra.mxu1 %v6154_v35  ;;  %v6116_v35 = vld [vmem:[%s8734_s2 + $0x2b0] ss:$8 sps:$4 sm:$0xff]  }
  0x37   :  { %392 = vmatpush1.bf16.msra.mxu0 %v6028_v49  ;;  %1291 = vmatprep.subr.bf16.mxu1 %v6155_v37  ;;  %v6163_v49 = vld [vmem:[%s8736_s5 + $0x1a0] ss:$8 sps:$4 sm:$0xff]  }
  0x38   :  { %393 = vmatprep.subr.bf16.mxu0 %v6029_v50  ;;  %v6074_v50 = vld [vmem:[%s8734_s2 + $0xd0] ss:$8 sps:$4 sm:$0xff]   ;;  %v6119_v37 = vld [vmem:[%s8734_s2 + $0x2c0] ss:$8 sps:$4 sm:$0xff]  }
  0x3a   :  { %1292 = vmatpush1.bf16.msra.mxu1 %v6157_v39  ;;  %v6122_v39 = vld [vmem:[%s8734_s2 + $0x2d0] ss:$8 sps:$4 sm:$0xff]  }
  0x3b   :  { %394 = vmatpush1.bf16.msra.mxu0 %v6031_v51  ;;  %1293 = vmatprep.subr.bf16.mxu1 %v6158_v41  ;;  %v6164_v51 = vld [vmem:[%s8736_s5 + $0x1b4] ss:$8 sps:$4 sm:$0xff]   ;;  %v631_v41 = vld [vmem:[#allocation2] sm:$0xfc] }
  0x3c   :  { %395 = vmatprep.subr.bf16.mxu0 %v6032_v52  ;;  %v6079_v52 = vld [vmem:[%s8734_s2 + $0xe4] ss:$8 sps:$4 sm:$0xff]  }
  0x3e   :  { %1294 = vmatpush1.bf16.msra.mxu1 %v6160_v44  ;;  %v638_v44 = vld [vmem:[#allocation2 + $0x38] sm:$0xfc] }
  0x3f   :  { %396 = vmatpush1.bf16.msra.mxu0 %v6034_v53  ;;  %1295 = vmatprep.subr.bf16.mxu1 %v6161_v47  ;;  %v6166_v53 = vld [vmem:[%s8736_s5 + $0x1b0] ss:$8 sps:$4 sm:$0xff]   ;;  %v6125_v47 = vld [vmem:[%s8734_s2 + $0x2e0] ss:$8 sps:$4 sm:$0xff]  }
  0x40   :  { %578 = vmatprep.subr.bf16.mxu0 %v6037_v54  ;;  %v6077_v54 = vld [vmem:[%s8734_s2 + $0xe0] ss:$8 sps:$4 sm:$0xff]  }
  0x42   :  { %398 = vmatmul.mubr.bf16.vlgmr.msra.gmra.mrb[0].mxu0 %v168_v55  ;;  %1296 = vmatpush1.bf16.msra.mxu1 %v6163_v49  ;;  %v6167_v55 = vld [vmem:[%s8736_s5 + $0x1c4] ss:$8 sps:$4 sm:$0xff]   ;;  %v657_v49 = vrot.slane %v6666_v26, 2 }
  0x43   :  { %579 = vmatpush1.bf16.msra.mxu0 %v6035_v56  ;;  %407 = vmatprep.mubr.bf16.mxu0 %v171_v57  ;;  %v6082_v56 = vld [vmem:[%s8734_s2 + $0xf4] ss:$8 sps:$4 sm:$0xff]   ;;  %v6169_v57 = vld [vmem:[%s8736_s5 + $0x1c0] ss:$8 sps:$4 sm:$0xff]  }
  0x44   :  { %580 = vmatprep.subr.bf16.mxu0 %v6040_v58  ;;  %1297 = vmatprep.subr.bf16.mxu1 %v6164_v51  ;;  %v6080_v58 = vld [vmem:[%s8734_s2 + $0xf0] ss:$8 sps:$4 sm:$0xff]   ;;  %v6130_v51 = vld [vmem:[%s8734_s2 + $0x2f4] ss:$8 sps:$4 sm:$0xff]  }
  0x46   :  { %1298 = vmatpush1.bf16.msra.mxu1 %v6166_v53  ;;  %v670_v53 = vrot.slane %v6711_v43, 2 }
  0x47   :  { %581 = vmatpush1.bf16.msra.mxu0 %v6038_v59  ;;  %v124_v59 = vld [vmem:[#allocation2] sm:$0xff]  ;;  %1299 = vmatprep.subr.bf16.mxu1 %v6167_v55  ;;  %v6128_v55 = vld [vmem:[%s8734_s2 + $0x2f0] ss:$8 sps:$4 sm:$0xff]  }
  0x48   :  { %582 = vmatprep.subr.bf16.mxu0 %v6043_v61  ;;  %v6085_v61 = vld [vmem:[%s8734_s2 + $0x204] ss:$8 sps:$4 sm:$0xff]  }
  0x4a   :  { %408 = vmatmul.mubr.bf16.gmra.mrb[4].mxu0 %v170_v63  ;;  %v632_v63 = vld [vmem:[#allocation2 + $0x8] sm:$0xfc]  ;;  %1300 = vmatpush1.bf16.msra.mxu1 %v6169_v57 }
  0x4b   :  { %583 = vmatpush1.bf16.msra.mxu0 %v6041_v1  ;;  %610 = vmatprep.mubr.bf16.mxu0 %v133_v2  ;;  %v636_v1 = vld [vmem:[#allocation2 + $0x28] sm:$0x3]  ;;  %v132_v2 = vpack.c.bf16 %v6666_v26, %v124_v59  ;;  %v659_v7 = vrot.slane %v632_v63, 2  ;;  %v637_v59 = vld [vmem:[#allocation2 + $0x30] sm:$0xfc] }
  0x4c   :  { %584 = vmatprep.subr.bf16.mxu0 %v6046_v3  ;;  %v6083_v3 = vld [vmem:[%s8734_s2 + $0x200] ss:$8 sps:$4 sm:$0xff]   ;;  %v664_v9 = vrot.slane %v636_v1, 2  ;;  %v666_v63 = vrot.slane %v637_v59, 2  ;;  %v667_v1 = vrot.slane %v6714_v46, 2 }
  0x4d   :  { %v6173_v46 = vld [vmem:[%s8736_s5 + $0x1e4] ss:$8 sps:$4 sm:$0xff]  }
  0x4f   :  { %585 = vmatpush1.bf16.msra.mxu0 %v6044_v5  ;;  %v135_v5 = vpack.c.bf16 %v6711_v43, %v129_v62 }
  0x50   :  { %586 = vmatprep.subr.bf16.mxu0 %v6049_v6  ;;  %v6088_v6 = vld [vmem:[%s8734_s2 + $0x214] ss:$8 sps:$4 sm:$0xff]  }
  0x53   :  { %587 = vmatpush1.bf16.msra.mxu0 %v6047_v10  ;;  %v6086_v10 = vld [vmem:[%s8734_s2 + $0x210] ss:$8 sps:$4 sm:$0xff]  }
  0x54   :  { %588 = vmatprep.subr.bf16.mxu0 %v6052_v13  ;;  %v661_v13 = vsel %vm8756_vm2, %v659_v7, %v660_v8  ;;  %v6170_v7 = vld [vmem:[%s8736_s5 + $0x1d4] ss:$8 sps:$4 sm:$0xff]  }
  0x55   :  { %1301 = vmatprep.subr.bf16.mxu1 %v6170_v7 }
  0x57   :  { %589 = vmatpush1.bf16.msra.mxu0 %v6050_v14  ;;  %v665_v14 = vsel %vm8756_vm2, %v660_v8, %v664_v9  ;;  %v6172_v8 = vld [vmem:[%s8736_s5 + $0x1d0] ss:$8 sps:$4 sm:$0xff]   ;;  %v6175_v9 = vld [vmem:[%s8736_s5 + $0x1e0] ss:$8 sps:$4 sm:$0xff]  }
  0x58   :  { %590 = vmatprep.subr.bf16.mxu0 %v6055_v17  ;;  %v685_v16 = vpack.c.bf16 %v665_v14, %v661_v13  ;;  %v6094_v17 = vld [vmem:[%s8734_s2 + $0x234] ss:$8 sps:$4 sm:$0xff]   ;;  %1302 = vmatpush1.bf16.msra.mxu1 %v6172_v8  ;;  %v945_v13 = vshrl.u32 %v51_v0, 7 }
  0x59   :  { %1303 = vmatprep.subr.bf16.mxu1 %v6173_v46 }
  0x5a   :  { %v7054_v14 = vsub.s32 0, %v945_v13 }
  0x5b   :  { %591 = vmatpush1.bf16.msra.mxu0 %v6053_v18  ;;  %v6092_v18 = vld [vmem:[%s8734_s2 + $0x230] ss:$8 sps:$4 sm:$0xff]  }
  0x5c   :  { %592 = vmatprep.subr.bf16.mxu0 %v6058_v21  ;;  %v6100_v21 = vld [vmem:[%s8734_s2 + $0x254] ss:$8 sps:$4 sm:$0xff]   ;;  %1304 = vmatpush1.bf16.msra.mxu1 %v6175_v9  ;;  %8759 = vst [vmem:[#allocation5_spill] sm:$0xff] %v7054_v14 }
  0x5f   :  { %593 = vmatpush1.bf16.msra.mxu0 %v6056_v22  ;;  %v6098_v22 = vld [vmem:[%s8734_s2 + $0x250] ss:$8 sps:$4 sm:$0xff]  }
  0x60   :  { %594 = vmatprep.subr.bf16.mxu0 %v6061_v23  ;;  %v6103_v23 = vld [vmem:[%s8734_s2 + $0x264] ss:$8 sps:$4 sm:$0xff]  }
  0x63   :  { %595 = vmatpush1.bf16.msra.mxu0 %v6059_v28  ;;  %v6109_v28 = vld [vmem:[%s8734_s2 + $0x284] ss:$8 sps:$4 sm:$0xff]  }
  0x64   :  { %596 = vmatprep.subr.bf16.mxu0 %v6064_v30  ;;  %v6112_v30 = vld [vmem:[%s8734_s2 + $0x294] ss:$8 sps:$4 sm:$0xff]  }
  0x67   :  { %597 = vmatpush1.bf16.msra.mxu0 %v6062_v32  ;;  %v6115_v32 = vld [vmem:[%s8734_s2 + $0x2a4] ss:$8 sps:$4 sm:$0xff]  }
  0x68   :  { %598 = vmatprep.subr.bf16.mxu0 %v6067_v34  ;;  %v6118_v34 = vld [vmem:[%s8734_s2 + $0x2b4] ss:$8 sps:$4 sm:$0xff]  }
  0x6b   :  { %599 = vmatpush1.bf16.msra.mxu0 %v6065_v36  ;;  %v6121_v36 = vld [vmem:[%s8734_s2 + $0x2c4] ss:$8 sps:$4 sm:$0xff]  }
  0x6c   :  { %600 = vmatprep.subr.bf16.mxu0 %v6070_v38  ;;  %v6124_v38 = vld [vmem:[%s8734_s2 + $0x2d4] ss:$8 sps:$4 sm:$0xff]  }
  0x6f   :  { %601 = vmatpush1.bf16.msra.mxu0 %v6068_v40  ;;  %v6127_v40 = vld [vmem:[%s8734_s2 + $0x2e4] ss:$8 sps:$4 sm:$0xff]   ;;  %s6503_s2 = smov 80  }
  0x70   :  { %602 = vmatprep.subr.bf16.mxu0 %v6073_v42  ;;  %v635_v42 = vld [vmem:[#allocation2 + $0x20] sm:$0x3] }
  0x73   :  { %603 = vmatpush1.bf16.msra.mxu0 %v6071_v45  ;;  %v642_v45 = vld [vmem:[#allocation2 + $0x58] sm:$0x3] }
  0x74   :  { %604 = vmatprep.subr.bf16.mxu0 %v6076_v48  ;;  %v656_v48 = vrot.slane %v631_v41, 2 }
  0x77   :  { %605 = vmatpush1.bf16.msra.mxu0 %v6074_v50  ;;  %v662_v50 = vrot.slane %v635_v42, 2 }
  0x78   :  { %606 = vmatprep.subr.bf16.mxu0 %v6079_v52  ;;  %v669_v52 = vrot.slane %v638_v44, 2 }
  0x79   :  { %v663_v57 = vsel %vm8756_vm2, %v657_v49, %v662_v50  ;;  %v6179_v50 = vld [vmem:[%s8736_s5] ss:$8 sps:$4 sm:$0xff]  }
  0x7a   :  { %v671_v26 = vsel %vm8756_vm2, %v669_v52, %v670_v53 }
  0x7b   :  { %607 = vmatpush1.bf16.msra.mxu0 %v6077_v54  ;;  %v674_v54 = vrot.slane %v642_v45, 2 }
  0x7c   :  { %608 = vmatprep.subr.bf16.mxu0 %v6082_v56  ;;  %v658_v56 = vsel %vm8756_vm2, %v656_v48, %v657_v49 }
  0x7d   :  { %v684_v62 = vpack.c.bf16 %v663_v57, %v658_v56 }
  0x7f   :  { %609 = vmatpush1.bf16.msra.mxu0 %v6080_v58  ;;  %v675_v58 = vsel %vm8756_vm2, %v670_v53, %v674_v54 }
  0x80   :  { %881 = vmatprep.subr.bf16.mxu0 %v6085_v61  ;;  %v641_v61 = vld [vmem:[#allocation2 + $0x50] sm:$0x3]  ;;  %v687_v43 = vpack.c.bf16 %v675_v58, %v671_v26 }
  0x82   :  { %611 = vmatmul.mubr.bf16.vlgmr.msra.gmra.mrb[0].mxu0 %v132_v2  ;;  %v672_v2 = vrot.slane %v641_v61, 2 }
  0x83   :  { %882 = vmatpush1.bf16.msra.mxu0 %v6083_v3  ;;  %620 = vmatprep.mubr.bf16.mxu0 %v135_v5  ;;  %v668_v3 = vsel %vm8756_vm2, %v666_v63, %v667_v1 }
  0x84   :  { %883 = vmatprep.subr.bf16.mxu0 %v6088_v6  ;;  %v673_v5 = vsel %vm8756_vm2, %v667_v1, %v672_v2  ;;  %v6187_v2 = vld [vmem:[%s8736_s5 + $0x24] ss:$8 sps:$4 sm:$0xff]  }
  0x85   :  { %v686_v6 = vpack.c.bf16 %v673_v5, %v668_v3 }
  0x87   :  { %884 = vmatpush1.bf16.msra.mxu0 %v6086_v10  ;;  %v6176_v10 = vld [vmem:[%s8736_s5 + $0x1f4] ss:$8 sps:$4 sm:$0xff]  }
  0x88   :  { %885 = vmatprep.subr.bf16.mxu0 %v6091_v12  ;;  %1305 = vmatprep.subr.bf16.mxu1 %v6176_v10  ;;  %v6181_v12 = vld [vmem:[%s8736_s5 + $0x4] ss:$8 sps:$4 sm:$0xff]   ;;  %v6185_v10 = vld [vmem:[%s8736_s5 + $0x20] ss:$8 sps:$4 sm:$0xff]  }
  0x89   :  { %1306 = vmatpush1.bf16.msra.mxu1 %v6178_v11 }
  0x8a   :  { %621 = vmatmul.mubr.bf16.gmra.mrb[4].mxu0 %v134_v60  ;;  %1488 = vmatprep.subr.bf16.mxu1 %v6181_v12  ;;  %v942_v60 = vld [vmem:[%s8737_s3] sm:$0x3]  ;;  %v6190_v12 = vld [vmem:[%s8736_s5 + $0x34] ss:$8 sps:$4 sm:$0xff]   ;;  %s6504_s3 = smov 16  }
  0x8b   :  { %886 = vmatpush1.bf16.msra.mxu0 %v6089_v15  ;;  %913 = vmatprep.mubr.bf16.mxu0 %v685_v16  ;;  %v7059_v15 = vsub.s32 1, %v945_v13  ;;  %v962_v16 = vld [vmem:[%s8738_s4] sm:$0x3] }
  0x8c   :  { %887 = vmatprep.subr.bf16.mxu0 %v6094_v17  ;;  %v947_v17 = vrot.slane %v942_v60, %v7054_v14 }
  0x8d   :  { %8760 = vst [vmem:[#allocation6_spill] sm:$0xff] %v7059_v15  ;;  %v971_v0 = vrot.slane %v962_v16, %v7059_v15 }
  0x8f   :  { %888 = vmatpush1.bf16.msra.mxu0 %v6092_v18  ;;  %v951_v18 = vrot.slane %v942_v60, %v7059_v15 }
  0x90   :  { %889 = vmatprep.subr.bf16.mxu0 %v6097_v19  ;;  %v967_v19 = vrot.slane %v962_v16, %v7054_v14  ;;  %v6188_v16 = vld [vmem:[%s8736_s5 + $0x30] ss:$8 sps:$4 sm:$0xff]  }
  0x93   :  { %890 = vmatpush1.bf16.msra.mxu0 %v6095_v20 }
  0x94   :  { %891 = vmatprep.subr.bf16.mxu0 %v6100_v21 }
  0x97   :  { %892 = vmatpush1.bf16.msra.mxu0 %v6098_v22 }
  0x98   :  { %893 = vmatprep.subr.bf16.mxu0 %v6103_v23 }
  0x9b   :  { %894 = vmatpush1.bf16.msra.mxu0 %v6101_v24 }
  0x9c   :  { %895 = vmatprep.subr.bf16.mxu0 %v6106_v25 }
  0x9f   :  { %896 = vmatpush1.bf16.msra.mxu0 %v6104_v27 }
  0xa0   :  { %897 = vmatprep.subr.bf16.mxu0 %v6109_v28 }
  0xa3   :  { %898 = vmatpush1.bf16.msra.mxu0 %v6107_v29 }
  0xa4   :  { %899 = vmatprep.subr.bf16.mxu0 %v6112_v30 }
  0xa7   :  { %900 = vmatpush1.bf16.msra.mxu0 %v6110_v31 }
  0xa8   :  { %901 = vmatprep.subr.bf16.mxu0 %v6115_v32 }
  0xab   :  { %902 = vmatpush1.bf16.msra.mxu0 %v6113_v33 }
  0xac   :  { %903 = vmatprep.subr.bf16.mxu0 %v6118_v34 }
  0xaf   :  { %904 = vmatpush1.bf16.msra.mxu0 %v6116_v35 }
  0xb0   :  { %905 = vmatprep.subr.bf16.mxu0 %v6121_v36 }
  0xb3   :  { %906 = vmatpush1.bf16.msra.mxu0 %v6119_v37 }
  0xb4   :  { %907 = vmatprep.subr.bf16.mxu0 %v6124_v38 }
  0xb7   :  { %908 = vmatpush1.bf16.msra.mxu0 %v6122_v39 }
  0xb8   :  { %909 = vmatprep.subr.bf16.mxu0 %v6127_v40 }
  0xbb   :  { %910 = vmatpush1.bf16.msra.mxu0 %v6125_v47 }
  0xbc   :  { %911 = vmatprep.subr.bf16.mxu0 %v6130_v51 }
  0xbf   :  { %912 = vmatpush1.bf16.msra.mxu0 %v6128_v55  ;;  %v6184_v55 = vld [vmem:[%s8736_s5 + $0x14] ss:$8 sps:$4 sm:$0xff]  }
  0xc2   :  { %914 = vmatmul.mubr.bf16.vlgmr.msra.gmra.mrb[0].mxu0 %v684_v62 }
  0xc3   :  { %923 = vmatprep.mubr.bf16.mxu0 %v687_v43  ;;  %v6182_v43 = vld [vmem:[%s8736_s5 + $0x10] ss:$8 sps:$4 sm:$0xff]  }
  0xca   :  { %924 = vmatmul.mubr.bf16.gmra.mrb[4].mxu0 %v686_v6 }
 0x195   :  { %v915_v20 = vpop.f32.mrb[0].mxu0 }
 0x196   :  { %v954_v21 = vmul.f32 %v947_v17, %v915_v20  ;;  %v917_v22 = vpop.f32.mrb[1].mxu0  ;;  %v6194_v20 = vld [vmem:[%s8736_s5 + $0x50] ss:$8 sps:$4 sm:$0xff]  }
 0x197   :  { %v955_v23 = vmul.f32 %v951_v18, %v917_v22  ;;  %v919_v24 = vpop.f32.mrb[2].mxu0  ;;  %v6202_v22 = vld [vmem:[%s8736_s5 + $0x74] ss:$8 sps:$4 sm:$0xff]  }
 0x198   :  { %v974_v25 = vadd.f32 %v967_v19, %v954_v21  ;;  %v956_v27 = vmul.f32 %v947_v17, %v919_v24  ;;  %v921_v28 = vpop.f32.mrb[3].mxu0  ;;  %v6197_v21 = vld [vmem:[%s8736_s5 + $0x60] ss:$8 sps:$4 sm:$0xff]   ;;  %v6205_v24 = vld [vmem:[%s8736_s5 + $0x84] ss:$8 sps:$4 sm:$0xff]  }
 0x199   :  { %v957_v29 = vmul.f32 %v951_v18, %v921_v28  ;;  %v975_v30 = vadd.f32 %v971_v0, %v955_v23  ;;  %v6200_v23 = vld [vmem:[%s8736_s5 + $0x70] ss:$8 sps:$4 sm:$0xff]  }
 0x19a   :  { %v982_v31 = vmax.f32 %v974_v25, 0.0  ;;  %v976_v32 = vadd.f32 %v967_v19, %v956_v27  ;;  %v6203_v25 = vld [vmem:[%s8736_s5 + $0x80] ss:$8 sps:$4 sm:$0xff]   ;;  %v6208_v27 = vld [vmem:[%s8736_s5 + $0x94] ss:$8 sps:$4 sm:$0xff]  }
 0x19b   :  { %v977_v33 = vadd.f32 %v971_v0, %v957_v29  ;;  %v983_v34 = vmax.f32 %v975_v30, 0.0  ;;  %v6206_v28 = vld [vmem:[%s8736_s5 + $0x90] ss:$8 sps:$4 sm:$0xff]   ;;  %v6211_v29 = vld [vmem:[%s8736_s5 + $0xa4] ss:$8 sps:$4 sm:$0xff]  }
 0x19c   :  { %v998_v35 = vrot.slane %v982_v31, 7  ;;  %v984_v36 = vmax.f32 %v976_v32, 0.0  ;;  %v6209_v30 = vld [vmem:[%s8736_s5 + $0xa0] ss:$8 sps:$4 sm:$0xff]   ;;  %v6212_v32 = vld [vmem:[%s8736_s5 + $0xb0] ss:$8 sps:$4 sm:$0xff]  }
 0x19d   :  { %v925_v37 = vpop.f32.mrb[4].mxu0  ;;  %v985_v38 = vmax.f32 %v977_v33, 0.0  ;;  %v999_v39 = vrot.slane %v983_v34, 7  ;;  %v6217_v33 = vld [vmem:[%s8736_s5 + $0xc4] ss:$8 sps:$4 sm:$0xff]  }
 0x19e   :  { %1022 = vst [vmem:[#allocation2] sm:$0xfe] %v998_v35  ;;  %v1000_v40 = vrot.slane %v984_v36, 7  ;;  %v958_v41 = vmul.f32 %v947_v17, %v925_v37  ;;  %v927_v42 = vpop.f32.mrb[5].mxu0  ;;  %v1078_v44 = vpack.c.bf16 %v984_v36, %v982_v31  ;;  %v6214_v31 = vld [vmem:[%s8736_s5 + $0xb4] ss:$8 sps:$4 sm:$0xff]  }
 0x19f   :  { %v959_v45 = vmul.f32 %v951_v18, %v927_v42  ;;  %v929_v47 = vpop.f32.mrb[6].mxu0  ;;  %v1002_v48 = vrot.slane %v985_v38, 7  ;;  %1023 = vst [vmem:[#allocation2 + $0x8] sm:$0xfe] %v999_v39  ;;  %v1079_v49 = vpack.c.bf16 %v985_v38, %v983_v34  ;;  %v6215_v34 = vld [vmem:[%s8736_s5 + $0xc0] ss:$8 sps:$4 sm:$0xff]  }
 0x1a0   :  { %v7072_v51 = vsel %vm8757_vm1, %v998_v35, %v1000_v40  ;;  %1026 = vst [vmem:[#allocation2 + $0x20] sm:$0x1] %v1000_v40  ;;  %v978_v52 = vadd.f32 %v967_v19, %v958_v41  ;;  %v960_v53 = vmul.f32 %v947_v17, %v929_v47  ;;  %v931_v54 = vpop.f32.mrb[7].mxu0  ;;  %v6193_v17 = vld [vmem:[%s8736_s5 + $0x44] ss:$8 sps:$4 sm:$0xff]  }
 0x1a1   :  { %v979_v56 = vadd.f32 %v971_v0, %v959_v45  ;;  %v961_v57 = vmul.f32 %v951_v18, %v931_v54  ;;  %v7078_v26 = vsel %vm8757_vm1, %v999_v39, %v1002_v48  ;;  %1027 = vst [vmem:[#allocation2 + $0x28] sm:$0x1] %v1002_v48  ;;  %1307 = vmatprep.mubr.bf16.mxu1 %v1079_v49  ;;  %v6191_v18 = vld [vmem:[%s8736_s5 + $0x40] ss:$8 sps:$4 sm:$0xff]   ;;  %v6220_v35 = vld [vmem:[%s8736_s5 + $0xd4] ss:$8 sps:$4 sm:$0xff]  }
 0x1a2   :  { %v986_v58 = vmax.f32 %v978_v52, 0.0  ;;  %v980_v59 = vadd.f32 %v967_v19, %v960_v53  ;;  %1308 = vmatmul.mubr.bf16.vlgmr.msra.gmra.mrb[0].mxu1 %v1078_v44  ;;  %v6196_v19 = vld [vmem:[%s8736_s5 + $0x54] ss:$8 sps:$4 sm:$0xff]   ;;  %v6218_v36 = vld [vmem:[%s8736_s5 + $0xd0] ss:$8 sps:$4 sm:$0xff]  }
 0x1a3   :  { %v987_v61 = vmax.f32 %v979_v56, 0.0  ;;  %v981_v62 = vadd.f32 %v971_v0, %v961_v57  ;;  %1489 = vmatpush1.bf16.msra.mxu1 %v6179_v50  ;;  %v6199_v0 = vld [vmem:[%s8736_s5 + $0x64] ss:$8 sps:$4 sm:$0xff]   ;;  %v6221_v38 = vld [vmem:[%s8736_s5 + $0xe0] ss:$8 sps:$4 sm:$0xff]   ;;  %v1569_v57 = vrot.slane %v7078_v26, 2 }
 0x1a4   :  { %v1004_v63 = vrot.slane %v986_v58, 7  ;;  %v988_v1 = vmax.f32 %v980_v59, 0.0  ;;  %1490 = vmatprep.subr.bf16.mxu1 %v6184_v55  ;;  %v6223_v37 = vld [vmem:[%s8736_s5 + $0xe4] ss:$8 sps:$4 sm:$0xff]   ;;  %v6226_v39 = vld [vmem:[%s8736_s5 + $0xf4] ss:$8 sps:$4 sm:$0xff]  }
 0x1a5   :  { %v1005_v3 = vrot.slane %v987_v61, 7  ;;  %v989_v5 = vmax.f32 %v981_v62, 0.0  ;;  %v6224_v40 = vld [vmem:[%s8736_s5 + $0xf0] ss:$8 sps:$4 sm:$0xff]   ;;  %v6229_v41 = vld [vmem:[%s8736_s5 + $0x204] ss:$8 sps:$4 sm:$0xff]  }
 0x1a6   :  { %1028 = vst [vmem:[#allocation2 + $0x30] sm:$0xfe] %v1004_v63  ;;  %v1006_v6 = vrot.slane %v988_v1, 7  ;;  %v1080_v7 = vpack.c.bf16 %v988_v1, %v986_v58  ;;  %v1035_v8 = vld [vmem:[#allocation2 + $0x8] sm:$0xff]  ;;  %v1034_v42 = vld [vmem:[#allocation2] sm:$0xff] }
 0x1a7   :  { %1029 = vst [vmem:[#allocation2 + $0x38] sm:$0xfe] %v1005_v3  ;;  %v1008_v46 = vrot.slane %v989_v5, 7  ;;  %1491 = vmatpush1.bf16.msra.mxu1 %v6182_v43  ;;  %v1081_v9 = vpack.c.bf16 %v989_v5, %v987_v61  ;;  %v1043_v60 = vpack.c.bf16 %v7078_v26, %v1035_v8  ;;  %v6227_v45 = vld [vmem:[%s8736_s5 + $0x200] ss:$8 sps:$4 sm:$0xff]   ;;  %v1042_v48 = vpack.c.bf16 %v7072_v51, %v1034_v42 }
 0x1a8   :  { %v7090_v11 = vsel %vm8757_vm1, %v1004_v63, %v1006_v6  ;;  %1032 = vst [vmem:[#allocation2 + $0x50] sm:$0x1] %v1006_v6  ;;  %1492 = vmatprep.subr.bf16.mxu1 %v6187_v2  ;;  %v1546_v47 = vld [vmem:[#allocation2 + $0x28] sm:$0x3]  ;;  %v6232_v49 = vld [vmem:[%s8736_s5 + $0x214] ss:$8 sps:$4 sm:$0xff]  }
 0x1a9   :  { %v7096_v13 = vsel %vm8757_vm1, %v1005_v3, %v1008_v46  ;;  %1033 = vst [vmem:[#allocation2 + $0x58] sm:$0x1] %v1008_v46  ;;  %1317 = vmatprep.mubr.bf16.mxu1 %v1081_v9  ;;  %v1542_v52 = vld [vmem:[#allocation2 + $0x8] sm:$0xfc]  ;;  %v1573_v53 = vrot.slane %v1546_v47, 2  ;;  %vm2594_vm1 = vcmask 121856  }
 0x1aa   :  { %1318 = vmatmul.mubr.bf16.gmra.mrb[4].mxu1 %v1080_v7  ;;  %v6230_v54 = vld [vmem:[%s8736_s5 + $0x210] ss:$8 sps:$4 sm:$0xff]   ;;  %v6235_v55 = vld [vmem:[%s8736_s5 + $0x224] ss:$8 sps:$4 sm:$0xff]   ;;  %v1568_v56 = vrot.slane %v1542_v52, 2 }
 0x1ab   :  { %1493 = vmatpush1.bf16.msra.mxu1 %v6185_v10  ;;  %1520 = vmatprep.mubr.bf16.mxu1 %v1043_v60  ;;  %v1574_v59 = vsel %vm8756_vm2, %v1569_v57, %v1573_v53  ;;  %v6233_v61 = vld [vmem:[%s8736_s5 + $0x220] ss:$8 sps:$4 sm:$0xff]   ;;  %v6238_v63 = vld [vmem:[%s8736_s5 + $0x234] ss:$8 sps:$4 sm:$0xff]   ;;  %v6236_v26 = vld [vmem:[%s8736_s5 + $0x230] ss:$8 sps:$4 sm:$0xff]  }
 0x1ac   :  { %1494 = vmatprep.subr.bf16.mxu1 %v6190_v12  ;;  %v1570_v43 = vsel %vm8756_vm2, %v1568_v56, %v1569_v57  ;;  %v6241_v2 = vld [vmem:[%s8736_s5 + $0x244] ss:$8 sps:$4 sm:$0xff]   ;;  %v6239_v3 = vld [vmem:[%s8736_s5 + $0x240] ss:$8 sps:$4 sm:$0xff]   ;;  %v6244_v5 = vld [vmem:[%s8736_s5 + $0x254] ss:$8 sps:$4 sm:$0xff]  }
 0x1ad   :  { %v1038_v58 = vld [vmem:[#allocation2 + $0x30] sm:$0xff]  ;;  %v1594_v1 = vpack.c.bf16 %v1574_v59, %v1570_v43  ;;  %v6247_v7 = vld [vmem:[%s8736_s5 + $0x264] ss:$8 sps:$4 sm:$0xff]   ;;  %v6245_v8 = vld [vmem:[%s8736_s5 + $0x260] ss:$8 sps:$4 sm:$0xff]  }
 0x1ae   :  { %v1039_v44 = vld [vmem:[#allocation2 + $0x38] sm:$0xff]  ;;  %v1044_v62 = vpack.c.bf16 %v7090_v11, %v1038_v58  ;;  %v6253_v10 = vld [vmem:[%s8736_s5 + $0x284] ss:$8 sps:$4 sm:$0xff]   ;;  %v6251_v12 = vld [vmem:[%s8736_s5 + $0x280] ss:$8 sps:$4 sm:$0xff]  }
 0x1af   :  { %1495 = vmatpush1.bf16.msra.mxu1 %v6188_v16  ;;  %v1045_v50 = vpack.c.bf16 %v7096_v13, %v1039_v44  ;;  %v6242_v6 = vld [vmem:[%s8736_s5 + $0x250] ss:$8 sps:$4 sm:$0xff]   ;;  %v6250_v46 = vld [vmem:[%s8736_s5 + $0x274] ss:$8 sps:$4 sm:$0xff]  }
 0x1b0   :  { %1496 = vmatprep.subr.bf16.mxu1 %v6193_v17  ;;  %v6248_v9 = vld [vmem:[%s8736_s5 + $0x270] ss:$8 sps:$4 sm:$0xff]   ;;  %v6256_v60 = vld [vmem:[%s8736_s5 + $0x294] ss:$8 sps:$4 sm:$0xff]   ;;  %v6259_v17 = vld [vmem:[%s8736_s5 + $0x2a4] ss:$8 sps:$4 sm:$0xff]  }
 0x1b1   :  { %v6254_v16 = vld [vmem:[%s8736_s5 + $0x290] ss:$8 sps:$4 sm:$0xff]  }
 0x1b2   :  { %v1547_v47 = vld [vmem:[#allocation2 + $0x30] sm:$0xfc] }
 0x1b3   :  { %1497 = vmatpush1.bf16.msra.mxu1 %v6191_v18  ;;  %v6257_v18 = vld [vmem:[%s8736_s5 + $0x2a0] ss:$8 sps:$4 sm:$0xff]  }
 0x1b4   :  { %1498 = vmatprep.subr.bf16.mxu1 %v6196_v19  ;;  %v6262_v19 = vld [vmem:[%s8736_s5 + $0x2b4] ss:$8 sps:$4 sm:$0xff]  }
 0x1b7   :  { %1499 = vmatpush1.bf16.msra.mxu1 %v6194_v20  ;;  %v6260_v20 = vld [vmem:[%s8736_s5 + $0x2b0] ss:$8 sps:$4 sm:$0xff]  }
 0x1b8   :  { %1500 = vmatprep.subr.bf16.mxu1 %v6199_v0  ;;  %v6265_v0 = vld [vmem:[%s8736_s5 + $0x2c4] ss:$8 sps:$4 sm:$0xff]  }
 0x1bb   :  { %1501 = vmatpush1.bf16.msra.mxu1 %v6197_v21  ;;  %v6263_v21 = vld [vmem:[%s8736_s5 + $0x2c0] ss:$8 sps:$4 sm:$0xff]  }
 0x1bc   :  { %1502 = vmatprep.subr.bf16.mxu1 %v6202_v22  ;;  %v6268_v22 = vld [vmem:[%s8736_s5 + $0x2d4] ss:$8 sps:$4 sm:$0xff]  }
 0x1bf   :  { %1503 = vmatpush1.bf16.msra.mxu1 %v6200_v23  ;;  %v6266_v23 = vld [vmem:[%s8736_s5 + $0x2d0] ss:$8 sps:$4 sm:$0xff]  }
 0x1c0   :  { %1504 = vmatprep.subr.bf16.mxu1 %v6205_v24  ;;  %v6271_v24 = vld [vmem:[%s8736_s5 + $0x2e4] ss:$8 sps:$4 sm:$0xff]  }
 0x1c3   :  { %1505 = vmatpush1.bf16.msra.mxu1 %v6203_v25  ;;  %v1545_v25 = vld [vmem:[#allocation2 + $0x20] sm:$0x3] }
 0x1c4   :  { %1506 = vmatprep.subr.bf16.mxu1 %v6208_v27  ;;  %v6269_v27 = vld [vmem:[%s8736_s5 + $0x2e0] ss:$8 sps:$4 sm:$0xff]  }
 0x1c7   :  { %1507 = vmatpush1.bf16.msra.mxu1 %v6206_v28  ;;  %v1552_v28 = vld [vmem:[#allocation2 + $0x58] sm:$0x3] }
 0x1c8   :  { %1508 = vmatprep.subr.bf16.mxu1 %v6211_v29  ;;  %v6274_v29 = vld [vmem:[%s8736_s5 + $0x2f4] ss:$8 sps:$4 sm:$0xff]  }
 0x1cb   :  { %1509 = vmatpush1.bf16.msra.mxu1 %v6209_v30  ;;  %v1541_v30 = vld [vmem:[#allocation2] sm:$0xfc] }
 0x1cc   :  { %1510 = vmatprep.subr.bf16.mxu1 %v6214_v31  ;;  %v1571_v31 = vrot.slane %v1545_v25, 2 }
 0x1cf   :  { %1511 = vmatpush1.bf16.msra.mxu1 %v6212_v32  ;;  %v1548_v32 = vld [vmem:[#allocation2 + $0x38] sm:$0xfc] }
 0x1d0   :  { %1512 = vmatprep.subr.bf16.mxu1 %v6217_v33  ;;  %v1583_v33 = vrot.slane %v1552_v28, 2 }
 0x1d3   :  { %1513 = vmatpush1.bf16.msra.mxu1 %v6215_v34  ;;  %v6272_v34 = vld [vmem:[%s8736_s5 + $0x2f0] ss:$8 sps:$4 sm:$0xff]  }
 0x1d4   :  { %1514 = vmatprep.subr.bf16.mxu1 %v6220_v35  ;;  %v1565_v35 = vrot.slane %v1541_v30, 2 }
 0x1d7   :  { %1515 = vmatpush1.bf16.msra.mxu1 %v6218_v36  ;;  %v1566_v36 = vrot.slane %v7072_v51, 2  ;;  %v1575_v51 = vrot.slane %v1547_v47, 2 }
 0x1d8   :  { %1516 = vmatprep.subr.bf16.mxu1 %v6223_v37  ;;  %v1578_v37 = vrot.slane %v1548_v32, 2 }
 0x1d9   :  { %v1567_v42 = vsel %vm8756_vm2, %v1565_v35, %v1566_v36 }
 0x1db   :  { %1517 = vmatpush1.bf16.msra.mxu1 %v6221_v38  ;;  %v1579_v38 = vrot.slane %v7096_v13, 2 }
 0x1dc   :  { %1518 = vmatprep.subr.bf16.mxu1 %v6226_v39  ;;  %v1572_v39 = vsel %vm8756_vm2, %v1566_v36, %v1571_v31 }
 0x1dd   :  { %v1593_v44 = vpack.c.bf16 %v1572_v39, %v1567_v42 }
 0x1df   :  { %1519 = vmatpush1.bf16.msra.mxu1 %v6224_v40  ;;  %v1584_v40 = vsel %vm8756_vm2, %v1579_v38, %v1583_v33 }
 0x1e0   :  { %1790 = vmatprep.subr.bf16.mxu1 %v6229_v41  ;;  %v1551_v41 = vld [vmem:[#allocation2 + $0x50] sm:$0x3] }
 0x1e2   :  { %1521 = vmatmul.mubr.bf16.vlgmr.msra.gmra.mrb[0].mxu1 %v1042_v48 }
 0x1e3   :  { %1530 = vmatprep.mubr.bf16.mxu1 %v1045_v50  ;;  %1791 = vmatpush1.bf16.msra.mxu1 %v6227_v45  ;;  %v1580_v45 = vsel %vm8756_vm2, %v1578_v37, %v1579_v38  ;;  %v1576_v50 = vrot.slane %v7090_v11, 2 }
 0x1e4   :  { %1792 = vmatprep.subr.bf16.mxu1 %v6232_v49  ;;  %v1596_v48 = vpack.c.bf16 %v1584_v40, %v1580_v45  ;;  %v1581_v49 = vrot.slane %v1551_v41, 2 }
 0x1e5   :  { %v1577_v52 = vsel %vm8756_vm2, %v1575_v51, %v1576_v50 }
 0x1e6   :  { %v1582_v13 = vsel %vm8756_vm2, %v1576_v50, %v1581_v49  ;;  %vm2589_vm2 = vcmask 113664  }
 0x1e7   :  { %1793 = vmatpush1.bf16.msra.mxu1 %v6230_v54  ;;  %v1595_v53 = vpack.c.bf16 %v1582_v13, %v1577_v52  ;;  %v1851_v54 = vld [vmem:[%s8739_s6] sm:$0x3]  ;;  %s6498_s6 = smov 64  }
 0x1e8   :  { %1794 = vmatprep.subr.bf16.mxu1 %v6235_v55  ;;  %v1871_v55 = vld [vmem:[%s8740_s7] sm:$0x3]  ;;  %v1856_v56 = vrot.slane %v1851_v54, %v7054_v14  ;;  %v1860_v57 = vrot.slane %v1851_v54, %v7059_v15  ;;  %s6499_s7 = smov 112  }
 0x1e9   :  { %v1876_v11 = vrot.slane %v1871_v55, %v7054_v14  ;;  %v1880_v59 = vrot.slane %v1871_v55, %v7059_v15 }
 0x1ea   :  { %1531 = vmatmul.mubr.bf16.gmra.mrb[4].mxu1 %v1044_v62 }
 0x1eb   :  { %1795 = vmatpush1.bf16.msra.mxu1 %v6233_v61  ;;  %1822 = vmatprep.mubr.bf16.mxu1 %v1594_v1 }
 0x1ec   :  { %1796 = vmatprep.subr.bf16.mxu1 %v6238_v63 }
 0x1ef   :  { %1797 = vmatpush1.bf16.msra.mxu1 %v6236_v26 }
 0x1f0   :  { %1798 = vmatprep.subr.bf16.mxu1 %v6241_v2 }
 0x1f3   :  { %1799 = vmatpush1.bf16.msra.mxu1 %v6239_v3 }
 0x1f4   :  { %1800 = vmatprep.subr.bf16.mxu1 %v6244_v5 }
 0x1f7   :  { %1801 = vmatpush1.bf16.msra.mxu1 %v6242_v6 }
 0x1f8   :  { %1802 = vmatprep.subr.bf16.mxu1 %v6247_v7 }
 0x1fb   :  { %1803 = vmatpush1.bf16.msra.mxu1 %v6245_v8 }
 0x1fc   :  { %1804 = vmatprep.subr.bf16.mxu1 %v6250_v46 }
 0x1ff   :  { %1805 = vmatpush1.bf16.msra.mxu1 %v6248_v9 }
 0x200   :  { %1806 = vmatprep.subr.bf16.mxu1 %v6253_v10 }
 0x203   :  { %1807 = vmatpush1.bf16.msra.mxu1 %v6251_v12 }
 0x204   :  { %1808 = vmatprep.subr.bf16.mxu1 %v6256_v60 }
 0x207   :  { %1809 = vmatpush1.bf16.msra.mxu1 %v6254_v16 }
 0x208   :  { %1810 = vmatprep.subr.bf16.mxu1 %v6259_v17 }
 0x20b   :  { %1811 = vmatpush1.bf16.msra.mxu1 %v6257_v18 }
 0x20c   :  { %1812 = vmatprep.subr.bf16.mxu1 %v6262_v19 }
 0x20f   :  { %1813 = vmatpush1.bf16.msra.mxu1 %v6260_v20 }
 0x210   :  { %1814 = vmatprep.subr.bf16.mxu1 %v6265_v0 }
 0x213   :  { %1815 = vmatpush1.bf16.msra.mxu1 %v6263_v21 }
 0x214   :  { %1816 = vmatprep.subr.bf16.mxu1 %v6268_v22 }
 0x217   :  { %1817 = vmatpush1.bf16.msra.mxu1 %v6266_v23 }
 0x218   :  { %1818 = vmatprep.subr.bf16.mxu1 %v6271_v24 }
 0x21b   :  { %1819 = vmatpush1.bf16.msra.mxu1 %v6269_v27 }
 0x21c   :  { %1820 = vmatprep.subr.bf16.mxu1 %v6274_v29 }
 0x21f   :  { %1821 = vmatpush1.bf16.msra.mxu1 %v6272_v34 }
 0x222   :  { %1823 = vmatmul.mubr.bf16.vlgmr.msra.gmra.mrb[0].mxu1 %v1593_v44 }
 0x223   :  { %1832 = vmatprep.mubr.bf16.mxu1 %v1596_v48 }
 0x22a   :  { %1833 = vmatmul.mubr.bf16.gmra.mrb[4].mxu1 %v1595_v53 }
 0x2f5   :  { %v1824_v58 = vpop.f32.mrb[0].mxu1 }
 0x2f6   :  { %v1863_v61 = vmul.f32 %v1856_v56, %v1824_v58  ;;  %v1826_v62 = vpop.f32.mrb[1].mxu1 }
 0x2f7   :  { %v1864_v43 = vmul.f32 %v1860_v57, %v1826_v62  ;;  %v1828_v63 = vpop.f32.mrb[2].mxu1 }
 0x2f8   :  { %v7295_v1 = vadd.f32 %v1876_v11, %v1863_v61  ;;  %v1865_v26 = vmul.f32 %v1856_v56, %v1828_v63  ;;  %v1830_v2 = vpop.f32.mrb[3].mxu1 }
 0x2f9   :  { %v7297_v3 = vadd.f32 %v1880_v59, %v1864_v43  ;;  %v1866_v5 = vmul.f32 %v1860_v57, %v1830_v2 }
 0x2fa   :  { %8761 = vst [vmem:[#allocation7_spill] sm:$0xff] %v7295_v1  ;;  %v7299_v6 = vadd.f32 %v1876_v11, %v1865_v26  ;;  %2048 = vrot.lane.b32.xlu1 %v7295_v1, %s6498_s6  ;;  %1925 = vrot.lane.b32.xlu0 %v7295_v1, %s6499_s7  ;;  %v1909_v21 = vsel %vm1891_vm3, %v7295_v1, -inf  ;;  %v1954_v22 = vsel %vm1953_vm4, %v7295_v1, -inf  ;;  %v2036_v23 = vsel %vm2035_vm5, %v7295_v1, -inf }
 0x2fb   :  { %v7305_v7 = vadd.f32 %v1880_v59, %v1866_v5  ;;  %v1995_v24 = vsel %vm1994_vm6, %v7295_v1, -inf  ;;  %v2077_v25 = vsel %vm2076_vm7, %v7295_v1, -inf  ;;  %v2159_v27 = vsel %vm2158_vm8, %v7295_v1, -inf }
 0x2fc   :  { %v2118_v28 = vsel %vm2117_vm9, %v7295_v1, -inf  ;;  %v2200_v29 = vsel %vm2199_vm10, %v7295_v1, -inf  ;;  %v2228_v30 = vsel %vm1891_vm3, %v7297_v3, -inf  ;;  %v2272_v31 = vsel %vm1953_vm4, %v7297_v3, -inf }
 0x2fd   :  { %v1834_v8 = vpop.f32.mrb[4].mxu1  ;;  %v2312_v32 = vsel %vm1994_vm6, %v7297_v3, -inf  ;;  %v2352_v33 = vsel %vm2035_vm5, %v7297_v3, -inf  ;;  %v2392_v34 = vsel %vm2076_vm7, %v7297_v3, -inf  ;;  %v1957_v35 = vsel %vm1953_vm4, %v7299_v6, -inf }
 0x2fe   :  { %v1867_v46 = vmul.f32 %v1856_v56, %v1834_v8  ;;  %2089 = vrot.lane.b32.xlu1 %v7295_v1, %s6500_s23  ;;  %1966 = vrot.lane.b32.xlu0 %v7295_v1, %s6501_s24  ;;  %v1836_v9 = vpop.f32.mrb[5].mxu1  ;;  %v1998_v36 = vsel %vm1994_vm6, %v7299_v6, -inf  ;;  %v2039_v37 = vsel %vm2035_vm5, %v7299_v6, -inf  ;;  %v2080_v38 = vsel %vm2076_vm7, %v7299_v6, -inf }
 0x2ff   :  { %v1868_v10 = vmul.f32 %v1860_v57, %v1836_v9  ;;  %v1838_v12 = vpop.f32.mrb[6].mxu1  ;;  %v2121_v39 = vsel %vm2117_vm9, %v7299_v6, -inf  ;;  %v2162_v40 = vsel %vm2158_vm8, %v7299_v6, -inf  ;;  %v2203_v41 = vsel %vm2199_vm10, %v7299_v6, -inf }
 0x300   :  { %v7311_v60 = vadd.f32 %v1876_v11, %v1867_v46  ;;  %v1869_v16 = vmul.f32 %v1856_v56, %v1838_v12  ;;  %v1840_v17 = vpop.f32.mrb[7].mxu1  ;;  %v1912_v42 = vsel %vm1891_vm3, %v7299_v6, -inf  ;;  %v2231_v44 = vsel %vm1891_vm3, %v7305_v7, -inf }
 0x301   :  { %v7313_v18 = vadd.f32 %v1880_v59, %v1868_v10  ;;  %v1870_v19 = vmul.f32 %v1860_v57, %v1840_v17  ;;  %v2275_v45 = vsel %vm1953_vm4, %v7305_v7, -inf  ;;  %v2315_v47 = vsel %vm1994_vm6, %v7305_v7, -inf }
 0x302   :  { %8762 = vst [vmem:[#allocation8_spill] sm:$0xff] %v7311_v60  ;;  %v7315_v20 = vadd.f32 %v1876_v11, %v1869_v16  ;;  %2130 = vrot.lane.b32.xlu1 %v7295_v1, %s6502_s0  ;;  %2007 = vrot.lane.b32.xlu0 %v7295_v1, %s6503_s2  ;;  %v2355_v48 = vsel %vm2035_vm5, %v7305_v7, -inf  ;;  %v2395_v49 = vsel %vm2076_vm7, %v7305_v7, -inf  ;;  %v1915_v51 = vsel %vm1891_vm3, %v7311_v60, -inf }
 0x303   :  { %v7321_v0 = vadd.f32 %v1880_v59, %v1870_v19  ;;  %v1960_v13 = vsel %vm1953_vm4, %v7311_v60, -inf  ;;  %v2001_v53 = vsel %vm1994_vm6, %v7311_v60, -inf  ;;  %v2042_v55 = vsel %vm2035_vm5, %v7311_v60, -inf }
 0x304   :  { %v2083_v11 = vsel %vm2076_vm7, %v7311_v60, -inf  ;;  %v2206_v59 = vsel %vm2199_vm10, %v7311_v60, -inf  ;;  %v2124_v43 = vsel %vm2117_vm9, %v7311_v60, -inf  ;;  %v2165_v2 = vsel %vm2158_vm8, %v7311_v60, -inf }
 0x306   :  { %2171 = vrot.lane.b32.xlu1 %v7295_v1, %s6504_s3 }
 0x321   :  { %1910 = vmax.xlane.f32.xlu0 %v1909_v21 }
 0x325   :  { %1955 = vmax.xlane.f32.xlu0 %v1954_v22 }
 0x329   :  { %2037 = vmax.xlane.f32.xlu0 %v2036_v23 }
 0x32a   :  { %1996 = vmax.xlane.f32.xlu1 %v1995_v24 }
 0x32d   :  { %2078 = vmax.xlane.f32.xlu0 %v2077_v25 }
 0x32e   :  { %2160 = vmax.xlane.f32.xlu1 %v2159_v27 }
 0x331   :  { %2119 = vmax.xlane.f32.xlu0 %v2118_v28 }
 0x33f   :  { %2244 = vrot.lane.b32.xlu1 %v7297_v3, %s6499_s7 }
 0x347   :  { %1927 = vrot.lane.b32.xlu0 %v7299_v6, %s6499_s7 }
 0x363   :  { %2201 = vmax.xlane.f32.xlu1 %v2200_v29 }
 0x366   :  { %2229 = vmax.xlane.f32.xlu0 %v2228_v30 }
 0x36a   :  { %2273 = vmax.xlane.f32.xlu0 %v2272_v31 }
 0x36c   :  { %v7435_v50 = vpop.permute.xlu1 %2048  ;;  %v7439_v52 = vpop.permute.xlu0 %1925 }
 0x36e   :  { %2313 = vmax.xlane.f32.xlu0 %v2312_v32 }
 0x370   :  { %v7443_v54 = vpop.permute.xlu1 %2089  ;;  %v7447_v56 = vpop.permute.xlu0 %1966 }
 0x372   :  { %2353 = vmax.xlane.f32.xlu0 %v2352_v33  ;;  %v2234_v33 = vsel %vm1891_vm3, %v7313_v18, -inf }
 0x374   :  { %2284 = vrot.lane.b32.xlu1 %v7297_v3, %s6501_s24  ;;  %v7449_v57 = vpop.permute.xlu1 %2130  ;;  %v7453_v58 = vpop.permute.xlu0 %2007 }
 0x376   :  { %2393 = vmax.xlane.f32.xlu0 %v2392_v34 }
 0x378   :  { %2324 = vrot.lane.b32.xlu1 %v7297_v3, %s6503_s2  ;;  %v7457_v61 = vpop.permute.xlu1 %2171 }
 0x37a   :  { %1958 = vmax.xlane.f32.xlu0 %v1957_v35 }
 0x37c   :  { %2364 = vrot.lane.b32.xlu1 %v7297_v3, %s6498_s6 }
 0x37e   :  { %1999 = vmax.xlane.f32.xlu0 %v1998_v36  ;;  %v2278_v36 = vsel %vm1953_vm4, %v7313_v18, -inf }
 0x380   :  { %2404 = vrot.lane.b32.xlu1 %v7297_v3, %s6500_s23 }
 0x382   :  { %2040 = vmax.xlane.f32.xlu0 %v2039_v37 }
 0x384   :  { %2444 = vrot.lane.b32.xlu1 %v7297_v3, %s6502_s0 }
 0x386   :  { %2081 = vmax.xlane.f32.xlu0 %v2080_v38  ;;  %v2318_v38 = vsel %vm1994_vm6, %v7313_v18, -inf }
 0x388   :  { %2484 = vrot.lane.b32.xlu1 %v7297_v3, %s6504_s3 }
 0x38a   :  { %2122 = vmax.xlane.f32.xlu0 %v2121_v39 }
 0x38c   :  { %1968 = vrot.lane.b32.xlu1 %v7299_v6, %s6501_s24 }
 0x38e   :  { %2163 = vmax.xlane.f32.xlu0 %v2162_v40  ;;  %v2358_v40 = vsel %vm2035_vm5, %v7313_v18, -inf }
 0x390   :  { %2009 = vrot.lane.b32.xlu1 %v7299_v6, %s6503_s2 }
 0x394   :  { %2050 = vrot.lane.b32.xlu1 %v7299_v6, %s6498_s6 }
 0x398   :  { %2091 = vrot.lane.b32.xlu1 %v7299_v6, %s6500_s23 }
 0x39c   :  { %2132 = vrot.lane.b32.xlu1 %v7299_v6, %s6502_s0 }
 0x3a0   :  { %2173 = vrot.lane.b32.xlu1 %v7299_v6, %s6504_s3 }
 0x3a4   :  { %2246 = vrot.lane.b32.xlu0 %v7305_v7, %s6499_s7 }
 0x3ae   :  { %v7459_v62 = vpop.xlane.xlu0 %1910 }
 0x3b2   :  { %v7465_v26 = vpop.xlane.xlu0 %1955 }
 0x3b6   :  { %v7471_v8 = vpop.xlane.xlu0 %2037 }
 0x3b7   :  { %v7463_v63 = vpop.xlane.xlu1 %1996 }
 0x3ba   :  { %v7475_v9 = vpop.xlane.xlu0 %2078 }
 0x3bb   :  { %v7469_v5 = vpop.xlane.xlu1 %2160 }
 0x3be   :  { %v7481_v12 = vpop.xlane.xlu0 %2119 }
 0x3bf   :  { %v7473_v46 = vpop.permute.xlu1 %2244 }
 0x3c2   :  { %v7493_v17 = vpop.permute.xlu0 %1927 }
 0x3c3   :  { %2204 = vmax.xlane.f32.xlu0 %v2203_v41 }
 0x3c4   :  { %1913 = vmax.xlane.f32.xlu1 %v1912_v42 }
 0x3c7   :  { %2232 = vmax.xlane.f32.xlu0 %v2231_v44  ;;  %v1963_v44 = vsel %vm1953_vm4, %v7315_v20, -inf }
 0x3cb   :  { %2276 = vmax.xlane.f32.xlu0 %v2275_v45 }
 0x3cf   :  { %2316 = vmax.xlane.f32.xlu0 %v2315_v47  ;;  %v2127_v47 = vsel %vm2117_vm9, %v7315_v20, -inf }
 0x3d3   :  { %2356 = vmax.xlane.f32.xlu0 %v2355_v48  ;;  %v1918_v48 = vsel %vm1891_vm3, %v7315_v20, -inf }
 0x3d5   :  { %2286 = vrot.lane.b32.xlu1 %v7305_v7, %s6501_s24 }
 0x3d7   :  { %2396 = vmax.xlane.f32.xlu0 %v2395_v49 }
 0x3d9   :  { %2326 = vrot.lane.b32.xlu1 %v7305_v7, %s6503_s2 }
 0x3dd   :  { %2366 = vrot.lane.b32.xlu1 %v7305_v7, %s6498_s6 }
 0x3e1   :  { %2406 = vrot.lane.b32.xlu1 %v7305_v7, %s6500_s23 }
 0x3e5   :  { %2446 = vrot.lane.b32.xlu1 %v7305_v7, %s6502_s0 }
 0x3e9   :  { %2486 = vrot.lane.b32.xlu1 %v7305_v7, %s6504_s3 }
 0x3ed   :  { %1970 = vrot.lane.b32.xlu0 %v7311_v60, %s6501_s24  ;;  %1929 = vrot.lane.b32.xlu1 %v7311_v60, %s6499_s7 }
 0x3f0   :  { %v7477_v10 = vpop.xlane.xlu1 %2201 }
 0x3f1   :  { %2011 = vrot.lane.b32.xlu1 %v7311_v60, %s6503_s2  ;;  %8763 = vst [vmem:[#allocation9_spill] sm:$0xff] %v7477_v10 }
 0x3f3   :  { %v7501_v21 = vpop.xlane.xlu0 %2229 }
 0x3f4   :  { %v7487_v16 = vpop.permute.xlu1 %2284  ;;  %8764 = vst [vmem:[#allocation10_spill] sm:$0xff] %v7501_v21 }
 0x3f5   :  { %2052 = vrot.lane.b32.xlu1 %v7311_v60, %s6498_s6 }
 0x3f7   :  { %v7509_v23 = vpop.xlane.xlu0 %2273 }
 0x3f8   :  { %v7495_v19 = vpop.permute.xlu1 %2324  ;;  %8765 = vst [vmem:[#allocation11_spill] sm:$0xff] %v7509_v23 }
 0x3f9   :  { %2093 = vrot.lane.b32.xlu1 %v7311_v60, %s6500_s23 }
 0x3fb   :  { %v7517_v25 = vpop.xlane.xlu0 %2313 }
 0x3fc   :  { %v7507_v22 = vpop.permute.xlu1 %2364  ;;  %8766 = vst [vmem:[#allocation12_spill] sm:$0xff] %v7517_v25  ;;  %v2518_v25 = vsel %vm2199_vm10, %v7313_v18, -inf }
 0x3fd   :  { %2134 = vrot.lane.b32.xlu1 %v7311_v60, %s6502_s0 }
 0x3ff   :  { %v7523_v28 = vpop.xlane.xlu0 %2353 }
 0x400   :  { %v7513_v24 = vpop.permute.xlu1 %2404  ;;  %8767 = vst [vmem:[#allocation13_spill] sm:$0xff] %v7523_v28  ;;  %v2478_v28 = vsel %vm2158_vm8, %v7313_v18, -inf }
 0x401   :  { %2175 = vrot.lane.b32.xlu1 %v7311_v60, %s6504_s3 }
 0x403   :  { %v7529_v30 = vpop.xlane.xlu0 %2393 }
 0x404   :  { %v7521_v27 = vpop.permute.xlu1 %2444  ;;  %8768 = vst [vmem:[#allocation14_spill] sm:$0xff] %v7529_v30  ;;  %v2472_v30 = vsel %vm2158_vm8, %v7297_v3, -inf }
 0x407   :  { %v7533_v32 = vpop.xlane.xlu0 %1958 }
 0x408   :  { %v7527_v29 = vpop.permute.xlu1 %2484  ;;  %8769 = vst [vmem:[#allocation15_spill] sm:$0xff] %v7533_v32  ;;  %v2435_v32 = vsel %vm2117_vm9, %v7305_v7, -inf }
 0x40b   :  { %v7539_v35 = vpop.xlane.xlu0 %1999 }
 0x40c   :  { %1916 = vmax.xlane.f32.xlu0 %v1915_v51  ;;  %v7531_v31 = vpop.permute.xlu1 %1968  ;;  %8770 = vst [vmem:[#allocation16_spill] sm:$0xff] %v7539_v35  ;;  %v2168_v51 = vsel %vm2158_vm8, %v7315_v20, -inf }
 0x40f   :  { %v7547_v39 = vpop.xlane.xlu0 %2040 }
 0x410   :  { %1961 = vmax.xlane.f32.xlu0 %v1960_v13  ;;  %v7537_v34 = vpop.permute.xlu1 %2009  ;;  %8771 = vst [vmem:[#allocation17_spill] sm:$0xff] %v7547_v39 }
 0x413   :  { %v7553_v42 = vpop.xlane.xlu0 %2081 }
 0x414   :  { %2002 = vmax.xlane.f32.xlu0 %v2001_v53  ;;  %v7543_v37 = vpop.permute.xlu1 %2050  ;;  %8772 = vst [vmem:[#allocation18_spill] sm:$0xff] %v7553_v42  ;;  %v2004_v53 = vsel %vm1994_vm6, %v7315_v20, -inf  ;;  %v2398_v42 = vsel %vm2076_vm7, %v7313_v18, -inf }
 0x417   :  { %v7563_v49 = vpop.xlane.xlu0 %2122 }
 0x418   :  { %2043 = vmax.xlane.f32.xlu0 %v2042_v55  ;;  %v7551_v41 = vpop.permute.xlu1 %2091  ;;  %8773 = vst [vmem:[#allocation19_spill] sm:$0xff] %v7563_v49 }
 0x41b   :  { %v7571_v55 = vpop.xlane.xlu0 %2163 }
 0x41c   :  { %2084 = vmax.xlane.f32.xlu0 %v2083_v11  ;;  %v7557_v45 = vpop.permute.xlu1 %2132  ;;  %8774 = vst [vmem:[#allocation20_spill] sm:$0xff] %v7571_v55 }
 0x420   :  { %2207 = vmax.xlane.f32.xlu0 %v2206_v59  ;;  %v7567_v13 = vpop.permute.xlu1 %2173  ;;  %v2045_v59 = vsel %vm2035_vm5, %v7315_v20, -inf }
 0x425   :  { %2125 = vmax.xlane.f32.xlu1 %v2124_v43  ;;  %v2086_v43 = vsel %vm2076_vm7, %v7315_v20, -inf }
 0x429   :  { %2166 = vmax.xlane.f32.xlu1 %v2165_v2  ;;  %v7579_v2 = vpop.permute.xlu0 %2246 }
 0x436   :  { %2013 = vrot.lane.b32.xlu0 %v7315_v20, %s6503_s2 }
 0x43a   :  { %2248 = vrot.lane.b32.xlu1 %v7313_v18, %s6499_s7  ;;  %2054 = vrot.lane.b32.xlu0 %v7315_v20, %s6498_s6 }
 0x43e   :  { %2288 = vrot.lane.b32.xlu1 %v7313_v18, %s6501_s24  ;;  %2095 = vrot.lane.b32.xlu0 %v7315_v20, %s6500_s23 }
 0x442   :  { %2328 = vrot.lane.b32.xlu1 %v7313_v18, %s6503_s2  ;;  %2136 = vrot.lane.b32.xlu0 %v7315_v20, %s6502_s0 }
 0x446   :  { %2368 = vrot.lane.b32.xlu1 %v7313_v18, %s6498_s6  ;;  %2177 = vrot.lane.b32.xlu0 %v7315_v20, %s6504_s3 }
 0x44a   :  { %2408 = vrot.lane.b32.xlu1 %v7313_v18, %s6500_s23 }
 0x44e   :  { %2448 = vrot.lane.b32.xlu1 %v7313_v18, %s6502_s0 }
 0x451   :  { %v7573_v11 = vpop.xlane.xlu1 %1913 }
 0x452   :  { %1931 = vrot.lane.b32.xlu1 %v7315_v20, %s6499_s7  ;;  %8775 = vst [vmem:[#allocation21_spill] sm:$0xff] %v7573_v11 }
 0x456   :  { %1972 = vrot.lane.b32.xlu1 %v7315_v20, %s6501_s24 }
 0x465   :  { %2235 = vmax.xlane.f32.xlu0 %v2234_v33  ;;  %v7581_v33 = vpop.permute.xlu1 %2286 }
 0x469   :  { %2279 = vmax.xlane.f32.xlu0 %v2278_v36  ;;  %v2209_v36 = vsel %vm2199_vm10, %v7315_v20, -inf }
 0x46d   :  { %2319 = vmax.xlane.f32.xlu0 %v2318_v38  ;;  %v7585_v38 = vpop.xlane.xlu0 %2204 }
 0x46e   :  { %8776 = vst [vmem:[#allocation22_spill] sm:$0xff] %v7585_v38 }
 0x471   :  { %2359 = vmax.xlane.f32.xlu0 %v2358_v40  ;;  %v7587_v40 = vpop.permute.xlu1 %2326 }
 0x472   :  { %8777 = vst [vmem:[#allocation23_spill] sm:$0xff] %v7587_v40 }
 0x475   :  { %1964 = vmax.xlane.f32.xlu0 %v1963_v44  ;;  %v2237_v44 = vsel %vm1891_vm3, %v7321_v0, -inf }
 0x479   :  { %2128 = vmax.xlane.f32.xlu0 %v2127_v47  ;;  %v7591_v47 = vpop.xlane.xlu0 %2232 }
 0x47a   :  { %1919 = vmax.xlane.f32.xlu1 %v1918_v48  ;;  %8778 = vst [vmem:[#allocation24_spill] sm:$0xff] %v7591_v47  ;;  %v2281_v48 = vsel %vm1953_vm4, %v7321_v0, -inf  ;;  %vm2554_vm4 = vcmask 56320  }
 0x47d   :  { %2169 = vmax.xlane.f32.xlu0 %v2168_v51  ;;  %v7595_v51 = vpop.permute.xlu1 %2366 }
 0x47e   :  { %2005 = vmax.xlane.f32.xlu1 %v2004_v53  ;;  %8779 = vst [vmem:[#allocation25_spill] sm:$0xff] %v7595_v51  ;;  %v2321_v53 = vsel %vm1994_vm6, %v7321_v0, -inf  ;;  %vm2564_vm6 = vcmask 72704  }
 0x482   :  { %2046 = vmax.xlane.f32.xlu1 %v2045_v59  ;;  %v7601_v59 = vpop.xlane.xlu0 %2276 }
 0x483   :  { %8780 = vst [vmem:[#allocation26_spill] sm:$0xff] %v7601_v59 }
 0x486   :  { %2087 = vmax.xlane.f32.xlu1 %v2086_v43  ;;  %v7605_v43 = vpop.permute.xlu1 %2406 }
 0x487   :  { %8781 = vst [vmem:[#allocation27_spill] sm:$0xff] %v7605_v43  ;;  %v2438_v43 = vsel %vm2117_vm9, %v7313_v18, -inf }
 0x48a   :  { %2210 = vmax.xlane.f32.xlu1 %v2209_v36  ;;  %v2361_v36 = vsel %vm2035_vm5, %v7321_v0, -inf  ;;  %v7615_v4 = vpop.permute.xlu1 %2446  ;;  %vm2559_vm5 = vcmask 64512  }
 0x48b   :  { %8783 = vst [vmem:[#allocation29_spill] sm:$0xff] %v7615_v4 }
 0x48e   :  { %2238 = vmax.xlane.f32.xlu1 %v2237_v44  ;;  %v7611_v44 = vpop.xlane.xlu0 %2316 }
 0x48f   :  { %8782 = vst [vmem:[#allocation28_spill] sm:$0xff] %v7611_v44 }
 0x492   :  { %2282 = vmax.xlane.f32.xlu1 %v2281_v48  ;;  %v2401_v48 = vsel %vm2076_vm7, %v7321_v0, -inf  ;;  %vm2569_vm7 = vcmask 80896  }
 0x493   :  { %2250 = vrot.lane.b32.xlu0 %v7321_v0, %s6499_s7 }
 0x496   :  { %2322 = vmax.xlane.f32.xlu1 %v2321_v53  ;;  %v7619_v53 = vpop.xlane.xlu0 %2356 }
 0x497   :  { %2290 = vrot.lane.b32.xlu0 %v7321_v0, %s6501_s24  ;;  %8784 = vst [vmem:[#allocation30_spill] sm:$0xff] %v7619_v53 }
 0x49a   :  { %2362 = vmax.xlane.f32.xlu1 %v2361_v36  ;;  %v7623_v36 = vpop.permute.xlu1 %2486  ;;  %v7627_v15 = vpop.xlane.xlu0 %2396 }
 0x49b   :  { %2330 = vrot.lane.b32.xlu0 %v7321_v0, %s6503_s2  ;;  %8785 = vst [vmem:[#allocation31_spill] sm:$0xff] %v7623_v36  ;;  %8786 = vst [vmem:[#allocation32_spill] sm:$0xff] %v7627_v15  ;;  %v2432_v36 = vsel %vm2117_vm9, %v7297_v3, -inf }
 0x49e   :  { %2402 = vmax.xlane.f32.xlu1 %v2401_v48  ;;  %v1930_v14 = vpop.permute.xlu1 %1929  ;;  %v1971_v44 = vpop.permute.xlu0 %1970 }
 0x49f   :  { %2370 = vrot.lane.b32.xlu0 %v7321_v0, %s6498_s6 }
 0x4a2   :  { %v7631_v48 = vpop.permute.xlu1 %2011  ;;  %v7633_v59 = vpop.xlane.xlu0 %1916 }
 0x4a3   :  { %2410 = vrot.lane.b32.xlu0 %v7321_v0, %s6500_s23 }
 0x4a6   :  { %v7635_v53 = vpop.permute.xlu1 %2052  ;;  %v7637_v47 = vpop.xlane.xlu0 %1961 }
 0x4a7   :  { %2450 = vrot.lane.b32.xlu0 %v7321_v0, %s6502_s0 }
 0x4aa   :  { %v7639_v38 = vpop.permute.xlu1 %2093  ;;  %v7641_v55 = vpop.xlane.xlu0 %2002 }
 0x4ae   :  { %v7643_v49 = vpop.permute.xlu1 %2134  ;;  %v7645_v15 = vpop.xlane.xlu0 %2043 }
 0x4af   :  { %2488 = vrot.lane.b32.xlu1 %v7313_v18, %s6504_s3 }
 0x4b2   :  { %v7649_v39 = vpop.permute.xlu1 %2175  ;;  %v7653_v35 = vpop.xlane.xlu0 %2084 }
 0x4b3   :  { %8787 = vst [vmem:[#allocation33_spill] sm:$0xff] %v7653_v35 }
 0x4b6   :  { %v7655_v11 = vpop.xlane.xlu1 %2125  ;;  %v7659_v4 = vpop.xlane.xlu0 %2207 }
 0x4b7   :  { %8788 = vst [vmem:[#allocation34_spill] sm:$0xff] %v7655_v11  ;;  %8789 = vst [vmem:[#allocation35_spill] sm:$0xff] %v7659_v4  ;;  %v2512_v4 = vsel %vm2199_vm10, %v7297_v3, -inf }
 0x4ba   :  { %v7665_v51 = vpop.permute.xlu0 %2013 }
 0x4c6   :  { %2399 = vmax.xlane.f32.xlu0 %v2398_v42  ;;  %v7663_v42 = vpop.xlane.xlu1 %2166 }
 0x4c7   :  { %8790 = vst [vmem:[#allocation36_spill] sm:$0xff] %v7663_v42 }
 0x4ca   :  { %2433 = vmax.xlane.f32.xlu0 %v2432_v36  ;;  %v7669_v36 = vpop.permute.xlu1 %2248 }
 0x4ce   :  { %2436 = vmax.xlane.f32.xlu0 %v2435_v32  ;;  %v7673_v32 = vpop.permute.xlu0 %2054  ;;  %v7677_v40 = vpop.permute.xlu1 %2288 }
 0x4d3   :  { %2439 = vmax.xlane.f32.xlu1 %v2438_v43  ;;  %v7679_v43 = vpop.permute.xlu0 %2095 }
 0x4d7   :  { %2473 = vmax.xlane.f32.xlu1 %v2472_v30  ;;  %v7685_v30 = vpop.permute.xlu1 %2328  ;;  %v7689_v23 = vpop.permute.xlu0 %2136 }
 0x4db   :  { %2479 = vmax.xlane.f32.xlu1 %v2478_v28  ;;  %v1892_v28 = vsel %vm1891_vm3, %v7295_v1, 0.0  ;;  %v7693_v42 = vpop.permute.xlu1 %2368  ;;  %v7695_v21 = vpop.permute.xlu0 %2177 }
 0x4df   :  { %2513 = vmax.xlane.f32.xlu1 %v2512_v4  ;;  %v1898_v4 = vsel %vm1891_vm3, %v7311_v60, 0.0  ;;  %v7699_v11 = vpop.permute.xlu1 %2408  ;;  %v2019_v60 = vsel %vm1891_vm3, %v7453_v58, 0.0  ;;  %v1984_v58 = vsel %vm1891_vm3, %v1971_v44, 0.0  ;;  %v2066_v44 = vsel %vm1891_vm3, %v7635_v53, 0.0 }
 0x4e3   :  { %2519 = vmax.xlane.f32.xlu1 %v2518_v25  ;;  %v1937_v25 = vsel %vm1891_vm3, %v7439_v52, 0.0  ;;  %v7707_v1 = vpop.permute.xlu1 %2448  ;;  %v2060_v52 = vsel %vm1891_vm3, %v7435_v50, 0.0  ;;  %v2025_v50 = vsel %vm1891_vm3, %v7631_v48, 0.0 }
 0x4e4   :  { %2490 = vrot.lane.b32.xlu0 %v7321_v0, %s6504_s3 }
 0x4e7   :  { %1893 = vadd.xlane.f32.xlu1 %v1892_v28  ;;  %v1978_v28 = vsel %vm1891_vm3, %v7447_v56, 0.0  ;;  %v2441_v56 = vsel %vm2117_vm9, %v7321_v0, -inf  ;;  %vm8758_vm9 = vcmask 97280  }
 0x4eb   :  { %1899 = vadd.xlane.f32.xlu1 %v1898_v4 }
 0x4ef   :  { %1938 = vadd.xlane.f32.xlu1 %v1937_v25  ;;  %v7713_v25 = vpop.permute.xlu1 %1931 }
 0x4f2   :  { %v7701_v10 = vpop.xlane.xlu0 %2235 }
 0x4f3   :  { %8791 = vst [vmem:[#allocation37_spill] sm:$0xff] %v7701_v10  ;;  %1979 = vadd.xlane.f32.xlu1 %v1978_v28  ;;  %v1943_v10 = vsel %vm1891_vm3, %v1930_v14, 0.0  ;;  %v7721_v28 = vpop.permute.xlu1 %1972 }
 0x4f6   :  { %v7709_v4 = vpop.xlane.xlu0 %2279 }
 0x4f7   :  { %8792 = vst [vmem:[#allocation38_spill] sm:$0xff] %v7709_v4  ;;  %2020 = vadd.xlane.f32.xlu1 %v2019_v60  ;;  %v2475_v60 = vsel %vm2158_vm8, %v7305_v7, -inf }
 0x4fa   :  { %v7715_v35 = vpop.xlane.xlu0 %2319 }
 0x4fb   :  { %2061 = vadd.xlane.f32.xlu1 %v2060_v52  ;;  %8793 = vst [vmem:[#allocation39_spill] sm:$0xff] %v7715_v35 }
 0x4fe   :  { %v7723_v4 = vpop.xlane.xlu0 %2359 }
 0x4ff   :  { %1944 = vadd.xlane.f32.xlu1 %v1943_v10  ;;  %8794 = vst [vmem:[#allocation40_spill] sm:$0xff] %v7723_v4  ;;  %v2481_v10 = vsel %vm2158_vm8, %v7321_v0, -inf  ;;  %vm2574_vm8 = vcmask 89088  }
 0x502   :  { %v1965_v14 = vpop.xlane.xlu0 %1964 }
 0x503   :  { %2442 = vmax.xlane.f32.xlu0 %v2441_v56  ;;  %1985 = vadd.xlane.f32.xlu1 %v1984_v58  ;;  %v2515_v56 = vsel %vm2199_vm10, %v7305_v7, -inf  ;;  %v2101_v58 = vsel %vm1891_vm3, %v7443_v54, 0.0 }
 0x506   :  { %v2129_v48 = vpop.xlane.xlu0 %2128 }
 0x507   :  { %v1920_v52 = vpop.xlane.xlu1 %1919  ;;  %2476 = vmax.xlane.f32.xlu0 %v2475_v60  ;;  %2026 = vadd.xlane.f32.xlu1 %v2025_v50  ;;  %v2521_v50 = vsel %vm2199_vm10, %v7321_v0, -inf  ;;  %vm2584_vm10 = vcmask 105472  }
 0x508   :  { %v2602_v60 = vsel %vm2524_vm11, %v1920_v52, %v1965_v14 }
 0x50a   :  { %v2170_v52 = vpop.xlane.xlu0 %2169 }
 0x50b   :  { %v2006_v35 = vpop.xlane.xlu1 %2005  ;;  %2482 = vmax.xlane.f32.xlu0 %v2481_v10  ;;  %2067 = vadd.xlane.f32.xlu1 %v2066_v44  ;;  %v2107_v10 = vsel %vm1891_vm3, %v7639_v38, 0.0  ;;  %v2142_v38 = vsel %vm1891_vm3, %v7449_v57, 0.0  ;;  %v1940_v57 = vsel %vm1891_vm3, %v7493_v17, 0.0 }
 0x50c   :  { %v2606_v53 = vsel %vm2529_vm12, %v2602_v60, %v2006_v35 }
 0x50f   :  { %v2047_v4 = vpop.xlane.xlu1 %2046  ;;  %2516 = vmax.xlane.f32.xlu0 %v2515_v56  ;;  %2102 = vadd.xlane.f32.xlu1 %v2101_v58  ;;  %v1895_v58 = vsel %vm1891_vm3, %v7299_v6, 0.0 }
 0x510   :  { %v2610_v54 = vsel %vm2534_vm13, %v2606_v53, %v2047_v4  ;;  %v1901_v53 = vsel %vm1891_vm3, %v7315_v20, 0.0 }
 0x513   :  { %v2088_v44 = vpop.xlane.xlu1 %2087  ;;  %2522 = vmax.xlane.f32.xlu0 %v2521_v50  ;;  %2108 = vadd.xlane.f32.xlu1 %v2107_v10 }
 0x514   :  { %v2614_v56 = vsel %vm2539_vm14, %v2610_v54, %v2088_v44  ;;  %v2183_v54 = vsel %vm1891_vm3, %v7457_v61, 0.0  ;;  %v2022_v61 = vsel %vm1891_vm3, %v7537_v34, 0.0 }
 0x515   :  { %v2618_v14 = vsel %vm2544_vm15, %v2614_v56, %v2129_v48  ;;  %v2148_v48 = vsel %vm1891_vm3, %v7643_v49, 0.0  ;;  %v1981_v49 = vsel %vm1891_vm3, %v7531_v31, 0.0 }
 0x516   :  { %v2622_v35 = vsel %vm2549_vm0, %v2618_v14, %v2170_v52  ;;  %v2189_v52 = vsel %vm1891_vm3, %v7649_v39, 0.0  ;;  %v2063_v39 = vsel %vm1891_vm3, %v7543_v37, 0.0  ;;  %v1987_v37 = vsel %vm1891_vm3, %v7721_v28, 0.0 }
 0x517   :  { %v2211_v4 = vpop.xlane.xlu1 %2210  ;;  %1896 = vadd.xlane.f32.xlu0 %v1895_v58  ;;  %2143 = vadd.xlane.f32.xlu1 %v2142_v38  ;;  %v2218_v38 = vsel %vm1891_vm3, %v7313_v18, 0.0  ;;  %v2336_v28 = vsel %vm1891_vm3, %v7495_v19, 0.0  ;;  %v2151_v19 = vsel %vm1891_vm3, %v7689_v23, 0.0  ;;  %v2422_v23 = vsel %vm1891_vm3, %v7699_v11, 0.0 }
 0x518   :  { %v2626_v60 = vsel %vm2554_vm4, %v2622_v35, %v2211_v4  ;;  %v2212_v35 = vsel %vm1891_vm3, %v7297_v3, 0.0 }
 0x51b   :  { %1902 = vadd.xlane.f32.xlu0 %v1901_v53  ;;  %2149 = vadd.xlane.f32.xlu1 %v2148_v48  ;;  %v2239_v50 = vpop.xlane.xlu1 %2238  ;;  %v2256_v53 = vsel %vm1891_vm3, %v7473_v46, 0.0  ;;  %v2262_v48 = vsel %vm1891_vm3, %v7669_v36, 0.0  ;;  %v2069_v46 = vsel %vm1891_vm3, %v7673_v32, 0.0  ;;  %v2104_v36 = vsel %vm1891_vm3, %v7551_v41, 0.0  ;;  %v2251_v32 = vpop.permute.xlu0 %2250 }
 0x51c   :  { %v2630_v10 = vsel %vm2559_vm5, %v2626_v60, %v2239_v50  ;;  %v1946_v60 = vsel %vm1891_vm3, %v7713_v25, 0.0  ;;  %v2028_v50 = vsel %vm1891_vm3, %v7665_v51, 0.0  ;;  %v2302_v25 = vsel %vm1891_vm3, %v7677_v40, 0.0 }
 0x51d   :  { %v2342_v51 = vsel %vm1891_vm3, %v7685_v30, 0.0  ;;  %v2145_v40 = vsel %vm1891_vm3, %v7557_v45, 0.0  ;;  %v2376_v41 = vsel %vm1891_vm3, %v7507_v22, 0.0  ;;  %v2416_v45 = vsel %vm1891_vm3, %v7513_v24, 0.0 }
 0x51f   :  { %1941 = vadd.xlane.f32.xlu0 %v1940_v57  ;;  %2184 = vadd.xlane.f32.xlu1 %v2183_v54  ;;  %v2283_v44 = vpop.xlane.xlu1 %2282  ;;  %v2291_v30 = vpop.permute.xlu0 %2290  ;;  %v2186_v57 = vsel %vm1891_vm3, %v7567_v13, 0.0  ;;  %v2192_v54 = vsel %vm1891_vm3, %v7695_v21, 0.0  ;;  %v2456_v13 = vsel %vm1891_vm3, %v7521_v27, 0.0  ;;  %v2221_v21 = vsel %vm1891_vm3, %v7321_v0, 0.0 }
 0x520   :  { %v2634_v56 = vsel %vm2564_vm6, %v2630_v10, %v2283_v44  ;;  %v2296_v10 = vsel %vm1891_vm3, %v7487_v16, 0.0  ;;  %v2110_v16 = vsel %vm1891_vm3, %v7679_v43, 0.0  ;;  %v2382_v43 = vsel %vm1891_vm3, %v7693_v42, 0.0 }
 0x521   :  { %v2215_v42 = vsel %vm1891_vm3, %v7305_v7, 0.0  ;;  %v2462_v44 = vsel %vm1891_vm3, %v7707_v1, 0.0  ;;  %v2259_v27 = vsel %vm1891_vm3, %v7579_v2, 0.0 }
 0x523   :  { %1982 = vadd.xlane.f32.xlu0 %v1981_v49  ;;  %2190 = vadd.xlane.f32.xlu1 %v2189_v52  ;;  %v2323_v14 = vpop.xlane.xlu1 %2322  ;;  %v7815_v22 = vpop.permute.xlu0 %2330  ;;  %v2496_v49 = vsel %vm1891_vm3, %v7527_v29, 0.0  ;;  %v2599_v52 = vsel %vm2524_vm11, %v7459_v62, %v7465_v26  ;;  %v2299_v26 = vsel %vm1891_vm3, %v7581_v33, 0.0  ;;  %v8795_v33 = vld [vmem:[#allocation33_spill] sm:$0xff] }
 0x524   :  { %v2638_v17 = vsel %vm2569_vm7, %v2634_v56, %v2323_v14  ;;  %v2603_v1 = vsel %vm2529_vm12, %v2599_v52, %v7463_v63 }
 0x525   :  { %v2607_v29 = vsel %vm2534_vm13, %v2603_v1, %v7471_v8 }
 0x526   :  { %v2611_v62 = vsel %vm2539_vm14, %v2607_v29, %v7475_v9 }
 0x527   :  { %2023 = vadd.xlane.f32.xlu0 %v2022_v61  ;;  %2213 = vadd.xlane.f32.xlu1 %v2212_v35  ;;  %v2363_v58 = vpop.xlane.xlu1 %2362  ;;  %v7825_v24 = vpop.permute.xlu0 %2370  ;;  %v2615_v63 = vsel %vm2544_vm15, %v2611_v62, %v7481_v12  ;;  %v2305_v12 = vsel %vm1891_vm3, %v2291_v30, 0.0  ;;  %v8806_v30 = vld [vmem:[#allocation37_spill] sm:$0xff] }
 0x528   :  { %v2642_v31 = vsel %vm2574_vm8, %v2638_v17, %v2363_v58  ;;  %v2265_v17 = vsel %vm1891_vm3, %v2251_v32, 0.0  ;;  %v2601_v58 = vsel %vm2524_vm11, %v7633_v59, %v7637_v47  ;;  %v2619_v9 = vsel %vm2549_vm0, %v2615_v63, %v7469_v5  ;;  %v8797_v59 = vld [vmem:[#allocation34_spill] sm:$0xff]  ;;  %v8800_v5 = vld [vmem:[#allocation11_spill] sm:$0xff]  ;;  %v8810_v62 = vld [vmem:[#allocation25_spill] sm:$0xff] }
 0x529   :  { %v2605_v8 = vsel %vm2529_vm12, %v2601_v58, %v7641_v55  ;;  %v8798_v55 = vld [vmem:[#allocation10_spill] sm:$0xff]  ;;  %v2385_v63 = vsel %vm1891_vm3, %v7825_v24, 0.0 }
 0x52b   :  { %2064 = vadd.xlane.f32.xlu0 %v2063_v39  ;;  %2219 = vadd.xlane.f32.xlu1 %v2218_v38  ;;  %v2403_v4 = vpop.xlane.xlu1 %2402  ;;  %v7831_v56 = vpop.permute.xlu0 %2410  ;;  %v2609_v38 = vsel %vm2534_vm13, %v2605_v8, %v7645_v15 }
 0x52c   :  { %v7777_v34 = vsel %vm8758_vm9, %v2642_v31, %v2403_v4  ;;  %v2613_v4 = vsel %vm2539_vm14, %v2609_v38, %v8795_v33  ;;  %v8811_v38 = vld [vmem:[#allocation27_spill] sm:$0xff] }
 0x52f   :  { %1947 = vadd.xlane.f32.xlu0 %v1946_v60  ;;  %2257 = vadd.xlane.f32.xlu1 %v2256_v53  ;;  %v2489_v11 = vpop.permute.xlu1 %2488  ;;  %v7846_v2 = vpop.permute.xlu0 %2450  ;;  %v8796_v60 = vld [vmem:[#allocation9_spill] sm:$0xff]  ;;  %v2617_v53 = vsel %vm2544_vm15, %v2613_v4, %v8797_v59  ;;  %v2425_v4 = vsel %vm1891_vm3, %v7831_v56, 0.0 }
 0x530   :  { %v2502_v61 = vsel %vm1891_vm3, %v2489_v11, 0.0  ;;  %v2623_v47 = vsel %vm2554_vm4, %v2619_v9, %v8796_v60  ;;  %v8812_v59 = vld [vmem:[#allocation29_spill] sm:$0xff] }
 0x533   :  { %1988 = vadd.xlane.f32.xlu0 %v1987_v37  ;;  %2263 = vadd.xlane.f32.xlu1 %v2262_v48  ;;  %v2627_v37 = vsel %vm2559_vm5, %v2623_v47, %v8798_v55  ;;  %v8799_v48 = vld [vmem:[#allocation36_spill] sm:$0xff] }
 0x534   :  { %v2621_v15 = vsel %vm2549_vm0, %v2617_v53, %v8799_v48  ;;  %v2459_v53 = vsel %vm1891_vm3, %v8812_v59, 0.0  ;;  %v8813_v48 = vmov 0.0   ;;  %v8824_v59 = vld [vmem:[#allocation26_spill] sm:$0xff] }
 0x537   :  { %2029 = vadd.xlane.f32.xlu0 %v2028_v50  ;;  %2297 = vadd.xlane.f32.xlu1 %v2296_v10  ;;  %v2631_v10 = vsel %vm2564_vm6, %v2627_v37, %v8800_v5 }
 0x53b   :  { %2070 = vadd.xlane.f32.xlu0 %v2069_v46  ;;  %2303 = vadd.xlane.f32.xlu1 %v2302_v25  ;;  %v8801_v46 = vld [vmem:[#allocation12_spill] sm:$0xff] }
 0x53c   :  { %v2635_v25 = vsel %vm2569_vm7, %v2631_v10, %v8801_v46  ;;  %v2465_v10 = vsel %vm1891_vm3, %v7846_v2, 0.0 }
 0x53f   :  { %2105 = vadd.xlane.f32.xlu0 %v2104_v36  ;;  %2337 = vadd.xlane.f32.xlu1 %v2336_v28  ;;  %v8802_v28 = vld [vmem:[#allocation23_spill] sm:$0xff] }
 0x543   :  { %2111 = vadd.xlane.f32.xlu0 %v2110_v16  ;;  %2343 = vadd.xlane.f32.xlu1 %v2342_v51  ;;  %v2339_v16 = vsel %vm1891_vm3, %v8802_v28, 0.0  ;;  %v8803_v51 = vld [vmem:[#allocation13_spill] sm:$0xff]  ;;  %v8816_v28 = vld [vmem:[#allocation16_spill] sm:$0xff] }
 0x544   :  { %v2639_v32 = vsel %vm2574_vm8, %v2635_v25, %v8803_v51 }
 0x547   :  { %2146 = vadd.xlane.f32.xlu0 %v2145_v40  ;;  %2377 = vadd.xlane.f32.xlu1 %v2376_v41  ;;  %v8804_v40 = vld [vmem:[#allocation35_spill] sm:$0xff] }
 0x548   :  { %v2625_v41 = vsel %vm2554_vm4, %v2621_v15, %v8804_v40  ;;  %v8814_v15 = vld [vmem:[#allocation15_spill] sm:$0xff] }
 0x549   :  { %v8817_v40 = vld [vmem:[#allocation31_spill] sm:$0xff] }
 0x54b   :  { %2152 = vadd.xlane.f32.xlu0 %v2151_v19  ;;  %2383 = vadd.xlane.f32.xlu1 %v2382_v43  ;;  %v8805_v19 = vld [vmem:[#allocation14_spill] sm:$0xff] }
 0x54c   :  { %v2643_v43 = vsel %vm8758_vm9, %v2639_v32, %v8805_v19 }
 0x54f   :  { %2187 = vadd.xlane.f32.xlu0 %v2186_v57  ;;  %2417 = vadd.xlane.f32.xlu1 %v2416_v45  ;;  %v2629_v57 = vsel %vm2559_vm5, %v2625_v41, %v8806_v30  ;;  %v2499_v41 = vsel %vm1891_vm3, %v8817_v40, 0.0 }
 0x553   :  { %2193 = vadd.xlane.f32.xlu0 %v2192_v54  ;;  %2423 = vadd.xlane.f32.xlu1 %v2422_v23  ;;  %v2400_v31 = vpop.xlane.xlu0 %2399  ;;  %v8807_v54 = vld [vmem:[#allocation38_spill] sm:$0xff] }
 0x554   :  { %v2633_v23 = vsel %vm2564_vm6, %v2629_v57, %v8807_v54 }
 0x557   :  { %2216 = vadd.xlane.f32.xlu0 %v2215_v42  ;;  %2457 = vadd.xlane.f32.xlu1 %v2456_v13  ;;  %v2434_v36 = vpop.xlane.xlu0 %2433  ;;  %v8808_v13 = vld [vmem:[#allocation39_spill] sm:$0xff] }
 0x558   :  { %v2647_v42 = vsel %vm2584_vm10, %v2643_v43, %v2434_v36  ;;  %v8818_v43 = vld [vmem:[#allocation17_spill] sm:$0xff] }
 0x55b   :  { %2463 = vadd.xlane.f32.xlu1 %v2462_v44  ;;  %2222 = vadd.xlane.f32.xlu0 %v2221_v21  ;;  %v2637_v44 = vsel %vm2569_vm7, %v2633_v23, %v8808_v13  ;;  %v2345_v21 = vsel %vm1891_vm3, %v7815_v22, 0.0  ;;  %v2379_v22 = vsel %vm1891_vm3, %v8810_v62, 0.0  ;;  %v7915_v47 = vpop.xlane.xlu0 %2436  ;;  %v8819_v23 = vld [vmem:[#allocation18_spill] sm:$0xff] }
 0x55f   :  { %2497 = vadd.xlane.f32.xlu1 %v2496_v49  ;;  %2260 = vadd.xlane.f32.xlu0 %v2259_v27  ;;  %v8809_v49 = vld [vmem:[#allocation40_spill] sm:$0xff]  ;;  %v2491_v25 = vpop.permute.xlu0 %2490 }
 0x560   :  { %v2440_v14 = vpop.xlane.xlu1 %2439  ;;  %v2641_v27 = vsel %vm2574_vm8, %v2637_v44, %v8809_v49  ;;  %v2505_v54 = vsel %vm1891_vm3, %v2491_v25, 0.0  ;;  %v8820_v49 = vld [vmem:[#allocation19_spill] sm:$0xff] }
 0x561   :  { %v2645_v1 = vsel %vm8758_vm9, %v2641_v27, %v2400_v31  ;;  %vm66_vm9 = vcmask 256000  }
 0x562   :  { %67 = vst.msk [vmem:[#allocation3] sm:$0x7] %vm66_vm9, %v8813_v48  ;;  %68 = vst.msk [vmem:[#allocation3 + $0x18] sm:$0x7] %vm66_vm9, %v8813_v48 }
 0x563   :  { %2503 = vadd.xlane.f32.xlu1 %v2502_v61  ;;  %2266 = vadd.xlane.f32.xlu0 %v2265_v17  ;;  %v2649_v61 = vsel %vm2584_vm10, %v2645_v1, %v2440_v14  ;;  %v2419_v14 = vsel %vm1891_vm3, %v8811_v38, 0.0  ;;  %69 = vst.msk [vmem:[#allocation3 + $0x13] sm:$0x7] %vm66_vm9, %v8813_v48  ;;  %70 = vst.msk [vmem:[#allocation3 + $0x2b] sm:$0x7] %vm66_vm9, %v8813_v48  ;;  %v8823_v38 = vld [vmem:[#allocation24_spill] sm:$0xff] }
 0x564   :  { %v2474_v35 = vpop.xlane.xlu1 %2473  ;;  %vm8828_vm9 = vcmask 97280  }
 0x565   :  { %v2651_v11 = vsel %vm2589_vm2, %v2647_v42, %v2474_v35 }
 0x567   :  { %2300 = vadd.xlane.f32.xlu0 %v2299_v26 }
 0x568   :  { %v2480_v39 = vpop.xlane.xlu1 %2479 }
 0x569   :  { %v2653_v29 = vsel %vm2589_vm2, %v2649_v61, %v2480_v39  ;;  %v8821_v61 = vld [vmem:[#allocation20_spill] sm:$0xff] }
 0x56b   :  { %2306 = vadd.xlane.f32.xlu0 %v2305_v12 }
 0x56c   :  { %v2514_v50 = vpop.xlane.xlu1 %2513 }
 0x56d   :  { %v2655_v52 = vsel %vm2594_vm1, %v2651_v11, %v2514_v50  ;;  %v8815_v50 = vld [vmem:[#allocation21_spill] sm:$0xff] }
 0x56e   :  { %v2600_v5 = vsel %vm2524_vm11, %v8815_v50, %v8814_v15 }
 0x56f   :  { %2340 = vadd.xlane.f32.xlu0 %v2339_v16  ;;  %v2604_v16 = vsel %vm2529_vm12, %v2600_v5, %v8816_v28  ;;  %v6276_v28 = vld [vmem:[%s8741_s8 + $0x18] sm:$0xff]  }
 0x570   :  { %v2520_v45 = vpop.xlane.xlu1 %2519  ;;  %v2608_v30 = vsel %vm2534_vm13, %v2604_v16, %v8818_v43 }
 0x571   :  { %v2657_v35 = vsel %vm2594_vm1, %v2653_v29, %v2520_v45  ;;  %v2612_v42 = vsel %vm2539_vm14, %v2608_v30, %v8819_v23 }
 0x572   :  { %v2616_v27 = vsel %vm2544_vm15, %v2612_v42, %v8820_v49  ;;  %v7987_v42 = vld [vmem:[%s8741_s8] sm:$0xff]  }
 0x573   :  { %2346 = vadd.xlane.f32.xlu0 %v2345_v21  ;;  %v2620_v29 = vsel %vm2549_vm0, %v2616_v27, %v8821_v61 }
 0x574   :  { %2663 = vrot.lane.b32.xlu1 %v2655_v52, %s6504_s3  ;;  %v1894_v17 = vpop.xlane.xlu1 %1893 }
 0x575   :  { %v1905_v8 = vmul.f32 0.0625, %v1894_v17 }
 0x577   :  { %2380 = vadd.xlane.f32.xlu0 %v2379_v22 }
 0x578   :  { %2667 = vrot.lane.b32.xlu1 %v2657_v35, %s6504_s3  ;;  %v1900_v26 = vpop.xlane.xlu1 %1899  ;;  %v8822_v35 = vld [vmem:[#allocation22_spill] sm:$0xff] }
 0x579   :  { %v1907_v51 = vmul.f32 0.0625, %v1900_v26  ;;  %v2624_v26 = vsel %vm2554_vm4, %v2620_v29, %v8822_v35 }
 0x57b   :  { %2386 = vadd.xlane.f32.xlu0 %v2385_v63 }
 0x57c   :  { %v1939_v58 = vpop.xlane.xlu1 %1938 }
 0x57d   :  { %v1949_v31 = vmul.f32 0.0625, %v1939_v58 }
 0x57f   :  { %v2525_v39 = vsel %vm2524_vm11, %v1905_v8, %v1949_v31  ;;  %2420 = vadd.xlane.f32.xlu0 %v2419_v14  ;;  %v6275_v31 = vld [vmem:[%s8741_s8 + $0x10] sm:$0xff]   ;;  %v2628_v14 = vsel %vm2559_vm5, %v2624_v26, %v8823_v38 }
 0x580   :  { %v1980_v9 = vpop.xlane.xlu1 %1979  ;;  %5843 = vmatprep.subr.bf16.mxu0 %v6275_v31 }
 0x581   :  { %v1990_v33 = vmul.f32 0.0625, %v1980_v9  ;;  %5844 = vmatpush3.bf16.msra.mxu0 %v6275_v31 }
 0x582   :  { %5845 = vmatprep.subr.bf16.mxu0 %v6276_v28 }
 0x583   :  { %v2530_v12 = vsel %vm2529_vm12, %v2525_v39, %v1990_v33  ;;  %2426 = vadd.xlane.f32.xlu0 %v2425_v4 }
 0x584   :  { %v2021_v60 = vpop.xlane.xlu1 %2020 }
 0x585   :  { %v2031_v24 = vmul.f32 0.0625, %v2021_v60  ;;  %5846 = vmatpush3.bf16.msra.mxu0 %v6276_v28 }
 0x586   :  { %5851 = vmatprep.subr.bf16.mxu0 %v7987_v42 }
 0x587   :  { %v2535_v55 = vsel %vm2534_vm13, %v2530_v12, %v2031_v24  ;;  %2460 = vadd.xlane.f32.xlu0 %v2459_v53  ;;  %v2632_v53 = vsel %vm2564_vm6, %v2628_v14, %v8824_v59 }
 0x588   :  { %v2062_v37 = vpop.xlane.xlu1 %2061 }
 0x589   :  { %v2072_v56 = vmul.f32 0.0625, %v2062_v37 }
 0x58b   :  { %v2540_v46 = vsel %vm2539_vm14, %v2535_v55, %v2072_v56  ;;  %2466 = vadd.xlane.f32.xlu0 %v2465_v10  ;;  %v8825_v55 = vld [vmem:[#allocation28_spill] sm:$0xff]  ;;  %v8826_v56 = vld [vmem:[#allocation30_spill] sm:$0xff] }
 0x58c   :  { %v1945_v36 = vpop.xlane.xlu1 %1944  ;;  %v2636_v37 = vsel %vm2569_vm7, %v2632_v53, %v8825_v55  ;;  %v8827_v10 = vld [vmem:[#allocation32_spill] sm:$0xff] }
 0x58d   :  { %v1951_v32 = vmul.f32 0.0625, %v1945_v36  ;;  %v2640_v15 = vsel %vm2574_vm8, %v2636_v37, %v8826_v56 }
 0x58f   :  { %v2527_v19 = vsel %vm2524_vm11, %v1907_v51, %v1951_v32  ;;  %2500 = vadd.xlane.f32.xlu0 %v2499_v41 }
 0x590   :  { %v2443_v2 = vpop.xlane.xlu0 %2442  ;;  %v1986_v57 = vpop.xlane.xlu1 %1985 }
 0x591   :  { %v1992_v45 = vmul.f32 0.0625, %v1986_v57  ;;  %v2650_v39 = vsel %vm2584_vm10, %v7777_v34, %v2443_v2 }
 0x593   :  { %v2532_v13 = vsel %vm2529_vm12, %v2527_v19, %v1992_v45  ;;  %2506 = vadd.xlane.f32.xlu0 %v2505_v54 }
 0x594   :  { %v2477_v44 = vpop.xlane.xlu0 %2476  ;;  %v2027_v21 = vpop.xlane.xlu1 %2026 }
 0x595   :  { %v2033_v11 = vmul.f32 0.0625, %v2027_v21 }
 0x597   :  { %v2537_v52 = vsel %vm2534_vm13, %v2532_v13, %v2033_v11 }
 0x598   :  { %v2483_v1 = vpop.xlane.xlu0 %2482  ;;  %v2068_v17 = vpop.xlane.xlu1 %2067 }
 0x599   :  { %v2074_v62 = vmul.f32 0.0625, %v2068_v17  ;;  %v2654_v33 = vsel %vm2589_vm2, %v2650_v39, %v2483_v1 }
 0x59b   :  { %v2542_v22 = vsel %vm2539_vm14, %v2537_v52, %v2074_v62 }
 0x59c   :  { %v2517_v63 = vpop.xlane.xlu0 %2516  ;;  %v2103_v58 = vpop.xlane.xlu1 %2102 }
 0x59d   :  { %v2113_v8 = vmul.f32 0.0625, %v2103_v58 }
 0x59f   :  { %v2545_v9 = vsel %vm2544_vm15, %v2540_v46, %v2113_v8  ;;  %v2644_v46 = vsel %vm8828_vm9, %v2640_v15, %v8827_v10 }
 0x5a0   :  { %v2523_v4 = vpop.xlane.xlu0 %2522  ;;  %v2109_v12 = vpop.xlane.xlu1 %2108  ;;  %v2648_v36 = vsel %vm2584_vm10, %v2644_v46, %v7915_v47 }
 0x5a1   :  { %v2658_v60 = vsel %vm2594_vm1, %v2654_v33, %v2523_v4  ;;  %v2115_v24 = vmul.f32 0.0625, %v2109_v12  ;;  %v2652_v16 = vsel %vm2589_vm2, %v2648_v36, %v2477_v44 }
 0x5a2   :  { %2669 = vrot.lane.b32.xlu1 %v2658_v60, %s6504_s3  ;;  %v2656_v32 = vsel %vm2594_vm1, %v2652_v16, %v2517_v63 }
 0x5a3   :  { %v2547_v34 = vsel %vm2544_vm15, %v2542_v22, %v2115_v24 }
 0x5a4   :  { %v1897_v50 = vpop.xlane.xlu0 %1896  ;;  %v2144_v5 = vpop.xlane.xlu1 %2143 }
 0x5a5   :  { %v2154_v25 = vmul.f32 0.0625, %v2144_v5  ;;  %v1906_v2 = vmul.f32 0.0625, %v1897_v50 }
 0x5a7   :  { %v7976_v51 = vsel %vm2549_vm0, %v2545_v9, %v2154_v25 }
 0x5a8   :  { %v1903_v40 = vpop.xlane.xlu0 %1902  ;;  %v2150_v41 = vpop.xlane.xlu1 %2149 }
 0x5a9   :  { %v2156_v19 = vmul.f32 0.0625, %v2150_v41  ;;  %2665 = vrot.lane.b32.xlu0 %v2656_v32, %s6504_s3  ;;  %v1908_v22 = vmul.f32 0.0625, %v1903_v40 }
 0x5ab   :  { %v7981_v47 = vsel %vm2549_vm0, %v2547_v34, %v2156_v19 }
 0x5ac   :  { %v1942_v43 = vpop.xlane.xlu0 %1941  ;;  %v2185_v30 = vpop.xlane.xlu1 %2184 }
 0x5ad   :  { %v1950_v57 = vmul.f32 0.0625, %v1942_v43  ;;  %v2195_v43 = vmul.f32 0.0625, %v2185_v30 }
 0x5af   :  { %v2526_v45 = vsel %vm2524_vm11, %v1906_v2, %v1950_v57 }
 0x5b0   :  { %v1983_v54 = vpop.xlane.xlu0 %1982  ;;  %v2191_v23 = vpop.xlane.xlu1 %2190 }
 0x5b1   :  { %v1991_v13 = vmul.f32 0.0625, %v1983_v54 }
 0x5b3   :  { %v2531_v44 = vsel %vm2529_vm12, %v2526_v45, %v1991_v13 }
 0x5b4   :  { %v2024_v21 = vpop.xlane.xlu0 %2023  ;;  %v2214_v11 = vpop.xlane.xlu1 %2213 }
 0x5b5   :  { %v2032_v49 = vmul.f32 0.0625, %v2024_v21  ;;  %v2224_v45 = vmul.f32 0.0625, %v2214_v11  ;;  %v2197_v21 = vmul.f32 0.0625, %v2191_v23 }
 0x5b7   :  { %v2536_v27 = vsel %vm2534_vm13, %v2531_v44, %v2032_v49  ;;  %v2555_v44 = vsel %vm2554_vm4, %v7976_v51, %v2195_v43 }
 0x5b8   :  { %v2065_v52 = vpop.xlane.xlu0 %2064  ;;  %v2220_v1 = vpop.xlane.xlu1 %2219 }
 0x5b9   :  { %v2073_v17 = vmul.f32 0.0625, %v2065_v52 }
 0x5bb   :  { %v2541_v61 = vsel %vm2539_vm14, %v2536_v27, %v2073_v17  ;;  %v2560_v17 = vsel %vm2559_vm5, %v2555_v44, %v2224_v45 }
 0x5bc   :  { %v1948_v29 = vpop.xlane.xlu0 %1947  ;;  %v2258_v62 = vpop.xlane.xlu1 %2257 }
 0x5bd   :  { %v1952_v35 = vmul.f32 0.0625, %v1948_v29  ;;  %v2268_v54 = vmul.f32 0.0625, %v2258_v62 }
 0x5bf   :  { %v2528_v26 = vsel %vm2524_vm11, %v1908_v22, %v1952_v35  ;;  %v2565_v22 = vsel %vm2564_vm6, %v2560_v17, %v2268_v54  ;;  %vm8829_vm11 = vmmov %vm8828_vm9 }
 0x5c0   :  { %v1989_v63 = vpop.xlane.xlu0 %1988  ;;  %v2264_v58 = vpop.xlane.xlu1 %2263 }
 0x5c1   :  { %v1993_v8 = vmul.f32 0.0625, %v1989_v63  ;;  %v2270_v35 = vmul.f32 0.0625, %v2264_v58  ;;  %v2557_v63 = vsel %vm2554_vm4, %v7981_v47, %v2197_v21 }
 0x5c3   :  { %v2533_v31 = vsel %vm2529_vm12, %v2528_v26, %v1993_v8  ;;  %vm2679_vm12 = vcmask 261120  }
 0x5c4   :  { %v2030_v38 = vpop.xlane.xlu0 %2029  ;;  %v2298_v14 = vpop.xlane.xlu1 %2297 }
 0x5c5   :  { %v2034_v39 = vmul.f32 0.0625, %v2030_v38  ;;  %v2308_v13 = vmul.f32 0.0625, %v2298_v14 }
 0x5c7   :  { %v2538_v9 = vsel %vm2534_vm13, %v2533_v31, %v2034_v39  ;;  %v2570_v26 = vsel %vm2569_vm7, %v2565_v22, %v2308_v13  ;;  %vm8830_vm13 = vmmov %vm8828_vm9 }
 0x5c8   :  { %v2071_v33 = vpop.xlane.xlu0 %2070  ;;  %v2304_v4 = vpop.xlane.xlu1 %2303 }
 0x5c9   :  { %v2075_v12 = vmul.f32 0.0625, %v2071_v33  ;;  %v2310_v11 = vmul.f32 0.0625, %v2304_v4 }
 0x5cb   :  { %v2543_v60 = vsel %vm2539_vm14, %v2538_v9, %v2075_v12  ;;  %vm8831_vm14 = vmmov %vm8828_vm9 }
 0x5cc   :  { %v2106_v24 = vpop.xlane.xlu0 %2105  ;;  %v2338_v59 = vpop.xlane.xlu1 %2337 }
 0x5cd   :  { %v2114_v53 = vmul.f32 0.0625, %v2106_v24  ;;  %v2348_v49 = vmul.f32 0.0625, %v2338_v59 }
 0x5cf   :  { %v2546_v55 = vsel %vm2544_vm15, %v2541_v61, %v2114_v53  ;;  %v2226_v61 = vmul.f32 0.0625, %v2220_v1  ;;  %v2575_v51 = vsel %vm2574_vm8, %v2570_v26, %v2348_v49 }
 0x5d0   :  { %v2112_v37 = vpop.xlane.xlu0 %2111  ;;  %v2344_v34 = vpop.xlane.xlu1 %2343 }
 0x5d1   :  { %v2116_v56 = vmul.f32 0.0625, %v2112_v37  ;;  %v2350_v23 = vmul.f32 0.0625, %v2344_v34  ;;  %v2562_v1 = vsel %vm2559_vm5, %v2557_v63, %v2226_v61 }
 0x5d2   :  { %v2567_v58 = vsel %vm2564_vm6, %v2562_v1, %v2270_v35 }
 0x5d3   :  { %v7999_v15 = vsel %vm2544_vm15, %v2543_v60, %v2116_v56  ;;  %v2572_v4 = vsel %vm2569_vm7, %v2567_v58, %v2310_v11  ;;  %vm8832_vm15 = vmmov %vm8828_vm9 }
 0x5d4   :  { %v2147_v50 = vpop.xlane.xlu0 %2146  ;;  %v2378_v5 = vpop.xlane.xlu1 %2377  ;;  %v2577_v60 = vsel %vm2574_vm8, %v2572_v4, %v2350_v23 }
 0x5d5   :  { %v2155_v10 = vmul.f32 0.0625, %v2147_v50  ;;  %v2388_v29 = vmul.f32 0.0625, %v2378_v5 }
 0x5d7   :  { %v8002_v46 = vsel %vm2549_vm0, %v2546_v55, %v2155_v10  ;;  %v2580_v14 = vsel %vm8829_vm11, %v2575_v51, %v2388_v29 }
 0x5d8   :  { %v8004_v25 = vpop.xlane.xlu0 %2152  ;;  %v2384_v36 = vpop.xlane.xlu1 %2383 }
 0x5d9   :  { %v2390_v39 = vmul.f32 0.0625, %v2384_v36  ;;  %v2157_v44 = vmul.f32 0.0625, %v8004_v25 }
 0x5db   :  { %v2582_v37 = vsel %vm8830_vm13, %v2577_v60, %v2390_v39  ;;  %v2553_v22 = vsel %vm2549_vm0, %v7999_v15, %v2157_v44 }
 0x5dc   :  { %v8006_v28 = vpop.xlane.xlu0 %2187  ;;  %v2418_v16 = vpop.xlane.xlu1 %2417 }
 0x5dd   :  { %v2428_v30 = vmul.f32 0.0625, %v2418_v16  ;;  %v2196_v49 = vmul.f32 0.0625, %v8006_v28 }
 0x5df   :  { %v2585_v9 = vsel %vm2584_vm10, %v2580_v14, %v2428_v30  ;;  %v2556_v25 = vsel %vm2554_vm4, %v8002_v46, %v2196_v49 }
 0x5e0   :  { %v2194_v32 = vpop.xlane.xlu0 %2193  ;;  %v2424_v40 = vpop.xlane.xlu1 %2423 }
 0x5e1   :  { %v2430_v33 = vmul.f32 0.0625, %v2424_v40  ;;  %v2198_v21 = vmul.f32 0.0625, %v2194_v32 }
 0x5e3   :  { %v2587_v56 = vsel %vm2584_vm10, %v2582_v37, %v2430_v33  ;;  %v2558_v26 = vsel %vm2554_vm4, %v2553_v22, %v2198_v21  ;;  %v6278_v21 = vld [vmem:[%s8741_s8 + $0x8] sm:$0xff]  }
 0x5e4   :  { %v8008_v41 = vpop.xlane.xlu0 %2216  ;;  %v2458_v19 = vpop.xlane.xlu1 %2457  ;;  %v6280_v22 = vld [vmem:[%s8741_s8 + $0x28] sm:$0xff]  }
 0x5e5   :  { %v2468_v62 = vmul.f32 0.0625, %v2458_v19  ;;  %v2225_v61 = vmul.f32 0.0625, %v8008_v41 }
 0x5e7   :  { %v2590_v47 = vsel %vm2589_vm2, %v2585_v9, %v2468_v62  ;;  %v2561_v41 = vsel %vm2559_vm5, %v2556_v25, %v2225_v61  ;;  %v6283_v25 = vld [vmem:[%s8741_s8 + $0x40] sm:$0xff]  }
 0x5e8   :  { %v2464_v2 = vpop.xlane.xlu1 %2463  ;;  %v2223_v57 = vpop.xlane.xlu0 %2222 }
 0x5e9   :  { %v2470_v12 = vmul.f32 0.0625, %v2464_v2 }
 0x5eb   :  { %v2592_v50 = vsel %vm2589_vm2, %v2587_v56, %v2470_v12 }
 0x5ec   :  { %v2498_v27 = vpop.xlane.xlu1 %2497  ;;  %v2261_v52 = vpop.xlane.xlu0 %2260 }
 0x5ed   :  { %v2508_v8 = vmul.f32 0.0625, %v2498_v27  ;;  %v2227_v27 = vmul.f32 0.0625, %v2223_v57  ;;  %v2269_v35 = vmul.f32 0.0625, %v2261_v52 }
 0x5ef   :  { %v2595_v59 = vsel %vm2594_vm1, %v2590_v47, %v2508_v8  ;;  %v2563_v32 = vsel %vm2559_vm5, %v2558_v26, %v2227_v27  ;;  %v2566_v52 = vsel %vm2564_vm6, %v2561_v41, %v2269_v35  ;;  %v6285_v41 = vld [vmem:[%s8741_s8 + $0x50] sm:$0xff]   ;;  %vm8839_vm5 = vcmask 1045504  }
 0x5f0   :  { %v2504_v31 = vpop.xlane.xlu1 %2503  ;;  %v2267_v38 = vpop.xlane.xlu0 %2266  ;;  %vm8844_vm9 = vmmov %vm8839_vm5 }
 0x5f1   :  { %v2510_v24 = vmul.f32 0.0625, %v2504_v31  ;;  %v2271_v29 = vmul.f32 0.0625, %v2267_v38  ;;  %vm8845_vm11 = vmmov %vm8839_vm5 }
 0x5f3   :  { %v2597_v5 = vsel %vm2594_vm1, %v2592_v50, %v2510_v24  ;;  %v2568_v51 = vsel %vm2564_vm6, %v2563_v32, %v2271_v29  ;;  %vm8840_vm6 = vmmov %vm8839_vm5 }
 0x5f4   :  { %v2664_v53 = vpop.permute.xlu1 %2663  ;;  %v2301_v55 = vpop.xlane.xlu0 %2300 }
 0x5f5   :  { %v8028_v34 = vsel %vm1891_vm3, %v2595_v59, %v2664_v53  ;;  %v2309_v11 = vmul.f32 0.0625, %v2301_v55 }
 0x5f6   :  { %2680 = vst.msk [vmem:[#allocation3 + $0x3] sm:$0xff] %vm2679_vm12, %v8028_v34 }
 0x5f7   :  { %v2571_v1 = vsel %vm2569_vm7, %v2566_v52, %v2309_v11 }
 0x5f8   :  { %v2668_v10 = vpop.permute.xlu1 %2667  ;;  %v2307_v36 = vpop.xlane.xlu0 %2306 }
 0x5f9   :  { %v8036_v16 = vsel %vm1891_vm3, %v2597_v5, %v2668_v10  ;;  %v2311_v30 = vmul.f32 0.0625, %v2307_v36 }
 0x5fa   :  { %2682 = vst.msk [vmem:[#allocation3 + $0x1b] sm:$0xff] %vm2679_vm12, %v8036_v16 }
 0x5fb   :  { %v2573_v8 = vsel %vm2569_vm7, %v2568_v51, %v2311_v30  ;;  %vm8841_vm7 = vmmov %vm8839_vm5 }
 0x5fc   :  { %v2341_v40 = vpop.xlane.xlu0 %2340 }
 0x5fd   :  { %v2349_v28 = vmul.f32 0.0625, %v2341_v40  ;;  %v2684_v44 = vld [vmem:[#allocation3] sm:$0xff] }
 0x5fe   :  { %v2839_v29 = vld [vmem:[#allocation3 + $0x2] sm:$0xff] }
 0x5ff   :  { %v2576_v39 = vsel %vm2574_vm8, %v2571_v1, %v2349_v28  ;;  %v6287_v1 = vld [vmem:[%s8741_s8 + $0x60] sm:$0xff]  }
 0x600   :  { %v2347_v19 = vpop.xlane.xlu0 %2346 }
 0x601   :  { %v2351_v62 = vmul.f32 0.0625, %v2347_v19  ;;  %v2694_v19 = vld [vmem:[#allocation3 + $0x1] sm:$0xff] }
 0x602   :  { %v2841_v26 = vld [vmem:[#allocation3 + $0x1a] sm:$0xff] }
 0x603   :  { %v2578_v46 = vsel %vm2574_vm8, %v2573_v8, %v2351_v62  ;;  %v6282_v62 = vld [vmem:[%s8741_s8 + $0x38] sm:$0xff]   ;;  %vm8842_vm8 = vmmov %vm8839_vm5 }
 0x604   :  { %v2381_v43 = vpop.xlane.xlu0 %2380 }
 0x605   :  { %v2389_v23 = vmul.f32 0.0625, %v2381_v43 }
 0x607   :  { %v2581_v4 = vsel %vm8832_vm15, %v2576_v39, %v2389_v23 }
 0x608   :  { %v2387_v2 = vpop.xlane.xlu0 %2386 }
 0x609   :  { %v2391_v57 = vmul.f32 0.0625, %v2387_v2 }
 0x60b   :  { %v2583_v58 = vsel %vm8831_vm14, %v2578_v46, %v2391_v57  ;;  %v6284_v57 = vld [vmem:[%s8741_s8 + $0x48] sm:$0xff]  }
 0x60c   :  { %v2421_v45 = vpop.xlane.xlu0 %2420 }
 0x60d   :  { %v2429_v31 = vmul.f32 0.0625, %v2421_v45 }
 0x60f   :  { %v2586_v60 = vsel %vm2584_vm10, %v2581_v4, %v2429_v31  ;;  %v6286_v31 = vld [vmem:[%s8741_s8 + $0x58] sm:$0xff]  }
 0x610   :  { %v2427_v54 = vpop.xlane.xlu0 %2426 }
 0x611   :  { %v2431_v15 = vmul.f32 0.0625, %v2427_v54  ;;  %v2696_v54 = vld [vmem:[#allocation3 + $0x19] sm:$0xff] }
 0x613   :  { %v2588_v47 = vsel %vm2584_vm10, %v2583_v58, %v2431_v15  ;;  %vm8843_vm10 = vmmov %vm8839_vm5 }
 0x614   :  { %v2461_v13 = vpop.xlane.xlu0 %2460  ;;  %v2670_v59 = vpop.permute.xlu1 %2669 }
 0x615   :  { %v2469_v14 = vmul.f32 0.0625, %v2461_v13 }
 0x617   :  { %v2591_v53 = vsel %vm2589_vm2, %v2586_v60, %v2469_v14 }
 0x618   :  { %v2467_v17 = vpop.xlane.xlu0 %2466 }
 0x619   :  { %v2471_v38 = vmul.f32 0.0625, %v2467_v17  ;;  %v2686_v17 = vld [vmem:[#allocation3 + $0x18] sm:$0xff] }
 0x61b   :  { %v2593_v24 = vsel %vm2589_vm2, %v2588_v47, %v2471_v38 }
 0x61c   :  { %v2501_v63 = vpop.xlane.xlu0 %2500 }
 0x61d   :  { %v2509_v9 = vmul.f32 0.0625, %v2501_v63 }
 0x61f   :  { %v2596_v56 = vsel %vm2594_vm1, %v2591_v53, %v2509_v9  ;;  %v3269_v53 = vld [vmem:[%s8742_s12] sm:$0xff] }
 0x620   :  { %v2507_v33 = vpop.xlane.xlu0 %2506 }
 0x621   :  { %v2511_v12 = vmul.f32 0.0625, %v2507_v33  ;;  %v6288_v33 = vld [vmem:[%s8741_s8 + $0x68] sm:$0xff]  }
 0x623   :  { %v2598_v55 = vsel %vm2594_vm1, %v2593_v24, %v2511_v12  ;;  %v3270_v24 = vld [vmem:[%s8742_s12 + $0x8] sm:$0xff]  ;;  %vm8834_vm1 = vcmask 1040384  }
 0x624   :  { %v2678_v37 = vsel %vm1891_vm3, %v2598_v55, %v2670_v59  ;;  %v2666_v50 = vpop.permute.xlu0 %2665  ;;  %v3272_v59 = vld [vmem:[%s8742_s12 + $0x18] sm:$0xff]  ;;  %vm8836_vm2 = vmmov %vm8834_vm1 }
 0x625   :  { %2683 = vst.msk [vmem:[#allocation3 + $0x23] sm:$0xff] %vm2679_vm12, %v2678_v37  ;;  %v2922_v5 = vpack.c.bf16 %v2678_v37, %v8036_v16  ;;  %v2676_v10 = vsel %vm1891_vm3, %v2596_v56, %v2666_v50  ;;  %v5899_v55 = vpack.c.bf16 %v3272_v59, %v3270_v24  ;;  %v3271_v37 = vld [vmem:[%s8742_s12 + $0x10] sm:$0xff]  ;;  %v6289_v50 = vld [vmem:[%s8743_s9 + $0x100] ss:$8 sps:$4 sm:$0xff]   ;;  %v6339_v59 = vld [vmem:[%s8743_s9 + $0x4] ss:$8 sps:$4 sm:$0xff]  }
 0x626   :  { %2681 = vst.msk [vmem:[#allocation3 + $0xb] sm:$0xff] %vm2679_vm12, %v2676_v10  ;;  %v2921_v36 = vpack.c.bf16 %v2676_v10, %v8028_v34  ;;  %v6279_v34 = vld [vmem:[%s8741_s8 + $0x20] sm:$0xff]   ;;  %v5901_v56 = vpack.c.bf16 %v3271_v37, %v3269_v53  ;;  %v6294_v10 = vld [vmem:[%s8743_s9 + $0x114] ss:$8 sps:$4 sm:$0xff]   ;;  %vm8837_vm0 = vmmov %vm8834_vm1 }
 0x627   :  { %v6336_v24 = vld [vmem:[%s8743_s9 + $0x1f4] ss:$8 sps:$4 sm:$0xff]   ;;  %vm8838_vm4 = vmmov %vm8837_vm0 }
 0x628   :  { %vm8849_vm13 = vmmov %vm8837_vm0 }
 0x629   :  { %vm8850_vm14 = vmmov %vm8837_vm0 }
 0x62a   :  { %vm8851_vm15 = vmmov %vm8837_vm0 }
 0x62c   :  { %v2697_v40 = vld [vmem:[#allocation3 + $0x21] sm:$0xff] }
 0x62d   :  { %v2695_v43 = vld [vmem:[#allocation3 + $0x9] sm:$0xff]  ;;  %v2699_v13 = vpack.c.bf16 %v2697_v40, %v2696_v54  ;;  %v2687_v49 = vld [vmem:[#allocation3 + $0x20] sm:$0xff] }
 0x62e   :  { %v2685_v2 = vld [vmem:[#allocation3 + $0x8] sm:$0xff]  ;;  %v2698_v45 = vpack.c.bf16 %v2695_v43, %v2694_v19  ;;  %v2689_v61 = vpack.c.bf16 %v2687_v49, %v2686_v17  ;;  %v3001_v51 = vld [vmem:[#allocation3 + $0x1c] sm:$0xff]  ;;  %v6310_v49 = vld [vmem:[%s8743_s9 + $0x170] ss:$8 sps:$4 sm:$0xff]  }
 0x62f   :  { %v2688_v16 = vpack.c.bf16 %v2685_v2, %v2684_v44  ;;  %v2840_v27 = vld [vmem:[#allocation3 + $0xa] sm:$0xff]  ;;  %v2842_v30 = vld [vmem:[#allocation3 + $0x22] sm:$0xff]  ;;  %v6300_v43 = vld [vmem:[%s8743_s9 + $0x134] ss:$8 sps:$4 sm:$0xff]  }
 0x630   :  { %5847 = vmatprep.mubr.msk.bf16.mxu0 %vm2679_vm12, %v2698_v45  ;;  %v2843_v35 = vpack.c.bf16 %v2840_v27, %v2839_v29  ;;  %v2844_v11 = vpack.c.bf16 %v2842_v30, %v2841_v26  ;;  %v2999_v32 = vld [vmem:[#allocation3 + $0x4] sm:$0xff]  ;;  %v3000_v28 = vld [vmem:[#allocation3 + $0xc] sm:$0xff] }
 0x631   :  { %5848 = vmatmul.mubr.msk.bf16.vlgmr.msra.gmra.mrb[8].mxu0 %vm2679_vm12, %v2699_v13  ;;  %v3003_v63 = vpack.c.bf16 %v3000_v28, %v2999_v32  ;;  %v3002_v23 = vld [vmem:[#allocation3 + $0x24] sm:$0xff]  ;;  %v3082_v52 = vld [vmem:[#allocation3 + $0xd] sm:$0xff] }
 0x632   :  { %5852 = vmatpush3.bf16.msra.mxu0 %v7987_v42  ;;  %5855 = vmatprep.mubr.msk.bf16.mxu0 %vm2679_vm12, %v2688_v16  ;;  %v6281_v42 = vld [vmem:[%s8741_s8 + $0x30] sm:$0xff]   ;;  %v3081_v15 = vld [vmem:[#allocation3 + $0x5] sm:$0xff]  ;;  %v3004_v8 = vpack.c.bf16 %v3002_v23, %v3001_v51  ;;  %v3083_v46 = vld [vmem:[#allocation3 + $0x1d] sm:$0xff] }
 0x633   :  { %5853 = vmatprep.subr.bf16.mxu0 %v6278_v21  ;;  %v3085_v38 = vpack.c.bf16 %v3082_v52, %v3081_v15  ;;  %v3084_v14 = vld [vmem:[#allocation3 + $0x25] sm:$0xff]  ;;  %v3164_v58 = vld [vmem:[#allocation3 + $0xe] sm:$0xff] }
 0x634   :  { %v3163_v39 = vld [vmem:[#allocation3 + $0x6] sm:$0xff]  ;;  %v3086_v9 = vpack.c.bf16 %v3084_v14, %v3083_v46  ;;  %v3165_v47 = vld [vmem:[#allocation3 + $0x1e] sm:$0xff]  ;;  %v6298_v2 = vld [vmem:[%s8743_s9 + $0x130] ss:$8 sps:$4 sm:$0xff]  }
 0x635   :  { %v3167_v4 = vpack.c.bf16 %v3164_v58, %v3163_v39  ;;  %v3166_v12 = vld [vmem:[#allocation3 + $0x26] sm:$0xff]  ;;  %v6306_v13 = vld [vmem:[%s8743_s9 + $0x154] ss:$8 sps:$4 sm:$0xff]   ;;  %v6304_v44 = vld [vmem:[%s8743_s9 + $0x150] ss:$8 sps:$4 sm:$0xff]  }
 0x636   :  { %5854 = vmatpush3.bf16.msra.mxu0 %v6278_v21  ;;  %v3168_v60 = vpack.c.bf16 %v3166_v12, %v3165_v47  ;;  %v6297_v40 = vld [vmem:[%s8743_s9 + $0x124] ss:$8 sps:$4 sm:$0xff]   ;;  %v6295_v19 = vld [vmem:[%s8743_s9 + $0x120] ss:$8 sps:$4 sm:$0xff]   ;;  %v6316_v29 = vld [vmem:[%s8743_s9 + $0x190] ss:$8 sps:$4 sm:$0xff]  }
 0x637   :  { %5859 = vmatprep.subr.bf16.mxu0 %v6279_v34  ;;  %v6303_v45 = vld [vmem:[%s8743_s9 + $0x144] ss:$8 sps:$4 sm:$0xff]   ;;  %v6301_v54 = vld [vmem:[%s8743_s9 + $0x140] ss:$8 sps:$4 sm:$0xff]   ;;  %v6322_v30 = vld [vmem:[%s8743_s9 + $0x1b0] ss:$8 sps:$4 sm:$0xff]  }
 0x638   :  { %v6309_v21 = vld [vmem:[%s8743_s9 + $0x164] ss:$8 sps:$4 sm:$0xff]   ;;  %v6307_v16 = vld [vmem:[%s8743_s9 + $0x160] ss:$8 sps:$4 sm:$0xff]  }
 0x639   :  { %v6315_v27 = vld [vmem:[%s8743_s9 + $0x184] ss:$8 sps:$4 sm:$0xff]   ;;  %v6313_v17 = vld [vmem:[%s8743_s9 + $0x180] ss:$8 sps:$4 sm:$0xff]  }
 0x63a   :  { %v6327_v26 = vld [vmem:[%s8743_s9 + $0x1c4] ss:$8 sps:$4 sm:$0xff]   ;;  %v6331_v47 = vld [vmem:[%s8743_s9 + $0x1e0] ss:$8 sps:$4 sm:$0xff]  }
 0x63b   :  { %v6333_v12 = vld [vmem:[%s8743_s9 + $0x1e4] ss:$8 sps:$4 sm:$0xff]  }
 0x63d   :  { %5856 = vmatmul.mubr.msk.bf16.vlgmr.msra.gmra.mrb[8].mxu0 %vm2679_vm12, %v2689_v61  ;;  %v6318_v61 = vld [vmem:[%s8743_s9 + $0x194] ss:$8 sps:$4 sm:$0xff]  }
 0x63e   :  { %5860 = vmatpush3.bf16.msra.mxu0 %v6279_v34  ;;  %5863 = vmatprep.mubr.msk.bf16.mxu0 %vm2679_vm12, %v2843_v35  ;;  %v6312_v34 = vld [vmem:[%s8743_s9 + $0x174] ss:$8 sps:$4 sm:$0xff]   ;;  %v6319_v35 = vld [vmem:[%s8743_s9 + $0x1a0] ss:$8 sps:$4 sm:$0xff]  }
 0x63f   :  { %5861 = vmatprep.subr.bf16.mxu0 %v6280_v22 }
 0x642   :  { %5862 = vmatpush3.bf16.msra.mxu0 %v6280_v22  ;;  %v6321_v22 = vld [vmem:[%s8743_s9 + $0x1a4] ss:$8 sps:$4 sm:$0xff]  }
 0x643   :  { %5867 = vmatprep.subr.bf16.mxu0 %v6281_v42 }
 0x649   :  { %5864 = vmatmul.mubr.msk.bf16.vlgmr.msra.gmra.mrb[8].mxu0 %vm2679_vm12, %v2844_v11  ;;  %v6325_v11 = vld [vmem:[%s8743_s9 + $0x1c0] ss:$8 sps:$4 sm:$0xff]  }
 0x64a   :  { %5868 = vmatpush3.bf16.msra.mxu0 %v6281_v42  ;;  %5871 = vmatprep.mubr.msk.bf16.mxu0 %vm2679_vm12, %v2921_v36  ;;  %v6292_v36 = vld [vmem:[%s8743_s9 + $0x110] ss:$8 sps:$4 sm:$0xff]   ;;  %v6324_v42 = vld [vmem:[%s8743_s9 + $0x1b4] ss:$8 sps:$4 sm:$0xff]  }
 0x64b   :  { %5869 = vmatprep.subr.bf16.mxu0 %v6282_v62 }
 0x64e   :  { %5870 = vmatpush3.bf16.msra.mxu0 %v6282_v62  ;;  %v6330_v62 = vld [vmem:[%s8743_s9 + $0x1d4] ss:$8 sps:$4 sm:$0xff]  }
 0x64f   :  { %5875 = vmatprep.subr.bf16.mxu0 %v6283_v25 }
 0x655   :  { %5872 = vmatmul.mubr.msk.bf16.vlgmr.msra.gmra.mrb[8].mxu0 %vm2679_vm12, %v2922_v5  ;;  %v6291_v5 = vld [vmem:[%s8743_s9 + $0x104] ss:$8 sps:$4 sm:$0xff]  }
 0x656   :  { %5876 = vmatpush3.bf16.msra.mxu0 %v6283_v25  ;;  %5879 = vmatprep.mubr.msk.bf16.mxu0 %vm2679_vm12, %v3003_v63  ;;  %v6328_v25 = vld [vmem:[%s8743_s9 + $0x1d0] ss:$8 sps:$4 sm:$0xff]  }
 0x657   :  { %5877 = vmatprep.subr.bf16.mxu0 %v6284_v57  ;;  %3675 = vmatprep.subr.bf16.mxu1 %v6291_v5 }
 0x658   :  { %3676 = vmatpush1.bf16.msra.mxu1 %v6289_v50 }
 0x659   :  { %3677 = vmatprep.subr.bf16.mxu1 %v6294_v10 }
 0x65a   :  { %5878 = vmatpush3.bf16.msra.mxu0 %v6284_v57 }
 0x65b   :  { %5883 = vmatprep.subr.bf16.mxu0 %v6285_v41 }
 0x65c   :  { %3678 = vmatpush1.bf16.msra.mxu1 %v6292_v36 }
 0x65d   :  { %3679 = vmatprep.subr.bf16.mxu1 %v6297_v40 }
 0x660   :  { %3680 = vmatpush1.bf16.msra.mxu1 %v6295_v19 }
 0x661   :  { %5880 = vmatmul.mubr.msk.bf16.vlgmr.msra.gmra.mrb[8].mxu0 %vm2679_vm12, %v3004_v8  ;;  %3681 = vmatprep.subr.bf16.mxu1 %v6300_v43 }
 0x662   :  { %5884 = vmatpush3.bf16.msra.mxu0 %v6285_v41  ;;  %5887 = vmatprep.mubr.msk.bf16.mxu0 %vm2679_vm12, %v3085_v38 }
 0x663   :  { %5885 = vmatprep.subr.bf16.mxu0 %v6286_v31 }
 0x664   :  { %3682 = vmatpush1.bf16.msra.mxu1 %v6298_v2 }
 0x665   :  { %3683 = vmatprep.subr.bf16.mxu1 %v6303_v45 }
 0x666   :  { %5886 = vmatpush3.bf16.msra.mxu0 %v6286_v31 }
 0x667   :  { %5891 = vmatprep.subr.bf16.mxu0 %v6287_v1 }
 0x668   :  { %3684 = vmatpush1.bf16.msra.mxu1 %v6301_v54 }
 0x669   :  { %3685 = vmatprep.subr.bf16.mxu1 %v6306_v13 }
 0x66c   :  { %3686 = vmatpush1.bf16.msra.mxu1 %v6304_v44 }
 0x66d   :  { %5888 = vmatmul.mubr.msk.bf16.vlgmr.msra.gmra.mrb[8].mxu0 %vm2679_vm12, %v3086_v9  ;;  %3687 = vmatprep.subr.bf16.mxu1 %v6309_v21 }
 0x66e   :  { %5892 = vmatpush3.bf16.msra.mxu0 %v6287_v1  ;;  %5895 = vmatprep.mubr.msk.bf16.mxu0 %vm2679_vm12, %v3167_v4 }
 0x66f   :  { %5893 = vmatprep.subr.bf16.mxu0 %v6288_v33 }
 0x670   :  { %3688 = vmatpush1.bf16.msra.mxu1 %v6307_v16 }
 0x671   :  { %3689 = vmatprep.subr.bf16.mxu1 %v6312_v34  ;;  %v6342_v34 = vld [vmem:[%s8743_s9 + $0x14] ss:$8 sps:$4 sm:$0xff]  }
 0x672   :  { %5894 = vmatpush3.bf16.msra.mxu0 %v6288_v33 }
 0x673   :  { %5900 = vmatprep.subr.bf16.mxu0 %v5899_v55  ;;  %v8833_v55 = vld [vmem:[#allocation7_spill] sm:$0xff] }
 0x674   :  { %3690 = vmatpush1.bf16.msra.mxu1 %v6310_v49 }
 0x675   :  { %3691 = vmatprep.subr.bf16.mxu1 %v6315_v27 }
 0x678   :  { %3692 = vmatpush1.bf16.msra.mxu1 %v6313_v17 }
 0x679   :  { %5896 = vmatmul.mubr.msk.bf16.vlgmr.msra.gmra.mrb[8].mxu0 %vm2679_vm12, %v3168_v60  ;;  %3693 = vmatprep.subr.bf16.mxu1 %v6318_v61  ;;  %v6334_v60 = vld [vmem:[%s8743_s9 + $0x1f0] ss:$8 sps:$4 sm:$0xff]   ;;  %vm8846_vm12 = vmmov %vm8839_vm5 }
 0x67a   :  { %3349 = vmatprep.mubr.f32.mxu0 %v8813_v48  ;;  %5902 = vmatpush1.bf16.msra.mxu0 %v5901_v56 }
 0x67c   :  { %3694 = vmatpush1.bf16.msra.mxu1 %v6316_v29 }
 0x67d   :  { %3695 = vmatprep.subr.bf16.mxu1 %v6321_v22  ;;  %v6340_v22 = vld [vmem:[%s8743_s9 + $0x10] ss:$8 sps:$4 sm:$0xff]  }
 0x680   :  { %3696 = vmatpush1.bf16.msra.mxu1 %v6319_v35 }
 0x681   :  { %3697 = vmatprep.subr.bf16.mxu1 %v6324_v42  ;;  %v6345_v42 = vld [vmem:[%s8743_s9 + $0x24] ss:$8 sps:$4 sm:$0xff]  }
 0x684   :  { %3698 = vmatpush1.bf16.msra.mxu1 %v6322_v30 }
 0x685   :  { %3699 = vmatprep.subr.bf16.mxu1 %v6327_v26 }
 0x688   :  { %3700 = vmatpush1.bf16.msra.mxu1 %v6325_v11 }
 0x689   :  { %3701 = vmatprep.subr.bf16.mxu1 %v6330_v62 }
 0x68c   :  { %3702 = vmatpush1.bf16.msra.mxu1 %v6328_v25 }
 0x68d   :  { %3703 = vmatprep.subr.bf16.mxu1 %v6333_v12  ;;  %v6358_v12 = vld [vmem:[%s8743_s9 + $0x70] ss:$8 sps:$4 sm:$0xff]  }
 0x690   :  { %3704 = vmatpush1.bf16.msra.mxu1 %v6331_v47  ;;  %v6441_v47 = vld [vmem:[%s8745_s11 + $0xe0] sm:$0xff]  }
 0x691   :  { %3705 = vmatprep.subr.bf16.mxu1 %v6336_v24  ;;  %v6442_v24 = vld [vmem:[%s8745_s11 + $0xa0] sm:$0xff]  }
 0x694   :  { %3706 = vmatpush1.bf16.msra.mxu1 %v6334_v60  ;;  %v6363_v60 = vld [vmem:[%s8743_s9 + $0x84] ss:$8 sps:$4 sm:$0xff]  }
 0x695   :  { %3888 = vmatprep.subr.bf16.mxu1 %v6339_v59  ;;  %v6443_v59 = vld [vmem:[%s8745_s11 + $0xe8] sm:$0xff]  }
 0x74c   :  { %v5897_v32 = vpop.f32.mrb[8].mxu0 }
 0x74d   :  { %v3226_v28 = vpop.f32.mrb[9].mxu0  ;;  %v5449_v51 = vmul.f32 -1.442695, %v5897_v32  ;;  %v6343_v32 = vld [vmem:[%s8743_s9 + $0x20] ss:$8 sps:$4 sm:$0xff]  }
 0x74e   :  { %v5447_v57 = vmul.f32 -1.442695, %v3226_v28  ;;  %v5898_v63 = vpop.f32.mrb[10].mxu0  ;;  %v6348_v28 = vld [vmem:[%s8743_s9 + $0x34] ss:$8 sps:$4 sm:$0xff]  }
 0x74f   :  { %v3229_v41 = vpop.f32.mrb[11].mxu0  ;;  %v5450_v15 = vmul.f32 -1.442695, %v5898_v63 }
 0x750   :  { %6481 = vpow2.f32 %v5447_v57  ;;  %v5448_v23 = vmul.f32 -1.442695, %v3229_v41  ;;  %v6346_v41 = vld [vmem:[%s8743_s9 + $0x30] ss:$8 sps:$4 sm:$0xff]  }
 0x752   :  { %6483 = vpow2.f32 %v5448_v23  ;;  %v6433_v23 = vld [vmem:[%s8745_s11 + $0xc0] sm:$0xff]  }
 0x753   :  { %6485 = vpow2.f32 %v5449_v51  ;;  %v6351_v51 = vld [vmem:[%s8743_s9 + $0x44] ss:$8 sps:$4 sm:$0xff]   ;;  %5759 = vmatprep.subr.bf16.mxu0 %v6433_v23  ;;  %v6400_v23 = vld [vmem:[%s8743_s9 + $0x250] ss:$8 sps:$4 sm:$0xff]  }
 0x754   :  { %6487 = vpow2.f32 %v5450_v15  ;;  %v6434_v15 = vld [vmem:[%s8745_s11 + $0x80] sm:$0xff]  }
 0x75a   :  { %v6482_v52 = vpop.eup %6481 }
 0x75b   :  { %v3257_v8 = vadd.f32 1.0, %v6482_v52  ;;  %v6349_v52 = vld [vmem:[%s8743_s9 + $0x40] ss:$8 sps:$4 sm:$0xff]  }
 0x75c   :  { %v6484_v31 = vpop.eup %6483 }
 0x75d   :  { %6489 = vrcp.f32 %v3257_v8  ;;  %v3258_v38 = vadd.f32 1.0, %v6484_v31  ;;  %v6486_v1 = vpop.eup %6485  ;;  %v6435_v8 = vld [vmem:[%s8745_s11 + $0xc8] sm:$0xff]   ;;  %v6354_v31 = vld [vmem:[%s8743_s9 + $0x54] ss:$8 sps:$4 sm:$0xff]  }
 0x75e   :  { %v3259_v46 = vadd.f32 1.0, %v6486_v1  ;;  %v6488_v14 = vpop.eup %6487  ;;  %v6437_v1 = vld [vmem:[%s8745_s11 + $0xd0] sm:$0xff]  }
 0x75f   :  { %6491 = vrcp.f32 %v3258_v38  ;;  %v3260_v39 = vadd.f32 1.0, %v6488_v14  ;;  %v6436_v38 = vld [vmem:[%s8745_s11 + $0x88] sm:$0xff]  }
 0x760   :  { %6493 = vrcp.f32 %v3259_v46  ;;  %v6352_v46 = vld [vmem:[%s8743_s9 + $0x50] ss:$8 sps:$4 sm:$0xff]   ;;  %v6357_v14 = vld [vmem:[%s8743_s9 + $0x64] ss:$8 sps:$4 sm:$0xff]  }
 0x761   :  { %6495 = vrcp.f32 %v3260_v39  ;;  %v6438_v39 = vld [vmem:[%s8745_s11 + $0x90] sm:$0xff]  }
 0x767   :  { %v6490_v58 = vpop.eup %6489 }
 0x768   :  { %5451 = vmatmul.mubr.msk.f32.vlgmr.msra.gmra.mrb[12].mxu0 %vm1891_vm3, %v6490_v58  ;;  %v6355_v58 = vld [vmem:[%s8743_s9 + $0x60] ss:$8 sps:$4 sm:$0xff]  }
 0x769   :  { %3355 = vmatprep.mubr.f32.mxu0 %v8813_v48  ;;  %v6492_v9 = vpop.eup %6491  ;;  %5760 = vmatpush3.bf16.msra.mxu0 %v6434_v15  ;;  %v6405_v15 = vld [vmem:[%s8743_s9 + $0x264] ss:$8 sps:$4 sm:$0xff]  }
 0x76a   :  { %v6494_v33 = vpop.eup %6493  ;;  %5761 = vmatprep.subr.bf16.mxu0 %v6435_v8  ;;  %v6408_v8 = vld [vmem:[%s8743_s9 + $0x274] ss:$8 sps:$4 sm:$0xff]  }
 0x76b   :  { %v6496_v4 = vpop.eup %6495 }
 0x76c   :  { %5452 = vmatmul.mubr.msk.f32.gmra.mrb[14].mxu0 %vm1891_vm3, %v6492_v9  ;;  %v6439_v9 = vld [vmem:[%s8745_s11 + $0xd8] sm:$0xff]  }
 0x76d   :  { %3361 = vmatprep.mubr.f32.mxu0 %v8813_v48  ;;  %5762 = vmatpush3.bf16.msra.mxu0 %v6436_v38  ;;  %v6411_v38 = vld [vmem:[%s8743_s9 + $0x284] ss:$8 sps:$4 sm:$0xff]  }
 0x76e   :  { %5763 = vmatprep.subr.bf16.mxu0 %v6437_v1  ;;  %v6409_v1 = vld [vmem:[%s8743_s9 + $0x280] ss:$8 sps:$4 sm:$0xff]  }
 0x770   :  { %5453 = vmatmul.mubr.msk.f32.gmra.mrb[16].mxu0 %vm1891_vm3, %v6494_v33  ;;  %v6360_v33 = vld [vmem:[%s8743_s9 + $0x74] ss:$8 sps:$4 sm:$0xff]  }
 0x771   :  { %3367 = vmatprep.mubr.f32.mxu0 %v8813_v48  ;;  %5764 = vmatpush3.bf16.msra.mxu0 %v6438_v39  ;;  %v6417_v39 = vld [vmem:[%s8743_s9 + $0x2a4] ss:$8 sps:$4 sm:$0xff]  }
 0x772   :  { %5765 = vmatprep.subr.bf16.mxu0 %v6439_v9  ;;  %v6420_v9 = vld [vmem:[%s8743_s9 + $0x2b4] ss:$8 sps:$4 sm:$0xff]  }
 0x774   :  { %5454 = vmatmul.mubr.msk.f32.gmra.mrb[18].mxu0 %vm1891_vm3, %v6496_v4  ;;  %v6440_v4 = vld [vmem:[%s8745_s11 + $0x98] sm:$0xff]  }
 0x775   :  { %5766 = vmatpush3.bf16.msra.mxu0 %v6440_v4  ;;  %v6423_v4 = vld [vmem:[%s8743_s9 + $0x2c4] ss:$8 sps:$4 sm:$0xff]  }
 0x776   :  { %5767 = vmatprep.subr.bf16.mxu0 %v6441_v47  ;;  %v6421_v47 = vld [vmem:[%s8743_s9 + $0x2c0] ss:$8 sps:$4 sm:$0xff]  }
 0x779   :  { %5768 = vmatpush3.bf16.msra.mxu0 %v6442_v24  ;;  %v6429_v24 = vld [vmem:[%s8743_s9 + $0x2e4] ss:$8 sps:$4 sm:$0xff]  }
 0x77a   :  { %5769 = vmatprep.subr.bf16.mxu0 %v6443_v59 }
 0x83b   :  { %v3351_v53 = vpop.f32.mrb[12].mxu0 }
 0x83c   :  { %v3374_v37 = vmul.f32 %v3351_v53, %v8833_v55  ;;  %v3353_v56 = vpop.f32.mrb[13].mxu0  ;;  %v6361_v53 = vld [vmem:[%s8743_s9 + $0x80] ss:$8 sps:$4 sm:$0xff]   ;;  %v6366_v55 = vld [vmem:[%s8743_s9 + $0x94] ss:$8 sps:$4 sm:$0xff]  }
 0x83d   :  { %v3375_v50 = vmul.f32 %v3353_v56, %v7297_v3  ;;  %v6364_v56 = vld [vmem:[%s8743_s9 + $0x90] ss:$8 sps:$4 sm:$0xff]  }
 0x83e   :  { %3382 = vst [vmem:[%s8744_s15] sm:$0xff] %v3374_v37  ;;  %v3398_v5 = vrot.slane %v3374_v37, 7 }
 0x83f   :  { %3383 = vst [vmem:[%s8744_s15 + $0x8] sm:$0xff] %v3375_v50  ;;  %v3399_v10 = vrot.slane %v3375_v50, 7  ;;  %v3357_v36 = vpop.f32.mrb[14].mxu0 }
 0x840   :  { %3422 = vst [vmem:[#allocation2] sm:$0xfe] %v3398_v5  ;;  %v3376_v40 = vmul.f32 %v3357_v36, %v7299_v6  ;;  %v3359_v19 = vpop.f32.mrb[15].mxu0  ;;  %v6337_v6 = vld [vmem:[%s8743_s9] ss:$8 sps:$4 sm:$0xff]  }
 0x841   :  { %3423 = vst [vmem:[#allocation2 + $0x8] sm:$0xfe] %v3399_v10  ;;  %v3377_v43 = vmul.f32 %v3359_v19, %v7305_v7  ;;  %v8835_v7 = vld [vmem:[#allocation8_spill] sm:$0xff]  ;;  %v6370_v36 = vld [vmem:[%s8743_s9 + $0xb0] ss:$8 sps:$4 sm:$0xff]  }
 0x842   :  { %3384 = vst [vmem:[%s8744_s15 + $0x10] sm:$0xff] %v3376_v40  ;;  %v3400_v3 = vrot.slane %v3376_v40, 7  ;;  %v3478_v2 = vpack.c.bf16 %v3376_v40, %v3374_v37  ;;  %v6444_v37 = vld [vmem:[%s8745_s11 + $0xa8] sm:$0xff]  }
 0x843   :  { %3385 = vst [vmem:[%s8744_s15 + $0x18] sm:$0xff] %v3377_v43  ;;  %v3402_v45 = vrot.slane %v3377_v43, 7  ;;  %v3363_v54 = vpop.f32.mrb[16].mxu0  ;;  %v3479_v13 = vpack.c.bf16 %v3377_v43, %v3375_v50  ;;  %v6369_v50 = vld [vmem:[%s8743_s9 + $0xa4] ss:$8 sps:$4 sm:$0xff]   ;;  %5770 = vmatpush3.bf16.msra.mxu0 %v6444_v37 }
 0x844   :  { %v8257_v44 = vsel %vm8834_vm1, %v3398_v5, %v3400_v3  ;;  %3426 = vst [vmem:[#allocation2 + $0x20] sm:$0x1] %v3400_v3  ;;  %v3378_v21 = vmul.f32 %v3363_v54, %v8835_v7  ;;  %v3365_v16 = vpop.f32.mrb[17].mxu0  ;;  %v6367_v5 = vld [vmem:[%s8743_s9 + $0xa0] ss:$8 sps:$4 sm:$0xff]   ;;  %vm8852_vm1 = vmmov %vm8837_vm0 }
 0x845   :  { %v8264_v49 = vsel %vm8836_vm2, %v3399_v10, %v3402_v45  ;;  %3427 = vst [vmem:[#allocation2 + $0x28] sm:$0x1] %v3402_v45  ;;  %v3379_v27 = vmul.f32 %v3365_v16, %v7313_v18  ;;  %3707 = vmatprep.mubr.bf16.mxu1 %v3479_v13  ;;  %v6372_v10 = vld [vmem:[%s8743_s9 + $0xb4] ss:$8 sps:$4 sm:$0xff]   ;;  %v6375_v40 = vld [vmem:[%s8743_s9 + $0xc4] ss:$8 sps:$4 sm:$0xff]   ;;  %vm8853_vm2 = vmmov %vm8839_vm5 }
 0x846   :  { %3386 = vst [vmem:[%s8744_s15 + $0x20] sm:$0xff] %v3378_v21  ;;  %v3404_v17 = vrot.slane %v3378_v21, 7  ;;  %3708 = vmatmul.mubr.bf16.vlgmr.msra.gmra.mrb[8].mxu1 %v3478_v2  ;;  %v6373_v19 = vld [vmem:[%s8743_s9 + $0xc0] ss:$8 sps:$4 sm:$0xff]   ;;  %v6378_v43 = vld [vmem:[%s8743_s9 + $0xd4] ss:$8 sps:$4 sm:$0xff]  }
 0x847   :  { %3387 = vst [vmem:[%s8744_s15 + $0x28] sm:$0xff] %v3379_v27  ;;  %v3405_v61 = vrot.slane %v3379_v27, 7  ;;  %3889 = vmatpush1.bf16.msra.mxu1 %v6337_v6  ;;  %v3369_v29 = vpop.f32.mrb[18].mxu0  ;;  %v6376_v3 = vld [vmem:[%s8743_s9 + $0xd0] ss:$8 sps:$4 sm:$0xff]   ;;  %v3434_v7 = vld [vmem:[#allocation2] sm:$0xff] }
 0x848   :  { %3428 = vst [vmem:[#allocation2 + $0x30] sm:$0xfe] %v3404_v17  ;;  %v3380_v18 = vmul.f32 %v3369_v29, %v7315_v20  ;;  %v3371_v35 = vpop.f32.mrb[19].mxu0  ;;  %3890 = vmatprep.subr.bf16.mxu1 %v6342_v34  ;;  %v3435_v62 = vld [vmem:[#allocation2 + $0x8] sm:$0xff]  ;;  %v6384_v54 = vld [vmem:[%s8743_s9 + $0xf4] ss:$8 sps:$4 sm:$0xff]  }
 0x849   :  { %3429 = vst [vmem:[#allocation2 + $0x38] sm:$0xfe] %v3405_v61  ;;  %v3381_v30 = vmul.f32 %v3371_v35, %v7321_v0  ;;  %v3443_v63 = vpack.c.bf16 %v8264_v49, %v3435_v62  ;;  %v6381_v2 = vld [vmem:[%s8743_s9 + $0xe4] ss:$8 sps:$4 sm:$0xff]   ;;  %v6379_v45 = vld [vmem:[%s8743_s9 + $0xe0] ss:$8 sps:$4 sm:$0xff]  }
 0x84a   :  { %3388 = vst [vmem:[%s8744_s15 + $0x30] sm:$0xff] %v3380_v18  ;;  %v3406_v26 = vrot.slane %v3380_v18, 7  ;;  %v3480_v11 = vpack.c.bf16 %v3380_v18, %v3378_v21  ;;  %v6382_v13 = vld [vmem:[%s8743_s9 + $0xf0] ss:$8 sps:$4 sm:$0xff]   ;;  %v6387_v6 = vld [vmem:[%s8743_s9 + $0x204] ss:$8 sps:$4 sm:$0xff]  }
 0x84b   :  { %3389 = vst [vmem:[%s8744_s15 + $0x38] sm:$0xff] %v3381_v30  ;;  %v3408_v20 = vrot.slane %v3381_v30, 7  ;;  %3891 = vmatpush1.bf16.msra.mxu1 %v6340_v22  ;;  %v3481_v25 = vpack.c.bf16 %v3381_v30, %v3379_v27  ;;  %v6385_v16 = vld [vmem:[%s8743_s9 + $0x200] ss:$8 sps:$4 sm:$0xff]   ;;  %v3442_v27 = vpack.c.bf16 %v8257_v44, %v3434_v7  ;;  %v6388_v18 = vld [vmem:[%s8743_s9 + $0x210] ss:$8 sps:$4 sm:$0xff]  }
 0x84c   :  { %v8291_v0 = vsel %vm8837_vm0, %v3404_v17, %v3406_v26  ;;  %3432 = vst [vmem:[#allocation2 + $0x50] sm:$0x1] %v3406_v26  ;;  %3892 = vmatprep.subr.bf16.mxu1 %v6345_v42  ;;  %v3946_v34 = vld [vmem:[#allocation2 + $0x28] sm:$0x3]  ;;  %v6390_v17 = vld [vmem:[%s8743_s9 + $0x214] ss:$8 sps:$4 sm:$0xff]   ;;  %vm8854_vm0 = vmmov %vm8853_vm2 }
 0x84d   :  { %v8297_v57 = vsel %vm8838_vm4, %v3405_v61, %v3408_v20  ;;  %3433 = vst [vmem:[#allocation2 + $0x58] sm:$0x1] %v3408_v20  ;;  %3717 = vmatprep.mubr.bf16.mxu1 %v3481_v25  ;;  %v3942_v29 = vld [vmem:[#allocation2 + $0x8] sm:$0xfc]  ;;  %v3973_v22 = vrot.slane %v3946_v34, 2  ;;  %v3969_v30 = vrot.slane %v8264_v49, 2  ;;  %vm8855_vm4 = vmmov %vm8854_vm0 }
 0x84e   :  { %3718 = vmatmul.mubr.bf16.gmra.mrb[12].mxu1 %v3480_v11  ;;  %v6393_v35 = vld [vmem:[%s8743_s9 + $0x224] ss:$8 sps:$4 sm:$0xff]   ;;  %v3968_v42 = vrot.slane %v3942_v29, 2  ;;  %v6391_v62 = vld [vmem:[%s8743_s9 + $0x220] ss:$8 sps:$4 sm:$0xff]   ;;  %v6445_v29 = vld [vmem:[%s8745_s11 + $0xf0] sm:$0xff]  }
 0x84f   :  { %3893 = vmatpush1.bf16.msra.mxu1 %v6343_v32  ;;  %3920 = vmatprep.mubr.bf16.mxu1 %v3443_v63  ;;  %v3438_v26 = vld [vmem:[#allocation2 + $0x30] sm:$0xff]  ;;  %v3974_v11 = vsel %vm8839_vm5, %v3969_v30, %v3973_v22  ;;  %v6399_v63 = vld [vmem:[%s8743_s9 + $0x244] ss:$8 sps:$4 sm:$0xff]   ;;  %v3945_v59 = vld [vmem:[#allocation2 + $0x20] sm:$0x3] }
 0x850   :  { %3894 = vmatprep.subr.bf16.mxu1 %v6348_v28  ;;  %v3439_v21 = vld [vmem:[#allocation2 + $0x38] sm:$0xff]  ;;  %v3444_v20 = vpack.c.bf16 %v8291_v0, %v3438_v26  ;;  %v3970_v25 = vsel %vm8840_vm6, %v3968_v42, %v3969_v30  ;;  %v6446_v22 = vld [vmem:[%s8745_s11 + $0xb0] sm:$0xff]   ;;  %5771 = vmatprep.subr.bf16.mxu0 %v6445_v29  ;;  %v4251_v42 = vld [vmem:[%s8746_s10] sm:$0x3] }
 0x851   :  { %v3445_v61 = vpack.c.bf16 %v8297_v57, %v3439_v21  ;;  %v6396_v32 = vld [vmem:[%s8743_s9 + $0x234] ss:$8 sps:$4 sm:$0xff]   ;;  %v3994_v28 = vpack.c.bf16 %v3974_v11, %v3970_v25  ;;  %v6394_v49 = vld [vmem:[%s8743_s9 + $0x230] ss:$8 sps:$4 sm:$0xff]   ;;  %5772 = vmatpush3.bf16.msra.mxu0 %v6446_v22  ;;  %vm8856_vm5 = vmmov %vm8854_vm0 }
 0x852   :  { %v6432_v37 = vld [vmem:[%s8743_s9 + $0x2f4] ss:$8 sps:$4 sm:$0xff]   ;;  %vm8857_vm6 = vmmov %vm8854_vm0 }
 0x853   :  { %3895 = vmatpush1.bf16.msra.mxu1 %v6346_v41  ;;  %v6397_v41 = vld [vmem:[%s8743_s9 + $0x240] ss:$8 sps:$4 sm:$0xff]   ;;  %v3947_v21 = vld [vmem:[#allocation2 + $0x30] sm:$0xfc]  ;;  %v8848_v11 = vld [vmem:[#allocation6_spill] sm:$0xff] }
 0x854   :  { %3896 = vmatprep.subr.bf16.mxu1 %v6351_v51  ;;  %v6402_v51 = vld [vmem:[%s8743_s9 + $0x254] ss:$8 sps:$4 sm:$0xff]  }
 0x855   :  { %v8847_v30 = vld [vmem:[#allocation5_spill] sm:$0xff] }
 0x856   :  { %v4256_v26 = vrot.slane %v4251_v42, %v8847_v30  ;;  %v6461_v29 = vld [vmem:[%s8745_s11 + $0x70] sm:$0xff]  }
 0x857   :  { %3897 = vmatpush1.bf16.msra.mxu1 %v6349_v52  ;;  %v6403_v52 = vld [vmem:[%s8743_s9 + $0x260] ss:$8 sps:$4 sm:$0xff]   ;;  %v6462_v22 = vld [vmem:[%s8745_s11 + $0x30] sm:$0xff]  }
 0x858   :  { %3898 = vmatprep.subr.bf16.mxu1 %v6354_v31  ;;  %v6406_v31 = vld [vmem:[%s8743_s9 + $0x270] ss:$8 sps:$4 sm:$0xff]  }
 0x85b   :  { %3899 = vmatpush1.bf16.msra.mxu1 %v6352_v46  ;;  %v6414_v46 = vld [vmem:[%s8743_s9 + $0x294] ss:$8 sps:$4 sm:$0xff]  }
 0x85c   :  { %3900 = vmatprep.subr.bf16.mxu1 %v6357_v14  ;;  %v6412_v14 = vld [vmem:[%s8743_s9 + $0x290] ss:$8 sps:$4 sm:$0xff]  }
 0x85f   :  { %3901 = vmatpush1.bf16.msra.mxu1 %v6355_v58  ;;  %v6415_v58 = vld [vmem:[%s8743_s9 + $0x2a0] ss:$8 sps:$4 sm:$0xff]  }
 0x860   :  { %3902 = vmatprep.subr.bf16.mxu1 %v6360_v33  ;;  %v6418_v33 = vld [vmem:[%s8743_s9 + $0x2b0] ss:$8 sps:$4 sm:$0xff]  }
 0x863   :  { %3903 = vmatpush1.bf16.msra.mxu1 %v6358_v12  ;;  %v6426_v12 = vld [vmem:[%s8743_s9 + $0x2d4] ss:$8 sps:$4 sm:$0xff]  }
 0x864   :  { %3904 = vmatprep.subr.bf16.mxu1 %v6363_v60  ;;  %v6424_v60 = vld [vmem:[%s8743_s9 + $0x2d0] ss:$8 sps:$4 sm:$0xff]  }
 0x867   :  { %3905 = vmatpush1.bf16.msra.mxu1 %v6361_v53  ;;  %v6427_v53 = vld [vmem:[%s8743_s9 + $0x2e0] ss:$8 sps:$4 sm:$0xff]  }
 0x868   :  { %3906 = vmatprep.subr.bf16.mxu1 %v6366_v55  ;;  %v3952_v55 = vld [vmem:[#allocation2 + $0x58] sm:$0x3] }
 0x86b   :  { %3907 = vmatpush1.bf16.msra.mxu1 %v6364_v56  ;;  %v3941_v56 = vld [vmem:[#allocation2] sm:$0xfc] }
 0x86c   :  { %3908 = vmatprep.subr.bf16.mxu1 %v6369_v50  ;;  %v3971_v50 = vrot.slane %v3945_v59, 2 }
 0x86f   :  { %3909 = vmatpush1.bf16.msra.mxu1 %v6367_v5  ;;  %v3948_v5 = vld [vmem:[#allocation2 + $0x38] sm:$0xfc] }
 0x870   :  { %3910 = vmatprep.subr.bf16.mxu1 %v6372_v10  ;;  %v3983_v10 = vrot.slane %v3952_v55, 2 }
 0x873   :  { %3911 = vmatpush1.bf16.msra.mxu1 %v6370_v36  ;;  %v6430_v36 = vld [vmem:[%s8743_s9 + $0x2f0] ss:$8 sps:$4 sm:$0xff]  }
 0x874   :  { %3912 = vmatprep.subr.bf16.mxu1 %v6375_v40  ;;  %v3965_v40 = vrot.slane %v3941_v56, 2 }
 0x877   :  { %3913 = vmatpush1.bf16.msra.mxu1 %v6373_v19  ;;  %v3966_v19 = vrot.slane %v8257_v44, 2  ;;  %v3975_v44 = vrot.slane %v3947_v21, 2  ;;  %v6455_v21 = vld [vmem:[%s8745_s11 + $0x58] sm:$0xff]  }
 0x878   :  { %3914 = vmatprep.subr.bf16.mxu1 %v6378_v43  ;;  %v3978_v43 = vrot.slane %v3948_v5, 2  ;;  %v6452_v5 = vld [vmem:[%s8745_s11 + $0x8] sm:$0xff]  }
 0x87b   :  { %3915 = vmatpush1.bf16.msra.mxu1 %v6376_v3  ;;  %v3979_v3 = vrot.slane %v8297_v57, 2 }
 0x87c   :  { %3916 = vmatprep.subr.bf16.mxu1 %v6381_v2  ;;  %v3972_v2 = vsel %vm8841_vm7, %v3966_v19, %v3971_v50  ;;  %vm8858_vm7 = vmmov %vm8854_vm0 }
 0x87d   :  { %v3980_v7 = vsel %vm8844_vm9, %v3978_v43, %v3979_v3 }
 0x87f   :  { %3917 = vmatpush1.bf16.msra.mxu1 %v6379_v45  ;;  %v3984_v45 = vsel %vm8842_vm8, %v3979_v3, %v3983_v10  ;;  %vm8859_vm8 = vmmov %vm8854_vm0 }
 0x880   :  { %3918 = vmatprep.subr.bf16.mxu1 %v6384_v54  ;;  %v3951_v54 = vld [vmem:[#allocation2 + $0x50] sm:$0x3] }
 0x881   :  { %v3981_v34 = vrot.slane %v3951_v54, 2 }
 0x883   :  { %3919 = vmatpush1.bf16.msra.mxu1 %v6382_v13  ;;  %v3967_v13 = vsel %vm8843_vm10, %v3965_v40, %v3966_v19  ;;  %v6453_v40 = vld [vmem:[%s8745_s11 + $0x50] sm:$0xff]   ;;  %vm8860_vm10 = vmmov %vm8854_vm0 }
 0x884   :  { %4190 = vmatprep.subr.bf16.mxu1 %v6387_v6  ;;  %v3993_v6 = vpack.c.bf16 %v3972_v2, %v3967_v13 }
 0x886   :  { %3921 = vmatmul.mubr.bf16.vlgmr.msra.gmra.mrb[8].mxu1 %v3442_v27  ;;  %v3976_v27 = vrot.slane %v8291_v0, 2  ;;  %v6448_v0 = vld [vmem:[%s8745_s11 + $0xb8] sm:$0xff]  }
 0x887   :  { %3930 = vmatprep.mubr.bf16.mxu1 %v3445_v61  ;;  %4191 = vmatpush1.bf16.msra.mxu1 %v6385_v16  ;;  %v3996_v16 = vpack.c.bf16 %v3984_v45, %v3980_v7 }
 0x888   :  { %4192 = vmatprep.subr.bf16.mxu1 %v6390_v17  ;;  %v3982_v57 = vsel %vm8845_vm11, %v3976_v27, %v3981_v34  ;;  %v3977_v17 = vsel %vm8846_vm12, %v3975_v44, %v3976_v27  ;;  %v6456_v44 = vld [vmem:[%s8745_s11 + $0x18] sm:$0xff]   ;;  %v6457_v27 = vld [vmem:[%s8745_s11 + $0x60] sm:$0xff]  }
 0x889   :  { %v3995_v61 = vpack.c.bf16 %v3982_v57, %v3977_v17  ;;  %v6458_v57 = vld [vmem:[%s8745_s11 + $0x20] sm:$0xff]   ;;  %v6459_v17 = vld [vmem:[%s8745_s11 + $0x68] sm:$0xff]  }
 0x88b   :  { %4193 = vmatpush1.bf16.msra.mxu1 %v6388_v18  ;;  %v6447_v18 = vld [vmem:[%s8745_s11 + $0xf8] sm:$0xff]  }
 0x88c   :  { %4194 = vmatprep.subr.bf16.mxu1 %v6393_v35  ;;  %5773 = vmatprep.subr.bf16.mxu0 %v6447_v18  ;;  %v6449_v35 = vld [vmem:[%s8745_s11 + $0x40] sm:$0xff]   ;;  %v6463_v18 = vld [vmem:[%s8745_s11 + $0x78] sm:$0xff]  }
 0x88d   :  { %5774 = vmatpush3.bf16.msra.mxu0 %v6448_v0  ;;  %v6464_v0 = vld [vmem:[%s8745_s11 + $0x38] sm:$0xff]  }
 0x88e   :  { %3931 = vmatmul.mubr.bf16.gmra.mrb[12].mxu1 %v3444_v20  ;;  %5787 = vmatprep.subr.bf16.mxu0 %v6449_v35  ;;  %v6465_v35 = vld [vmem:[%s8745_s11 + $0x140] sm:$0xff]  }
 0x88f   :  { %4195 = vmatpush1.bf16.msra.mxu1 %v6391_v62  ;;  %4222 = vmatprep.mubr.bf16.mxu1 %v3994_v28  ;;  %v4260_v62 = vrot.slane %v4251_v42, %v8848_v11 }
 0x890   :  { %4196 = vmatprep.subr.bf16.mxu1 %v6396_v32 }
 0x893   :  { %4197 = vmatpush1.bf16.msra.mxu1 %v6394_v49 }
 0x894   :  { %4198 = vmatprep.subr.bf16.mxu1 %v6399_v63 }
 0x897   :  { %4199 = vmatpush1.bf16.msra.mxu1 %v6397_v41 }
 0x898   :  { %4200 = vmatprep.subr.bf16.mxu1 %v6402_v51 }
 0x89b   :  { %4201 = vmatpush1.bf16.msra.mxu1 %v6400_v23 }
 0x89c   :  { %4202 = vmatprep.subr.bf16.mxu1 %v6405_v15 }
 0x89f   :  { %4203 = vmatpush1.bf16.msra.mxu1 %v6403_v52 }
 0x8a0   :  { %4204 = vmatprep.subr.bf16.mxu1 %v6408_v8 }
 0x8a3   :  { %4205 = vmatpush1.bf16.msra.mxu1 %v6406_v31 }
 0x8a4   :  { %4206 = vmatprep.subr.bf16.mxu1 %v6411_v38 }
 0x8a7   :  { %4207 = vmatpush1.bf16.msra.mxu1 %v6409_v1 }
 0x8a8   :  { %4208 = vmatprep.subr.bf16.mxu1 %v6414_v46 }
 0x8ab   :  { %4209 = vmatpush1.bf16.msra.mxu1 %v6412_v14 }
 0x8ac   :  { %4210 = vmatprep.subr.bf16.mxu1 %v6417_v39 }
 0x8af   :  { %4211 = vmatpush1.bf16.msra.mxu1 %v6415_v58 }
 0x8b0   :  { %4212 = vmatprep.subr.bf16.mxu1 %v6420_v9  ;;  %v6450_v9 = vld [vmem:[%s8745_s11] sm:$0xff]  }
 0x8b3   :  { %4213 = vmatpush1.bf16.msra.mxu1 %v6418_v33 }
 0x8b4   :  { %4214 = vmatprep.subr.bf16.mxu1 %v6423_v4 }
 0x8b7   :  { %4215 = vmatpush1.bf16.msra.mxu1 %v6421_v47 }
 0x8b8   :  { %4216 = vmatprep.subr.bf16.mxu1 %v6426_v12  ;;  %v6451_v12 = vld [vmem:[%s8745_s11 + $0x48] sm:$0xff]  }
 0x8bb   :  { %4217 = vmatpush1.bf16.msra.mxu1 %v6424_v60 }
 0x8bc   :  { %4218 = vmatprep.subr.bf16.mxu1 %v6429_v24 }
 0x8bf   :  { %4219 = vmatpush1.bf16.msra.mxu1 %v6427_v53 }
 0x8c0   :  { %4220 = vmatprep.subr.bf16.mxu1 %v6432_v37 }
 0x8c3   :  { %4221 = vmatpush1.bf16.msra.mxu1 %v6430_v36 }
 0x8c6   :  { %4223 = vmatmul.mubr.bf16.vlgmr.msra.gmra.mrb[8].mxu1 %v3993_v6  ;;  %v6454_v6 = vld [vmem:[%s8745_s11 + $0x10] sm:$0xff]  }
 0x8c7   :  { %4232 = vmatprep.mubr.bf16.mxu1 %v3996_v16 }
 0x8ce   :  { %4233 = vmatmul.mubr.bf16.gmra.mrb[12].mxu1 %v3995_v61  ;;  %v6460_v61 = vld [vmem:[%s8745_s11 + $0x28] sm:$0xff]  }
 0x999   :  { %v4224_v20 = vpop.f32.mrb[8].mxu1 }
 0x99a   :  { %v4263_v25 = vadd.f32 %v4256_v26, %v4224_v20  ;;  %v4226_v32 = vpop.f32.mrb[9].mxu1  ;;  %v6467_v20 = vld [vmem:[%s8745_s11 + $0x148] sm:$0xff]  }
 0x99b   :  { %v4264_v28 = vadd.f32 %v4260_v62, %v4226_v32  ;;  %v4228_v49 = vpop.f32.mrb[10].mxu1 }
 0x99c   :  { %v4271_v63 = vmax.f32 %v4263_v25, 0.0  ;;  %v4265_v41 = vadd.f32 %v4256_v26, %v4228_v49  ;;  %v4230_v51 = vpop.f32.mrb[11].mxu1  ;;  %v6468_v49 = vld [vmem:[%s8745_s11 + $0x108] sm:$0xff]  }
 0x99d   :  { %v4272_v23 = vmax.f32 %v4264_v28, 0.0  ;;  %v4266_v15 = vadd.f32 %v4260_v62, %v4230_v51 }
 0x99e   :  { %v4287_v52 = vrot.slane %v4271_v63, 7  ;;  %v4273_v8 = vmax.f32 %v4265_v41, 0.0 }
 0x99f   :  { %v4288_v31 = vrot.slane %v4272_v23, 7  ;;  %v4274_v38 = vmax.f32 %v4266_v15, 0.0 }
 0x9a0   :  { %4311 = vst [vmem:[#allocation2] sm:$0xfe] %v4287_v52  ;;  %v4289_v1 = vrot.slane %v4273_v8, 7  ;;  %v4367_v46 = vpack.c.bf16 %v4273_v8, %v4271_v63  ;;  %v6469_v63 = vld [vmem:[%s8745_s11 + $0x150] sm:$0xff]  }
 0x9a1   :  { %4312 = vst [vmem:[#allocation2 + $0x8] sm:$0xfe] %v4288_v31  ;;  %v4291_v14 = vrot.slane %v4274_v38, 7  ;;  %v4368_v39 = vpack.c.bf16 %v4274_v38, %v4272_v23  ;;  %v4234_v58 = vpop.f32.mrb[12].mxu1  ;;  %v6471_v38 = vld [vmem:[%s8745_s11 + $0x158] sm:$0xff]  }
 0x9a2   :  { %v8546_v33 = vsel %vm8849_vm13, %v4287_v52, %v4289_v1  ;;  %4315 = vst [vmem:[#allocation2 + $0x20] sm:$0x1] %v4289_v1  ;;  %v4267_v4 = vadd.f32 %v4256_v26, %v4234_v58  ;;  %v4236_v47 = vpop.f32.mrb[13].mxu1  ;;  %v6470_v52 = vld [vmem:[%s8745_s11 + $0x110] sm:$0xff]   ;;  %v6475_v58 = vld [vmem:[%s8745_s11 + $0x168] sm:$0xff]  }
 0x9a3   :  { %v8552_v60 = vsel %vm8850_vm14, %v4288_v31, %v4291_v14  ;;  %4316 = vst [vmem:[#allocation2 + $0x28] sm:$0x1] %v4291_v14  ;;  %v4268_v24 = vadd.f32 %v4260_v62, %v4236_v47  ;;  %v4238_v59 = vpop.f32.mrb[14].mxu1  ;;  %4532 = vmatprep.mubr.bf16.mxu0 %v4368_v39  ;;  %v6473_v14 = vld [vmem:[%s8745_s11 + $0x160] sm:$0xff]  }
 0x9a4   :  { %v4275_v53 = vmax.f32 %v4267_v4, 0.0  ;;  %v4269_v55 = vadd.f32 %v4256_v26, %v4238_v59  ;;  %v4240_v37 = vpop.f32.mrb[15].mxu1  ;;  %4533 = vmatmul.mubr.bf16.vlgmr.msra.gmra.mrb[20].mxu0 %v4367_v46  ;;  %v6466_v26 = vld [vmem:[%s8745_s11 + $0x100] sm:$0xff]   ;;  %v4722_v51 = vrot.slane %v8552_v60, 2  ;;  %v6472_v46 = vld [vmem:[%s8745_s11 + $0x118] sm:$0xff]   ;;  %v6477_v4 = vld [vmem:[%s8745_s11 + $0x170] sm:$0xff]  }
 0x9a5   :  { %v4276_v56 = vmax.f32 %v4268_v24, 0.0  ;;  %v4270_v50 = vadd.f32 %v4260_v62, %v4240_v37  ;;  %5788 = vmatpush3.bf16.msra.mxu0 %v6450_v9  ;;  %v6474_v39 = vld [vmem:[%s8745_s11 + $0x120] sm:$0xff]   ;;  %v6476_v9 = vld [vmem:[%s8745_s11 + $0x128] sm:$0xff]   ;;  %v6479_v24 = vld [vmem:[%s8745_s11 + $0x178] sm:$0xff]  }
 0x9a6   :  { %v4293_v10 = vrot.slane %v4275_v53, 7  ;;  %v4277_v36 = vmax.f32 %v4269_v55, 0.0  ;;  %5789 = vmatprep.subr.bf16.mxu0 %v6451_v12  ;;  %v6478_v12 = vld [vmem:[%s8745_s11 + $0x130] sm:$0xff]  }
 0x9a7   :  { %v4294_v19 = vrot.slane %v4276_v56, 7  ;;  %v4278_v43 = vmax.f32 %v4270_v50, 0.0  ;;  %v4323_v42 = vld [vmem:[#allocation2] sm:$0xff] }
 0x9a8   :  { %4317 = vst [vmem:[#allocation2 + $0x30] sm:$0xfe] %v4293_v10  ;;  %v4295_v3 = vrot.slane %v4277_v36, 7  ;;  %v4369_v2 = vpack.c.bf16 %v4277_v36, %v4275_v53  ;;  %v4324_v45 = vld [vmem:[#allocation2 + $0x8] sm:$0xff]  ;;  %v4331_v62 = vpack.c.bf16 %v8546_v33, %v4323_v42  ;;  %v4694_v59 = vld [vmem:[#allocation2] sm:$0xfc] }
 0x9a9   :  { %4318 = vst [vmem:[#allocation2 + $0x38] sm:$0xfe] %v4294_v19  ;;  %v4297_v54 = vrot.slane %v4278_v43, 7  ;;  %v4370_v13 = vpack.c.bf16 %v4278_v43, %v4276_v56  ;;  %5790 = vmatpush3.bf16.msra.mxu0 %v6452_v5  ;;  %v4332_v34 = vpack.c.bf16 %v8552_v60, %v4324_v45  ;;  %v4695_v32 = vld [vmem:[#allocation2 + $0x8] sm:$0xfc]  ;;  %v6480_v56 = vld [vmem:[%s8745_s11 + $0x138] sm:$0xff]  }
 0x9aa   :  { %v8564_v7 = vsel %vm8851_vm15, %v4293_v10, %v4295_v3  ;;  %4321 = vst [vmem:[#allocation2 + $0x50] sm:$0x1] %v4295_v3  ;;  %5791 = vmatprep.subr.bf16.mxu0 %v6453_v40  ;;  %v4699_v11 = vld [vmem:[#allocation2 + $0x28] sm:$0x3]  ;;  %v4721_v41 = vrot.slane %v4695_v32, 2  ;;  %v4718_v50 = vrot.slane %v4694_v59, 2 }
 0x9ab   :  { %v8570_v16 = vsel %vm8852_vm1, %v4294_v19, %v4297_v54  ;;  %4322 = vst [vmem:[#allocation2 + $0x58] sm:$0x1] %v4297_v54  ;;  %4540 = vmatprep.mubr.bf16.mxu0 %v4370_v13  ;;  %v4726_v28 = vrot.slane %v4699_v11, 2  ;;  %v4698_v47 = vld [vmem:[#allocation2 + $0x20] sm:$0x3]  ;;  %v4719_v5 = vrot.slane %v8546_v33, 2 }
 0x9ac   :  { %4541 = vmatmul.mubr.bf16.gmra.mrb[24].mxu0 %v4369_v2  ;;  %v4723_v31 = vsel %vm8854_vm0, %v4721_v41, %v4722_v51  ;;  %v4724_v53 = vrot.slane %v4698_v47, 2  ;;  %v4732_v36 = vrot.slane %v8570_v16, 2 }
 0x9ad   :  { %5792 = vmatpush3.bf16.msra.mxu0 %v6454_v6  ;;  %4677 = vmatprep.mubr.bf16.mxu0 %v4332_v34  ;;  %v4727_v15 = vsel %vm8853_vm2, %v4722_v51, %v4726_v28  ;;  %v4720_v3 = vsel %vm8857_vm6, %v4718_v50, %v4719_v5 }
 0x9ae   :  { %5793 = vmatprep.subr.bf16.mxu0 %v6455_v21  ;;  %v4747_v1 = vpack.c.bf16 %v4727_v15, %v4723_v31  ;;  %v4725_v40 = vsel %vm8855_vm4, %v4719_v5, %v4724_v53  ;;  %v4729_v21 = vrot.slane %v8564_v7, 2 }
 0x9af   :  { %v4327_v23 = vld [vmem:[#allocation2 + $0x30] sm:$0xff]  ;;  %v4746_v2 = vpack.c.bf16 %v4725_v40, %v4720_v3 }
 0x9b0   :  { %v4328_v30 = vld [vmem:[#allocation2 + $0x38] sm:$0xff]  ;;  %v4333_v8 = vpack.c.bf16 %v8564_v7, %v4327_v23  ;;  %v4700_v54 = vld [vmem:[#allocation2 + $0x30] sm:$0xfc]  ;;  %v4938_v7 = vld [vmem:[%s8742_s12] sm:$0xff] }
 0x9b1   :  { %5794 = vmatpush3.bf16.msra.mxu0 %v6456_v44  ;;  %v4334_v25 = vpack.c.bf16 %v8570_v16, %v4328_v30  ;;  %v4701_v55 = vld [vmem:[#allocation2 + $0x38] sm:$0xfc]  ;;  %v4704_v43 = vld [vmem:[#allocation2 + $0x50] sm:$0x3]  ;;  %v4728_v33 = vrot.slane %v4700_v54, 2  ;;  %v5043_v54 = vld [vmem:[%s8748_s1] sm:$0xff] }
 0x9b2   :  { %5795 = vmatprep.subr.bf16.mxu0 %v6457_v27  ;;  %v4705_v60 = vld [vmem:[#allocation2 + $0x58] sm:$0x3]  ;;  %v4731_v10 = vrot.slane %v4701_v55, 2  ;;  %v4734_v6 = vrot.slane %v4704_v43, 2  ;;  %v4939_v27 = vld [vmem:[%s8742_s12 + $0x8] sm:$0xff] }
 0x9b3   :  { %v4736_v37 = vrot.slane %v4705_v60, 2  ;;  %v4730_v34 = vsel %vm8860_vm10, %v4728_v33, %v4729_v21  ;;  %v4933_v60 = vstv %s8747_s13 }
 0x9b4   :  { %v4733_v45 = vsel %vm8858_vm7, %v4731_v10, %v4732_v36  ;;  %v4735_v16 = vsel %vm8859_vm8, %v4729_v21, %v4734_v6 }
 0x9b5   :  { %5796 = vmatpush3.bf16.msra.mxu0 %v6458_v57  ;;  %v4737_v19 = vsel %vm8856_vm5, %v4732_v36, %v4736_v37  ;;  %v4748_v44 = vpack.c.bf16 %v4735_v16, %v4730_v34  ;;  %v4941_v57 = vld [vmem:[%s8742_s12 + $0x18] sm:$0xff]  ;;  %v5045_v34 = vld [vmem:[%s8748_s1 + $0x10] sm:$0xff] }
 0x9b6   :  { %5797 = vmatprep.subr.bf16.mxu0 %v6459_v17  ;;  %v4749_v13 = vpack.c.bf16 %v4737_v19, %v4733_v45  ;;  %v5903_v17 = vpack.c.bf16 %v4941_v57, %v4939_v27 }
 0x9b9   :  { %5798 = vmatpush3.bf16.msra.mxu0 %v6460_v61  ;;  %v4940_v61 = vld [vmem:[%s8742_s12 + $0x10] sm:$0xff] }
 0x9ba   :  { %5799 = vmatprep.subr.bf16.mxu0 %v6461_v29  ;;  %v5905_v29 = vpack.c.bf16 %v4940_v61, %v4938_v7 }
 0x9bd   :  { %5800 = vmatpush3.bf16.msra.mxu0 %v6462_v22 }
 0x9be   :  { %5801 = vmatprep.subr.bf16.mxu0 %v6463_v18 }
 0x9c1   :  { %5802 = vmatpush3.bf16.msra.mxu0 %v6464_v0 }
 0x9c2   :  { %5815 = vmatprep.subr.bf16.mxu0 %v6465_v35 }
 0x9c4   :  { %4678 = vmatmul.mubr.bf16.vlgmr.msra.gmra.mrb[28].mxu0 %v4331_v62 }
 0x9c5   :  { %4685 = vmatprep.mubr.bf16.mxu0 %v4334_v25  ;;  %5816 = vmatpush3.bf16.msra.mxu0 %v6466_v26 }
 0x9c6   :  { %5817 = vmatprep.subr.bf16.mxu0 %v6467_v20 }
 0x9c9   :  { %5818 = vmatpush3.bf16.msra.mxu0 %v6468_v49 }
 0x9ca   :  { %5819 = vmatprep.subr.bf16.mxu0 %v6469_v63 }
 0x9cc   :  { %4686 = vmatmul.mubr.bf16.gmra.mrb[32].mxu0 %v4333_v8 }
 0x9cd   :  { %5820 = vmatpush3.bf16.msra.mxu0 %v6470_v52  ;;  %4911 = vmatprep.mubr.bf16.mxu0 %v4747_v1 }
 0x9ce   :  { %5821 = vmatprep.subr.bf16.mxu0 %v6471_v38 }
 0x9d1   :  { %5822 = vmatpush3.bf16.msra.mxu0 %v6472_v46 }
 0x9d2   :  { %5823 = vmatprep.subr.bf16.mxu0 %v6473_v14 }
 0x9d5   :  { %5824 = vmatpush3.bf16.msra.mxu0 %v6474_v39 }
 0x9d6   :  { %5825 = vmatprep.subr.bf16.mxu0 %v6475_v58 }
 0x9d9   :  { %5826 = vmatpush3.bf16.msra.mxu0 %v6476_v9 }
 0x9da   :  { %5827 = vmatprep.subr.bf16.mxu0 %v6477_v4 }
 0x9dd   :  { %5828 = vmatpush3.bf16.msra.mxu0 %v6478_v12 }
 0x9de   :  { %5829 = vmatprep.subr.bf16.mxu0 %v6479_v24 }
 0x9e1   :  { %5830 = vmatpush3.bf16.msra.mxu0 %v6480_v56 }
 0x9e2   :  { %5904 = vmatprep.subr.bf16.mxu0 %v5903_v17 }
 0x9e4   :  { %4912 = vmatmul.mubr.bf16.vlgmr.msra.gmra.mrb[36].mxu0 %v4746_v2 }
 0x9e5   :  { %4919 = vmatprep.mubr.bf16.mxu0 %v4749_v13  ;;  %5906 = vmatpush1.bf16.msra.mxu0 %v5905_v29  ;;  %v5044_v13 = vld [vmem:[%s8748_s1 + $0x8] sm:$0xff] }
 0x9ec   :  { %4920 = vmatmul.mubr.bf16.gmra.mrb[40].mxu0 %v4748_v44 }
 0x9ed   :  { %5018 = vmatprep.mubr.f32.mxu0 %v8813_v48 }
 0xa77   :  { %v5775_v22 = vpop.f32.mrb[20].mxu0 }
 0xa78   :  { %v5776_v18 = vpop.f32.mrb[21].mxu0 }
 0xa79   :  { %v5777_v0 = vadd.f32 %v5776_v18, %v5775_v22  ;;  %v5778_v35 = vpop.f32.mrb[22].mxu0 }
 0xa7a   :  { %v5779_v42 = vpop.f32.mrb[23].mxu0 }
 0xa7b   :  { %v5780_v30 = vadd.f32 %v5779_v42, %v5778_v35 }
 0xa7f   :  { %v5781_v26 = vpop.f32.mrb[24].mxu0 }
 0xa80   :  { %v5782_v11 = vpop.f32.mrb[25].mxu0 }
 0xa81   :  { %v5783_v62 = vadd.f32 %v5782_v11, %v5781_v26  ;;  %v5784_v20 = vpop.f32.mrb[26].mxu0 }
 0xa82   :  { %v5785_v25 = vpop.f32.mrb[27].mxu0 }
 0xa83   :  { %v5786_v32 = vadd.f32 %v5785_v25, %v5784_v20 }
 0xa97   :  { %v5803_v28 = vpop.f32.mrb[28].mxu0 }
 0xa98   :  { %v5804_v49 = vpop.f32.mrb[29].mxu0 }
 0xa99   :  { %v5805_v63 = vadd.f32 %v5804_v49, %v5803_v28  ;;  %v5806_v41 = vpop.f32.mrb[30].mxu0 }
 0xa9a   :  { %v5807_v51 = vpop.f32.mrb[31].mxu0 }
 0xa9b   :  { %v4680_v23 = vadd.f32 %v5805_v63, %v5777_v0  ;;  %v5808_v15 = vadd.f32 %v5807_v51, %v5806_v41 }
 0xa9d   :  { %v4683_v52 = vadd.f32 %v5808_v15, %v5780_v30 }
 0xa9f   :  { %v5809_v8 = vpop.f32.mrb[32].mxu0 }
 0xaa0   :  { %v5810_v31 = vpop.f32.mrb[33].mxu0 }
 0xaa1   :  { %v5811_v38 = vadd.f32 %v5810_v31, %v5809_v8  ;;  %v5812_v1 = vpop.f32.mrb[34].mxu0 }
 0xaa2   :  { %v5813_v46 = vpop.f32.mrb[35].mxu0 }
 0xaa3   :  { %v4688_v14 = vadd.f32 %v5811_v38, %v5783_v62  ;;  %v5814_v39 = vadd.f32 %v5813_v46, %v5812_v1 }
 0xaa5   :  { %v4691_v58 = vadd.f32 %v5814_v39, %v5786_v32 }
 0xab7   :  { %v5831_v9 = vpop.f32.mrb[36].mxu0 }
 0xab8   :  { %v5832_v4 = vpop.f32.mrb[37].mxu0 }
 0xab9   :  { %v5833_v47 = vadd.f32 %v5832_v4, %v5831_v9  ;;  %v5834_v12 = vpop.f32.mrb[38].mxu0 }
 0xaba   :  { %v5835_v24 = vpop.f32.mrb[39].mxu0 }
 0xabb   :  { %v4928_v59 = vadd.f32 %v5833_v47, %v4680_v23  ;;  %v5836_v53 = vadd.f32 %v5835_v24, %v5834_v12 }
 0xabd   :  { %v4934_v55 = vadd.f32 %v4933_v60, %v4928_v59  ;;  %v4929_v37 = vadd.f32 %v5836_v53, %v4683_v52 }
 0xabf   :  { %v5837_v56 = vpop.f32.mrb[40].mxu0  ;;  %5727 = vmatmul.mubr.msk.f32.vlgmr.msra.gmra.mrb[44].mxu0 %vm1891_vm3, %v4934_v55  ;;  %v4935_v5 = vadd.f32 %v4933_v60, %v4929_v37 }
 0xac0   :  { %v5838_v50 = vpop.f32.mrb[41].mxu0  ;;  %5024 = vmatprep.mubr.f32.mxu0 %v8813_v48 }
 0xac1   :  { %v5839_v10 = vadd.f32 %v5838_v50, %v5837_v56  ;;  %v5840_v36 = vpop.f32.mrb[42].mxu0 }
 0xac2   :  { %v5841_v40 = vpop.f32.mrb[43].mxu0 }
 0xac3   :  { %v4930_v19 = vadd.f32 %v5839_v10, %v4688_v14  ;;  %v5842_v43 = vadd.f32 %v5841_v40, %v5840_v36  ;;  %5728 = vmatmul.mubr.msk.f32.gmra.mrb[46].mxu0 %vm1891_vm3, %v4935_v5 }
 0xac4   :  { %5030 = vmatprep.mubr.f32.mxu0 %v8813_v48 }
 0xac5   :  { %v4936_v3 = vadd.f32 %v4933_v60, %v4930_v19  ;;  %v4931_v2 = vadd.f32 %v5842_v43, %v4691_v58 }
 0xac7   :  { %5729 = vmatmul.mubr.msk.f32.gmra.mrb[48].mxu0 %vm1891_vm3, %v4936_v3  ;;  %v4937_v45 = vadd.f32 %v4933_v60, %v4931_v2 }
 0xac8   :  { %5036 = vmatprep.mubr.f32.mxu0 %v8813_v48 }
 0xacb   :  { %5730 = vmatmul.mubr.msk.f32.gmra.mrb[50].mxu0 %vm1891_vm3, %v4937_v45 }
 0xb92   :  { %v5020_v6 = vpop.f32.mrb[44].mxu0 }
 0xb93   :  { %v5051_v33 = vadd.f32 %v5043_v54, %v5020_v6  ;;  %v5022_v21 = vpop.f32.mrb[45].mxu0 }
 0xb94   :  { %v5052_v16 = vadd.f32 %v5044_v13, %v5022_v21 }
 0xb95   :  { %5059 = vst [vmem:[%s8749_s14] sm:$0xff] %v5051_v33 }
 0xb96   :  { %v5026_v44 = vpop.f32.mrb[46].mxu0 }
 0xb97   :  { %v5053_v27 = vadd.f32 %v5045_v34, %v5026_v44  ;;  %v5028_v57 = vpop.f32.mrb[47].mxu0 }
 0xb9a   :  { %v5032_v29 = vpop.f32.mrb[48].mxu0 }
 0xb9b   :  { %v5034_v18 = vpop.f32.mrb[49].mxu0 }
 0xb9c   :  { %v5046_v48 = vld [vmem:[%s8748_s1 + $0x18] sm:$0xff] }
 0xb9d   :  { %5060 = vst [vmem:[%s8749_s14 + $0x8] sm:$0xff] %v5052_v16  ;;  %v5054_v7 = vadd.f32 %v5046_v48, %v5028_v57 }
 0xb9e   :  { %v5038_v30 = vpop.f32.mrb[50].mxu0 }
 0xb9f   :  { %v5040_v11 = vpop.f32.mrb[51].mxu0 }
 0xba4   :  { %v5047_v17 = vld [vmem:[%s8748_s1 + $0x20] sm:$0xff] }
 0xba5   :  { %5061 = vst [vmem:[%s8749_s14 + $0x10] sm:$0xff] %v5053_v27  ;;  %v5055_v22 = vadd.f32 %v5047_v17, %v5032_v29 }
 0xbac   :  { %v5048_v61 = vld [vmem:[%s8748_s1 + $0x28] sm:$0xff] }
 0xbad   :  { %5062 = vst [vmem:[%s8749_s14 + $0x18] sm:$0xff] %v5054_v7  ;;  %v5056_v0 = vadd.f32 %v5048_v61, %v5034_v18 }
 0xbb4   :  { %v5049_v35 = vld [vmem:[%s8748_s1 + $0x30] sm:$0xff] }
 0xbb5   :  { %5063 = vst [vmem:[%s8749_s14 + $0x20] sm:$0xff] %v5055_v22  ;;  %v5057_v26 = vadd.f32 %v5049_v35, %v5038_v30 }
 0xbbc   :  { %v5050_v42 = vld [vmem:[%s8748_s1 + $0x38] sm:$0xff] }
 0xbbd   :  { %5064 = vst [vmem:[%s8749_s14 + $0x28] sm:$0xff] %v5056_v0  ;;  %v5058_v62 = vadd.f32 %v5050_v42, %v5040_v11  ;;  %5065 = vst [vmem:[%s8749_s14 + $0x30] sm:$0xff] %v5057_v26 }
 0xbbf   :  { %5066 = vst [vmem:[%s8749_s14 + $0x38] sm:$0xff] %v5058_v62 }

</bundles_post_ra>
